<compile_context>
chip_gen: v5e
topology: v5e:2x2
jax: 0.10.0
libtpu: 0.0.40
codegen_flags: <defaults>
</compile_context>

<pallas_src>
import functools

import jax
import jax.numpy as jnp
import numpy as np
from jax.experimental import pallas as pl
from jax.experimental.pallas import tpu as pltpu

_INV_SQRT2 = 0.7071067811865476


def _erf(z):
    """Abramowitz & Stegun 7.1.26 polynomial erf, |abs err| < 1.5e-7."""
    p = 0.3275911
    a1, a2, a3, a4, a5 = (0.254829592, -0.284496736, 1.421413741,
                          -1.453152027, 1.061405429)
    az = jnp.abs(z)
    t = 1.0 / (1.0 + p * az)
    poly = ((((a5 * t + a4) * t + a3) * t + a2) * t + a1) * t
    y = 1.0 - poly * jnp.exp(-az * az)
    return jnp.where(z >= 0.0, y, -y)


def _gelu_exact(z):
    # Matches torch nn.GELU() (approximate='none') to float32 accuracy.
    return 0.5 * z * (1.0 + _erf(z * _INV_SQRT2))


def spectral_conv_kernel(x_ref, a_ref, bias_ref, birfft_ref, mmean_ref,
                         gamma_ref, beta_ref, out_ref, *, eps):
    """One grid step: SB samples; rows = samples, lanes = (channel, time)."""
    x = x_ref[...].astype(jnp.float32)                          # (SB, C*T)

    # rfft + grouped Conv1d over frequency (real & imag groups), one matmul.
    y = jnp.dot(x, a_ref[...], preferred_element_type=jnp.float32)
    y = _gelu_exact(y + bias_ref[...])                          # (SB, 2*C*Tf)

    # irfft + per-(sample, time) channel-mean removal, fused into one matmul.
    cen = jnp.dot(y, birfft_ref[...],
                  preferred_element_type=jnp.float32)           # (SB, C*T)

    # LayerNorm variance over channels via the group-mean matmul.
    var = jnp.dot(cen * cen, mmean_ref[...],
                  preferred_element_type=jnp.float32)           # (SB, C*T)

    out = cen * jax.lax.rsqrt(var + eps) * gamma_ref[...] + beta_ref[...]
    out_ref[...] = out.astype(out_ref.dtype)


@functools.lru_cache(maxsize=None)
def _spectral_constants(C, T, ksize):
    """Weight-independent DFT / irfft / LayerNorm matrices (cached, numpy)."""
    Tf = T // 2 + 1
    pad = ksize // 2
    tt = np.arange(T, dtype=np.float64)
    ff = np.arange(Tf, dtype=np.float64)
    ang = 2.0 * np.pi * ff[:, None] * tt[None, :] / T           # (Tf, T)
    Fr = np.cos(ang)                                            # Re(rfft)
    Fi = -np.sin(ang)                                           # Im(rfft)

    def shift_rows(m, delta):                                   # rows out of range -> 0
        out = np.zeros_like(m)
        if delta == 0:
            out[:] = m
        elif delta > 0:
            out[:Tf - delta] = m[delta:]
        else:
            out[-delta:] = m[:Tf + delta]
        return out

    # Conv tap dk reads input frequency f + dk - pad -> fold into shifted DFTs.
    FrS = np.stack([shift_rows(Fr, dk - pad) for dk in range(ksize)])
    FiS = np.stack([shift_rows(Fi, dk - pad) for dk in range(ksize)])

    # irfft (n=T, 'backward' normalization).  The imaginary weights at DC and
    # Nyquist are irrelevant because sin vanishes at integer sample points.
    wgt = np.full((Tf,), 2.0)
    wgt[0] = 1.0
    if T % 2 == 0:
        wgt[Tf - 1] = 1.0
    Gr = (wgt[None, :] * np.cos(ang.T)) / T                     # (T, Tf)
    Gi = (-wgt[None, :] * np.sin(ang.T)) / T

    # Per-channel irfft fused with the LayerNorm channel-mean removal.
    eyeC = np.eye(C)
    Br = np.kron(eyeC, Gr)                                      # (C*T, C*Tf)
    Bi = np.kron(eyeC, Gi)
    Mmean = np.kron(np.full((C, C), 1.0 / C), np.eye(T))        # (C*T, C*T)
    cenM = np.eye(C * T) - Mmean
    Birfft = np.concatenate([(cenM @ Br).T, (cenM @ Bi).T], axis=0)  # (2CTf, CT)

    return (FrS.astype(np.float32), FiS.astype(np.float32),
            Birfft.astype(np.float32), Mmean.astype(np.float32))


def _pick_block_samples(S):
    """Largest sample-block that divides S, obeys the sublane rule, and keeps
    the grid >= 2 when possible (feeds both v7x TensorCores)."""
    target = min(S, 512)
    if S >= 16:
        target = min(target, S // 2)
    for sb in range(target, 0, -1):
        if S % sb == 0 and (sb % 8 == 0 or sb == S):
            return sb
    return S


@functools.partial(jax.jit,
                   static_argnames=("kernel_size", "block_samples", "eps"))
def spectral_conv_layer(x, conv_w, conv_b, ln_gamma, ln_beta, *,
                        kernel_size=3, block_samples=None, eps=1e-5):
    """x: (batch, nodes, channels, time_steps) -> same shape (as the module)."""
    B, N, C, T = x.shape
    assert kernel_size % 2 == 1
    S = B * N
    Tf = T // 2 + 1
    L = C * T
    f32 = jnp.float32

    FrS, FiS, Birfft, Mmean = (jnp.asarray(m)
                               for m in _spectral_constants(C, T, kernel_size))

    # Fuse (rfft -> grouped Conv1d) into a single (C*T, 2*C*Tf) matrix so the
    # whole spectral conv is one right-multiplication on the lane axis.
    Wr = conv_w[:C].astype(f32)                                 # (C, C, k) real group
    Wi = conv_w[C:].astype(f32)                                 # (C, C, k) imag group
    Ar = jnp.einsum('ocd,dft->ofct', Wr, FrS).reshape(C * Tf, L)
    Ai = jnp.einsum('ocd,dft->ofct', Wi, FiS).reshape(C * Tf, L)
    A = jnp.concatenate([Ar, Ai], axis=0).T                     # (C*T, 2*C*Tf)
    bias = jnp.concatenate(
        [jnp.repeat(conv_b[:C].astype(f32), Tf),
         jnp.repeat(conv_b[C:].astype(f32), Tf)]).reshape(1, 2 * C * Tf)
    gamma_l = jnp.repeat(ln_gamma.astype(f32), T).reshape(1, L)
    beta_l = jnp.repeat(ln_beta.astype(f32), T).reshape(1, L)

    SB = _pick_block_samples(S) if block_samples is None else block_samples
    assert S % SB == 0 and (SB % 8 == 0 or SB == S), (S, SB)

    # Native (sample, channel*time) layout: a pure reshape (no HBM relayout);
    # every (SB, C*T) block DMA is a fully contiguous chunk.
    x2 = x.reshape(S, L)

    kernel = functools.partial(spectral_conv_kernel, eps=eps)

    def _const_spec(arr):
        nd = arr.ndim
        return pl.BlockSpec(arr.shape, lambda i: (0,) * nd)

    out2 = pl.pallas_call(
        kernel,
        out_shape=jax.ShapeDtypeStruct((S, L), x.dtype),
        grid=(S // SB,),
        in_specs=[
            pl.BlockSpec((SB, L), lambda i: (i, 0)),            # activations
            _const_spec(A),                                     # fused rfft + conv
            _const_spec(bias),                                  # conv bias (lanes)
            _const_spec(Birfft),                                # fused irfft + center
            _const_spec(Mmean),                                 # LN group-mean matrix
            _const_spec(gamma_l),                               # LN gamma
            _const_spec(beta_l),                                # LN beta
        ],
        out_specs=pl.BlockSpec((SB, L), lambda i: (i, 0)),
        compiler_params=pltpu.CompilerParams(
            dimension_semantics=("parallel",)),
    )(x2, A, bias, Birfft, Mmean, gamma_l, beta_l)

    # (S, C*T) -> (B, N, C, T): pure reshape, no HBM relayout.
    return out2.reshape(B, N, C, T)


def spectral_conv_layer_ref(x, conv_w, conv_b, ln_gamma, ln_beta, *,
                            kernel_size=3, eps=1e-5):
    """Pure-JAX reference mirroring the PyTorch forward."""
    B, N, C, T = x.shape
    pad = kernel_size // 2
    xr = x.reshape(B * N, C, T).astype(jnp.float32)
    xf = jnp.fft.rfft(xr, axis=-1)
    xc = jnp.concatenate([jnp.real(xf), jnp.imag(xf)], axis=1)      # (BN, 2C, Tf)
    y = jax.lax.conv_general_dilated(
        xc, conv_w.astype(jnp.float32),
        window_strides=(1,), padding=[(pad, pad)],
        dimension_numbers=("NCH", "OIH", "NCH"),
        feature_group_count=2)
    y = y + conv_b.astype(jnp.float32)[None, :, None]
    y = jax.nn.gelu(y, approximate=False)
    yr, yi = y[:, :C], y[:, C:]
    xi = jnp.fft.irfft(yr + 1j * yi, n=T, axis=-1)                  # (BN, C, T)
    xo = xi.reshape(B, N, C, T).transpose(0, 1, 3, 2)               # (B, N, T, C)
    mean = xo.mean(axis=-1, keepdims=True)
    var = ((xo - mean) ** 2).mean(axis=-1, keepdims=True)
    xo = (xo - mean) * jax.lax.rsqrt(var + eps) * ln_gamma + ln_beta
    return xo.transpose(0, 1, 3, 2).astype(x.dtype)


if __name__ == "__main__":
    # [batch, nodes, channels, time_steps]
    B, N, C, T = 2, 16, 32, 16
    K = 3

    key = jax.random.PRNGKey(0)
    kx, kw, kb, kg, kb2 = jax.random.split(key, 5)
    x = jax.random.normal(kx, (B, N, C, T), jnp.float32)
    conv_w = jax.random.normal(kw, (2 * C, C, K), jnp.float32) / jnp.sqrt(
        jnp.float32(C * K))
    conv_b = 0.1 * jax.random.normal(kb, (2 * C,), jnp.float32)
    ln_gamma = 1.0 + 0.1 * jax.random.normal(kg, (C,), jnp.float32)
    ln_beta = 0.1 * jax.random.normal(kb2, (C,), jnp.float32)

    out = spectral_conv_layer(x, conv_w, conv_b, ln_gamma, ln_beta,
                              kernel_size=K)
    out = jax.block_until_ready(out)

    ref = spectral_conv_layer_ref(x, conv_w, conv_b, ln_gamma, ln_beta,
                                  kernel_size=K)
    ref = jax.block_until_ready(ref)

    assert out.shape == (B, N, C, T)
    # Tolerance covers MXU f32-emulation matmuls used for the DFT/conv.
    assert jnp.allclose(out, ref, atol=2e-2, rtol=2e-2), \
        float(jnp.max(jnp.abs(out - ref)))
    print("KERNEL_OK")
</pallas_src>

<mosaic_0001>
module attributes {stable_mosaic.version = 11 : i64} {
  func.func @spectral_conv_kernel(%arg0: i32, %arg1: memref<16x512xf32, #tpu.memory_space<vmem>>, %arg2: memref<512x576xf32, #tpu.memory_space<vmem>>, %arg3: memref<1x576xf32, #tpu.memory_space<vmem>>, %arg4: memref<576x512xf32, #tpu.memory_space<vmem>>, %arg5: memref<512x512xf32, #tpu.memory_space<vmem>>, %arg6: memref<1x512xf32, #tpu.memory_space<vmem>>, %arg7: memref<1x512xf32, #tpu.memory_space<vmem>>, %arg8: memref<16x512xf32, #tpu.memory_space<vmem>>) attributes {dimension_semantics = [#tpu.dimension_semantics<parallel>], iteration_bounds = array<i64: 2>, scalar_prefetch = 0 : i64, scratch_operands = 0 : i64, tpu.core_type = #tpu.core_type<tc>, window_params = [{transform_indices = @transform_0, window_bounds = array<i64: 16, 512>}, {pipeline_mode = #tpu.pipeline_mode<synchronous>, transform_indices = @transform_1, window_bounds = array<i64: 512, 576>}, {pipeline_mode = #tpu.pipeline_mode<synchronous>, transform_indices = @transform_2, window_bounds = array<i64: 1, 576>}, {pipeline_mode = #tpu.pipeline_mode<synchronous>, transform_indices = @transform_3, window_bounds = array<i64: 576, 512>}, {pipeline_mode = #tpu.pipeline_mode<synchronous>, transform_indices = @transform_4, window_bounds = array<i64: 512, 512>}, {pipeline_mode = #tpu.pipeline_mode<synchronous>, transform_indices = @transform_5, window_bounds = array<i64: 1, 512>}, {pipeline_mode = #tpu.pipeline_mode<synchronous>, transform_indices = @transform_6, window_bounds = array<i64: 1, 512>}, {transform_indices = @transform_7, window_bounds = array<i64: 16, 512>}]} {
    %c0 = arith.constant 0 : index
    %c0_0 = arith.constant 0 : index
    %0 = vector.load %arg1[%c0, %c0_0] : memref<16x512xf32, #tpu.memory_space<vmem>>, vector<16x512xf32>
    %c0_1 = arith.constant 0 : index
    %c0_2 = arith.constant 0 : index
    %1 = vector.load %arg2[%c0_1, %c0_2] : memref<512x576xf32, #tpu.memory_space<vmem>>, vector<512x576xf32>
    %cst = arith.constant dense<0.000000e+00> : vector<16x576xf32>
    %2 = tpu.matmul %0, %1, %cst {dimension_numbers = #tpu.dot_dimension_numbers<[1], [0], [0], [1], [0, 0, 1, 1], [], []>} : vector<16x512xf32>, vector<512x576xf32>, vector<16x576xf32> -> vector<16x576xf32>
    %c0_3 = arith.constant 0 : index
    %c0_4 = arith.constant 0 : index
    %3 = vector.load %arg3[%c0_3, %c0_4] : memref<1x576xf32, #tpu.memory_space<vmem>>, vector<1x576xf32>
    %4 = vector.broadcast %3 : vector<1x576xf32> to vector<16x576xf32>
    %5 = arith.addf %2, %4 : vector<16x576xf32>
    %cst_5 = arith.constant 5.000000e-01 : f32
    %6 = vector.broadcast %cst_5 : f32 to vector<16x576xf32>
    %7 = arith.mulf %6, %5 : vector<16x576xf32>
    %cst_6 = arith.constant 0.707106769 : f32
    %8 = vector.broadcast %cst_6 : f32 to vector<16x576xf32>
    %9 = arith.mulf %5, %8 : vector<16x576xf32>
    %10 = math.absf %9 : vector<16x576xf32>
    %cst_7 = arith.constant 0.327591091 : f32
    %11 = vector.broadcast %cst_7 : f32 to vector<16x576xf32>
    %12 = arith.mulf %11, %10 : vector<16x576xf32>
    %cst_8 = arith.constant 1.000000e+00 : f32
    %13 = vector.broadcast %cst_8 : f32 to vector<16x576xf32>
    %14 = arith.addf %13, %12 : vector<16x576xf32>
    %cst_9 = arith.constant 1.000000e+00 : f32
    %15 = vector.broadcast %cst_9 : f32 to vector<16x576xf32>
    %16 = arith.divf %15, %14 : vector<16x576xf32>
    %cst_10 = arith.constant 1.06140542 : f32
    %17 = vector.broadcast %cst_10 : f32 to vector<16x576xf32>
    %18 = arith.mulf %17, %16 : vector<16x576xf32>
    %cst_11 = arith.constant -1.45315206 : f32
    %19 = vector.broadcast %cst_11 : f32 to vector<16x576xf32>
    %20 = arith.addf %18, %19 : vector<16x576xf32>
    %21 = arith.mulf %20, %16 : vector<16x576xf32>
    %cst_12 = arith.constant 1.42141378 : f32
    %22 = vector.broadcast %cst_12 : f32 to vector<16x576xf32>
    %23 = arith.addf %21, %22 : vector<16x576xf32>
    %24 = arith.mulf %23, %16 : vector<16x576xf32>
    %cst_13 = arith.constant -0.284496725 : f32
    %25 = vector.broadcast %cst_13 : f32 to vector<16x576xf32>
    %26 = arith.addf %24, %25 : vector<16x576xf32>
    %27 = arith.mulf %26, %16 : vector<16x576xf32>
    %cst_14 = arith.constant 0.254829586 : f32
    %28 = vector.broadcast %cst_14 : f32 to vector<16x576xf32>
    %29 = arith.addf %27, %28 : vector<16x576xf32>
    %30 = arith.mulf %29, %16 : vector<16x576xf32>
    %cst_15 = arith.constant 0.000000e+00 : f32
    %31 = vector.broadcast %cst_15 : f32 to vector<16x576xf32>
    %32 = arith.subf %31, %10 : vector<16x576xf32>
    %33 = arith.mulf %32, %10 : vector<16x576xf32>
    %34 = math.exp %33 : vector<16x576xf32>
    %35 = arith.mulf %30, %34 : vector<16x576xf32>
    %cst_16 = arith.constant 1.000000e+00 : f32
    %36 = vector.broadcast %cst_16 : f32 to vector<16x576xf32>
    %37 = arith.subf %36, %35 : vector<16x576xf32>
    %cst_17 = arith.constant 0.000000e+00 : f32
    %38 = vector.broadcast %cst_17 : f32 to vector<16x576xf32>
    %39 = arith.cmpf oge, %9, %38 : vector<16x576xf32>
    %cst_18 = arith.constant 0.000000e+00 : f32
    %40 = vector.broadcast %cst_18 : f32 to vector<16x576xf32>
    %41 = arith.subf %40, %37 : vector<16x576xf32>
    %42 = arith.select %39, %37, %41 : vector<16x576xi1>, vector<16x576xf32>
    %cst_19 = arith.constant 1.000000e+00 : f32
    %43 = vector.broadcast %cst_19 : f32 to vector<16x576xf32>
    %44 = arith.addf %43, %42 : vector<16x576xf32>
    %45 = arith.mulf %7, %44 : vector<16x576xf32>
    %c0_20 = arith.constant 0 : index
    %c0_21 = arith.constant 0 : index
    %46 = vector.load %arg4[%c0_20, %c0_21] : memref<576x512xf32, #tpu.memory_space<vmem>>, vector<576x512xf32>
    %cst_22 = arith.constant dense<0.000000e+00> : vector<16x512xf32>
    %47 = tpu.matmul %45, %46, %cst_22 {dimension_numbers = #tpu.dot_dimension_numbers<[1], [0], [0], [1], [0, 0, 1, 1], [], []>} : vector<16x576xf32>, vector<576x512xf32>, vector<16x512xf32> -> vector<16x512xf32>
    %48 = arith.mulf %47, %47 : vector<16x512xf32>
    %c0_23 = arith.constant 0 : index
    %c0_24 = arith.constant 0 : index
    %49 = vector.load %arg5[%c0_23, %c0_24] : memref<512x512xf32, #tpu.memory_space<vmem>>, vector<512x512xf32>
    %cst_25 = arith.constant dense<0.000000e+00> : vector<16x512xf32>
    %50 = tpu.matmul %48, %49, %cst_25 {dimension_numbers = #tpu.dot_dimension_numbers<[1], [0], [0], [1], [0, 0, 1, 1], [], []>} : vector<16x512xf32>, vector<512x512xf32>, vector<16x512xf32> -> vector<16x512xf32>
    %cst_26 = arith.constant 9.99999974E-6 : f32
    %51 = vector.broadcast %cst_26 : f32 to vector<16x512xf32>
    %52 = arith.addf %50, %51 : vector<16x512xf32>
    %53 = math.rsqrt %52 : vector<16x512xf32>
    %54 = arith.mulf %47, %53 : vector<16x512xf32>
    %c0_27 = arith.constant 0 : index
    %c0_28 = arith.constant 0 : index
    %55 = vector.load %arg6[%c0_27, %c0_28] : memref<1x512xf32, #tpu.memory_space<vmem>>, vector<1x512xf32>
    %56 = vector.broadcast %55 : vector<1x512xf32> to vector<16x512xf32>
    %57 = arith.mulf %54, %56 : vector<16x512xf32>
    %c0_29 = arith.constant 0 : index
    %c0_30 = arith.constant 0 : index
    %58 = vector.load %arg7[%c0_29, %c0_30] : memref<1x512xf32, #tpu.memory_space<vmem>>, vector<1x512xf32>
    %59 = vector.broadcast %58 : vector<1x512xf32> to vector<16x512xf32>
    %60 = arith.addf %57, %59 : vector<16x512xf32>
    %c0_31 = arith.constant 0 : index
    %c0_32 = arith.constant 0 : index
    %61 = vector.load %arg8[%c0_31, %c0_32] : memref<16x512xf32, #tpu.memory_space<vmem>>, vector<16x512xf32>
    tpu.vector_store %arg8[%c0_31, %c0_32], %60 {strides = array<i32>} : memref<16x512xf32, #tpu.memory_space<vmem>>, vector<16x512xf32>,
    return
  }
  func.func @transform_0(%arg0: i32) -> (i32, i32) {
    %c0_i32 = arith.constant 0 : i32
    %c0_i32_0 = arith.constant 0 : i32
    return %arg0, %c0_i32 : i32, i32
  }
  func.func @transform_1(%arg0: i32) -> (i32, i32) {
    %c0_i32 = arith.constant 0 : i32
    %c0_i32_0 = arith.constant 0 : i32
    %c0_i32_1 = arith.constant 0 : i32
    return %c0_i32, %c0_i32_0 : i32, i32
  }
  func.func @transform_2(%arg0: i32) -> (i32, i32) {
    %c0_i32 = arith.constant 0 : i32
    %c0_i32_0 = arith.constant 0 : i32
    %c0_i32_1 = arith.constant 0 : i32
    return %c0_i32, %c0_i32_0 : i32, i32
  }
  func.func @transform_3(%arg0: i32) -> (i32, i32) {
    %c0_i32 = arith.constant 0 : i32
    %c0_i32_0 = arith.constant 0 : i32
    %c0_i32_1 = arith.constant 0 : i32
    return %c0_i32, %c0_i32_0 : i32, i32
  }
  func.func @transform_4(%arg0: i32) -> (i32, i32) {
    %c0_i32 = arith.constant 0 : i32
    %c0_i32_0 = arith.constant 0 : i32
    %c0_i32_1 = arith.constant 0 : i32
    return %c0_i32, %c0_i32_0 : i32, i32
  }
  func.func @transform_5(%arg0: i32) -> (i32, i32) {
    %c0_i32 = arith.constant 0 : i32
    %c0_i32_0 = arith.constant 0 : i32
    %c0_i32_1 = arith.constant 0 : i32
    return %c0_i32, %c0_i32_0 : i32, i32
  }
  func.func @transform_6(%arg0: i32) -> (i32, i32) {
    %c0_i32 = arith.constant 0 : i32
    %c0_i32_0 = arith.constant 0 : i32
    %c0_i32_1 = arith.constant 0 : i32
    return %c0_i32, %c0_i32_0 : i32, i32
  }
  func.func @transform_7(%arg0: i32) -> (i32, i32) {
    %c0_i32 = arith.constant 0 : i32
    %c0_i32_0 = arith.constant 0 : i32
    return %arg0, %c0_i32 : i32, i32
  }
}

</mosaic_0001>

<bundles_post_ra>
// kernel: spectral_conv_layer.1
= control target key start
LH: loop header
LB: loop body
LE: loop exit
PB: predicated region body
PF: predicated region fallthrough
CT: control target
= control target key end

     0   :  { %s3208_s24 = smov 0   ;;  %s6487_s0 = inlined_call_operand.vmem [shape: f32[32,512], index: 0, kind: input, shape index: {}]   ;;  %s6488_s1 = inlined_call_operand.vmem [shape: f32[512,576], index: 1, kind: input, shape index: {}]   ;;  %s6489_s2 = inlined_call_operand.vmem [shape: f32[1,576], index: 2, kind: input, shape index: {}]   ;;  %s6490_s3 = inlined_call_operand.vmem [shape: f32[576,512], index: 3, kind: input, shape index: {}]   ;;  %s6491_s4 = inlined_call_operand.vmem [shape: f32[512,512], index: 4, kind: input, shape index: {}]   ;;  %s6492_s5 = inlined_call_operand.vmem [shape: f32[1,512], index: 5, kind: input, shape index: {}]   ;;  %s6493_s6 = inlined_call_operand.vmem [shape: f32[1,512], index: 6, kind: input, shape index: {}]   ;;  %s6494_s7 = inlined_call_operand.vmem [shape: f32[32,512], index: 7, kind: output, shape index: {}]  }
   0x1 LB: > { %s3064_s25 = sadd.s32 4294967295, %s3166_s24   ;;  %p3068_p0 = scmp.ge.s32.totalorder %s3166_s24, 1  ;;  %s3166_s24 = sphi %s3208_s24, %s17_s24  }
   0x2   : > { %p239_p1 = scmp.lt.s32.totalorder %s3166_s24, 3 }
   0x4   : > { %p240_p2 = pnand %p3068_p0, %p239_p1 }
   0x5   : > { %s3308_s21 = sshll.u32 (!%p240_p2), %s3064_s25, 1 }
   0x6   : > { %243 = sbr.rel (%p240_p2) target bundleno = 812 (0x32c), region = 48  ;;  %p274_p3 = scmp.lt.s32.totalorder (!%p240_p2), %s3308_s21, 3 }
   0xb   : > { %v530_v0 = vld [vmem:[%s6488_s1 + $0x758] sm:$0xff]  ;;  %v525_v2 = vld [vmem:[%s6488_s1 + $0x730] sm:$0xff]  ;;  %v520_v6 = vld [vmem:[%s6488_s1 + $0x708] sm:$0xff]  ;;  %s6514_s21 = smov (!%p274_p3, %s3308_s21), 3 }
   0xc   : > { %v370_v1 = vld [vmem:[%s6488_s1 + $0x258] sm:$0xff]  ;;  %673 = vmatpush.msra.mxu2 %v530_v0  ;;  %v365_v4 = vld [vmem:[%s6488_s1 + $0x230] sm:$0xff]  ;;  %v360_v8 = vld [vmem:[%s6488_s1 + $0x208] sm:$0xff]  ;;  %s3085_s26 = sshll.u32 %s6514_s21, 5 }
   0xd   : > { %627 = vmatpush.msra.mxu0 %v370_v1  ;;  %v610_v3 = vld [vmem:[%s6488_s1 + $0x9d8] sm:$0xff]  ;;  %v605_v7 = vld [vmem:[%s6488_s1 + $0x9b0] sm:$0xff]  ;;  %v600_v10 = vld [vmem:[%s6488_s1 + $0x988] sm:$0xff]  ;;  %s3406_s17 = scalar_lea.vmem %s6487_s0, %s3085_s26  ;;  %s6461_s25 = scalar_lea.vmem %s6494_s7, %s3085_s26 }
   0xe   : > { %v450_v5 = vld [vmem:[%s6488_s1 + $0x4d8] sm:$0xff]  ;;  %696 = vmatpush.msra.mxu3 %v610_v3  ;;  %674 = vmatpush.msra.mxu2 %v525_v2  ;;  %v445_v9 = vld [vmem:[%s6488_s1 + $0x4b0] sm:$0xff]  ;;  %v515_v11 = vld [vmem:[%s6488_s1 + $0x6e0] sm:$0xff] }
   0xf   : > { %650 = vmatpush.msra.mxu1 %v450_v5  ;;  %628 = vmatpush.msra.mxu0 %v365_v4  ;;  %v355_v12 = vld [vmem:[%s6488_s1 + $0x1e0] sm:$0xff]  ;;  %v440_v13 = vld [vmem:[%s6488_s1 + $0x488] sm:$0xff]  ;;  %v510_v16 = vld [vmem:[%s6488_s1 + $0x6b8] sm:$0xff] }
  0x10   : > { %697 = vmatpush.msra.mxu3 %v605_v7  ;;  %675 = vmatpush.msra.mxu2 %v520_v6  ;;  %v595_v14 = vld [vmem:[%s6488_s1 + $0x960] sm:$0xff]  ;;  %v350_v17 = vld [vmem:[%s6488_s1 + $0x1b8] sm:$0xff]  ;;  %v505_v20 = vld [vmem:[%s6488_s1 + $0x690] sm:$0xff] }
  0x11   : > { %651 = vmatpush.msra.mxu1 %v445_v9  ;;  %629 = vmatpush.msra.mxu0 %v360_v8  ;;  %v435_v15 = vld [vmem:[%s6488_s1 + $0x460] sm:$0xff]  ;;  %v590_v18 = vld [vmem:[%s6488_s1 + $0x938] sm:$0xff]  ;;  %v345_v21 = vld [vmem:[%s6488_s1 + $0x190] sm:$0xff] }
  0x12   : > { %698 = vmatpush.msra.mxu3 %v600_v10  ;;  %676 = vmatpush.msra.mxu2 %v515_v11  ;;  %v430_v19 = vld [vmem:[%s6488_s1 + $0x438] sm:$0xff]  ;;  %v585_v22 = vld [vmem:[%s6488_s1 + $0x910] sm:$0xff]  ;;  %v500_v24 = vld [vmem:[%s6488_s1 + $0x668] sm:$0xff] }
  0x13   : > { %652 = vmatpush.msra.mxu1 %v440_v13  ;;  %630 = vmatpush.msra.mxu0 %v355_v12  ;;  %v425_v23 = vld [vmem:[%s6488_s1 + $0x410] sm:$0xff]  ;;  %v340_v25 = vld [vmem:[%s6488_s1 + $0x168] sm:$0xff]  ;;  %v495_v28 = vld [vmem:[%s6488_s1 + $0x640] sm:$0xff] }
  0x14   : > { %699 = vmatpush.msra.mxu3 %v595_v14  ;;  %677 = vmatpush.msra.mxu2 %v510_v16  ;;  %v580_v26 = vld [vmem:[%s6488_s1 + $0x8e8] sm:$0xff]  ;;  %v335_v29 = vld [vmem:[%s6488_s1 + $0x140] sm:$0xff]  ;;  %v490_v32 = vld [vmem:[%s6488_s1 + $0x618] sm:$0xff] }
  0x15   : > { %653 = vmatpush.msra.mxu1 %v435_v15  ;;  %631 = vmatpush.msra.mxu0 %v350_v17  ;;  %v420_v27 = vld [vmem:[%s6488_s1 + $0x3e8] sm:$0xff]  ;;  %v575_v30 = vld [vmem:[%s6488_s1 + $0x8c0] sm:$0xff]  ;;  %v330_v33 = vld [vmem:[%s6488_s1 + $0x118] sm:$0xff] }
  0x16   : > { %700 = vmatpush.msra.mxu3 %v590_v18  ;;  %678 = vmatpush.msra.mxu2 %v505_v20  ;;  %v415_v31 = vld [vmem:[%s6488_s1 + $0x3c0] sm:$0xff]  ;;  %v570_v34 = vld [vmem:[%s6488_s1 + $0x898] sm:$0xff]  ;;  %v485_v36 = vld [vmem:[%s6488_s1 + $0x5f0] sm:$0xff] }
  0x17   : > { %654 = vmatpush.msra.mxu1 %v430_v19  ;;  %632 = vmatpush.msra.mxu0 %v345_v21  ;;  %v410_v35 = vld [vmem:[%s6488_s1 + $0x398] sm:$0xff]  ;;  %v325_v37 = vld [vmem:[%s6488_s1 + $0xf0] sm:$0xff]  ;;  %v480_v40 = vld [vmem:[%s6488_s1 + $0x5c8] sm:$0xff] }
  0x18   : > { %701 = vmatpush.msra.mxu3 %v585_v22  ;;  %679 = vmatpush.msra.mxu2 %v500_v24  ;;  %v565_v38 = vld [vmem:[%s6488_s1 + $0x870] sm:$0xff]  ;;  %v320_v41 = vld [vmem:[%s6488_s1 + $0xc8] sm:$0xff]  ;;  %v475_v44 = vld [vmem:[%s6488_s1 + $0x5a0] sm:$0xff] }
  0x19   : > { %655 = vmatpush.msra.mxu1 %v425_v23  ;;  %633 = vmatpush.msra.mxu0 %v340_v25  ;;  %v405_v39 = vld [vmem:[%s6488_s1 + $0x370] sm:$0xff]  ;;  %v560_v42 = vld [vmem:[%s6488_s1 + $0x848] sm:$0xff]  ;;  %v315_v45 = vld [vmem:[%s6488_s1 + $0xa0] sm:$0xff] }
  0x1a   : > { %702 = vmatpush.msra.mxu3 %v580_v26  ;;  %680 = vmatpush.msra.mxu2 %v495_v28  ;;  %v400_v43 = vld [vmem:[%s6488_s1 + $0x348] sm:$0xff]  ;;  %v555_v46 = vld [vmem:[%s6488_s1 + $0x820] sm:$0xff]  ;;  %v470_v48 = vld [vmem:[%s6488_s1 + $0x578] sm:$0xff] }
  0x1b   : > { %656 = vmatpush.msra.mxu1 %v420_v27  ;;  %634 = vmatpush.msra.mxu0 %v335_v29  ;;  %v395_v47 = vld [vmem:[%s6488_s1 + $0x320] sm:$0xff]  ;;  %v310_v49 = vld [vmem:[%s6488_s1 + $0x78] sm:$0xff]  ;;  %v465_v52 = vld [vmem:[%s6488_s1 + $0x550] sm:$0xff] }
  0x1c   : > { %703 = vmatpush.msra.mxu3 %v575_v30  ;;  %681 = vmatpush.msra.mxu2 %v490_v32  ;;  %v550_v50 = vld [vmem:[%s6488_s1 + $0x7f8] sm:$0xff]  ;;  %v305_v53 = vld [vmem:[%s6488_s1 + $0x50] sm:$0xff]  ;;  %v460_v56 = vld [vmem:[%s6488_s1 + $0x528] sm:$0xff] }
  0x1d   : > { %657 = vmatpush.msra.mxu1 %v415_v31  ;;  %635 = vmatpush.msra.mxu0 %v330_v33  ;;  %v390_v51 = vld [vmem:[%s6488_s1 + $0x2f8] sm:$0xff]  ;;  %v545_v54 = vld [vmem:[%s6488_s1 + $0x7d0] sm:$0xff]  ;;  %v300_v57 = vld [vmem:[%s6488_s1 + $0x28] sm:$0xff] }
  0x1e   : > { %704 = vmatpush.msra.mxu3 %v570_v34  ;;  %682 = vmatpush.msra.mxu2 %v485_v36  ;;  %v385_v55 = vld [vmem:[%s6488_s1 + $0x2d0] sm:$0xff]  ;;  %v540_v58 = vld [vmem:[%s6488_s1 + $0x7a8] sm:$0xff]  ;;  %v455_v60 = vld [vmem:[%s6488_s1 + $0x500] sm:$0xff] }
  0x1f   : > { %658 = vmatpush.msra.mxu1 %v410_v35  ;;  %636 = vmatpush.msra.mxu0 %v325_v37  ;;  %v380_v59 = vld [vmem:[%s6488_s1 + $0x2a8] sm:$0xff]  ;;  %v295_v61 = vld [vmem:[%s6488_s1] sm:$0xff]  ;;  %v3421_v62 = vld [vmem:[%s3406_s17 + $0x10] sm:$0xff] }
  0x20   : > { %705 = vmatpush.msra.mxu3 %v565_v38  ;;  %683 = vmatpush.msra.mxu2 %v480_v40  ;;  %v535_v63 = vld [vmem:[%s6488_s1 + $0x780] sm:$0xff]  ;;  %v3433_v2 = vld [vmem:[%s3406_s17 + $0x18] sm:$0xff]  ;;  %v3454_v8 = vld [vmem:[%s3406_s17 + $0x8] sm:$0xff] }
  0x21   : > { %659 = vmatpush.msra.mxu1 %v405_v39  ;;  %637 = vmatpush.msra.mxu0 %v320_v41  ;;  %v531_v0 = vld [vmem:[%s6488_s1 + $0x760] sm:$0xff]  ;;  %v526_v4 = vld [vmem:[%s6488_s1 + $0x738] sm:$0xff]  ;;  %v521_v9 = vld [vmem:[%s6488_s1 + $0x710] sm:$0xff] }
  0x22   : > { %706 = vmatpush.msra.mxu3 %v560_v42  ;;  %684 = vmatpush.msra.mxu2 %v475_v44  ;;  %v3430_v1 = vld [vmem:[%s3406_s17] sm:$0xff]  ;;  %v366_v7 = vld [vmem:[%s6488_s1 + $0x238] sm:$0xff]  ;;  %v361_v12 = vld [vmem:[%s6488_s1 + $0x210] sm:$0xff] }
  0x23   : > { %660 = vmatpush.msra.mxu1 %v400_v43  ;;  %638 = vmatpush.msra.mxu0 %v315_v45  ;;  %v371_v3 = vld [vmem:[%s6488_s1 + $0x260] sm:$0xff]  ;;  %v606_v11 = vld [vmem:[%s6488_s1 + $0x9b8] sm:$0xff]  ;;  %v516_v13 = vld [vmem:[%s6488_s1 + $0x6e8] sm:$0xff] }
  0x24   : > { %707 = vmatpush.msra.mxu3 %v555_v46  ;;  %685 = vmatpush.msra.mxu2 %v470_v48  ;;  %v611_v5 = vld [vmem:[%s6488_s1 + $0x9e0] sm:$0xff]  ;;  %v446_v14 = vld [vmem:[%s6488_s1 + $0x4b8] sm:$0xff]  ;;  %v601_v15 = vld [vmem:[%s6488_s1 + $0x990] sm:$0xff] }
  0x25   : > { %661 = vmatpush.msra.mxu1 %v395_v47  ;;  %639 = vmatpush.msra.mxu0 %v310_v49  ;;  %v375_v6 = vld [vmem:[%s6488_s1 + $0x280] sm:$0xff]  ;;  %v3479_v16 = vld [vmem:[%s3406_s17 + $0x30] sm:$0xff]  ;;  %v356_v17 = vld [vmem:[%s6488_s1 + $0x1e8] sm:$0xff] }
  0x26   : > { %708 = vmatpush.msra.mxu3 %v550_v50  ;;  %686 = vmatpush.msra.mxu2 %v465_v52  ;;  %v451_v10 = vld [vmem:[%s6488_s1 + $0x4e0] sm:$0xff]  ;;  %v441_v18 = vld [vmem:[%s6488_s1 + $0x490] sm:$0xff]  ;;  %v596_v20 = vld [vmem:[%s6488_s1 + $0x968] sm:$0xff] }
  0x27   : > { %662 = vmatpush.msra.mxu1 %v390_v51  ;;  %640 = vmatpush.msra.mxu0 %v305_v53  ;;  %v511_v19 = vld [vmem:[%s6488_s1 + $0x6c0] sm:$0xff]  ;;  %v3498_v22 = vld [vmem:[%s3406_s17 + $0x38] sm:$0xff]  ;;  %v436_v24 = vld [vmem:[%s6488_s1 + $0x468] sm:$0xff] }
  0x28   : > { %709 = vmatpush.msra.mxu3 %v545_v54  ;;  %687 = vmatpush.msra.mxu2 %v460_v56  ;;  %v3494_v21 = vld [vmem:[%s3406_s17 + $0x20] sm:$0xff]  ;;  %v506_v25 = vld [vmem:[%s6488_s1 + $0x698] sm:$0xff]  ;;  %v3514_v27 = vld [vmem:[%s3406_s17 + $0x28] sm:$0xff] }
  0x29   : > { %663 = vmatpush.msra.mxu1 %v385_v55  ;;  %641 = vmatpush.msra.mxu0 %v300_v57  ;;  %v351_v23 = vld [vmem:[%s6488_s1 + $0x1c0] sm:$0xff]  ;;  %v346_v28 = vld [vmem:[%s6488_s1 + $0x198] sm:$0xff]  ;;  %v501_v30 = vld [vmem:[%s6488_s1 + $0x670] sm:$0xff] }
  0x2a   : > { %710 = vmatpush.msra.mxu3 %v540_v58  ;;  %688 = vmatpush.msra.mxu2 %v455_v60  ;;  %v591_v26 = vld [vmem:[%s6488_s1 + $0x940] sm:$0xff]  ;;  %v586_v31 = vld [vmem:[%s6488_s1 + $0x918] sm:$0xff]  ;;  %v341_v32 = vld [vmem:[%s6488_s1 + $0x170] sm:$0xff] }
  0x2b   : > { %664 = vmatpush.msra.mxu1 %v380_v59  ;;  %642 = vmatpush.msra.mxu0 %v295_v61  ;;  %v431_v29 = vld [vmem:[%s6488_s1 + $0x440] sm:$0xff]  ;;  %v426_v33 = vld [vmem:[%s6488_s1 + $0x418] sm:$0xff]  ;;  %v496_v34 = vld [vmem:[%s6488_s1 + $0x648] sm:$0xff] }
  0x2c   : > { %689 = vmatmul.f32.vlgmr.msra.gmra.mxu2 %v3421_v62  ;;  %711 = vmatpush.msra.mxu3 %v535_v63  ;;  %v581_v35 = vld [vmem:[%s6488_s1 + $0x8f0] sm:$0xff]  ;;  %v336_v36 = vld [vmem:[%s6488_s1 + $0x148] sm:$0xff]  ;;  %v491_v38 = vld [vmem:[%s6488_s1 + $0x620] sm:$0xff] }
  0x2d   : > { %765 = vmatpush.msrb.mxu2 %v531_v0  ;;  %643 = vmatmul.f32.vlgmr.msra.gmra.mxu0 %v3430_v1  ;;  %v421_v37 = vld [vmem:[%s6488_s1 + $0x3f0] sm:$0xff]  ;;  %v576_v39 = vld [vmem:[%s6488_s1 + $0x8c8] sm:$0xff]  ;;  %v331_v40 = vld [vmem:[%s6488_s1 + $0x120] sm:$0xff] }
  0x2e   : > { %712 = vmatmul.f32.vlgmr.msra.gmra.mxu3 %v3433_v2  ;;  %719 = vmatpush.msrb.mxu0 %v371_v3  ;;  %v416_v41 = vld [vmem:[%s6488_s1 + $0x3c8] sm:$0xff]  ;;  %v486_v42 = vld [vmem:[%s6488_s1 + $0x5f8] sm:$0xff]  ;;  %v571_v43 = vld [vmem:[%s6488_s1 + $0x8a0] sm:$0xff] }
  0x2f   : > { %766 = vmatpush.msrb.mxu2 %v526_v4  ;;  %788 = vmatpush.msrb.mxu3 %v611_v5  ;;  %v326_v44 = vld [vmem:[%s6488_s1 + $0xf8] sm:$0xff]  ;;  %v411_v45 = vld [vmem:[%s6488_s1 + $0x3a0] sm:$0xff]  ;;  %v481_v46 = vld [vmem:[%s6488_s1 + $0x5d0] sm:$0xff] }
  0x30   : > { %665 = vmatpush.msra.mxu1 %v375_v6  ;;  %720 = vmatpush.msrb.mxu0 %v366_v7  ;;  %v566_v47 = vld [vmem:[%s6488_s1 + $0x878] sm:$0xff]  ;;  %v321_v48 = vld [vmem:[%s6488_s1 + $0xd0] sm:$0xff]  ;;  %v476_v50 = vld [vmem:[%s6488_s1 + $0x5a8] sm:$0xff] }
  0x31   : > { %666 = vmatmul.f32.vlgmr.msra.gmra.mxu1 %v3454_v8  ;;  %767 = vmatpush.msrb.mxu2 %v521_v9  ;;  %v406_v49 = vld [vmem:[%s6488_s1 + $0x378] sm:$0xff]  ;;  %v561_v51 = vld [vmem:[%s6488_s1 + $0x850] sm:$0xff]  ;;  %v316_v52 = vld [vmem:[%s6488_s1 + $0xa8] sm:$0xff] }
  0x32   : > { %742 = vmatpush.msrb.mxu1 %v451_v10  ;;  %789 = vmatpush.msrb.mxu3 %v606_v11  ;;  %v401_v53 = vld [vmem:[%s6488_s1 + $0x350] sm:$0xff]  ;;  %v471_v54 = vld [vmem:[%s6488_s1 + $0x580] sm:$0xff]  ;;  %v556_v55 = vld [vmem:[%s6488_s1 + $0x828] sm:$0xff] }
  0x33   : > { %721 = vmatpush.msrb.mxu0 %v361_v12  ;;  %768 = vmatpush.msrb.mxu2 %v516_v13  ;;  %v311_v56 = vld [vmem:[%s6488_s1 + $0x80] sm:$0xff]  ;;  %v396_v57 = vld [vmem:[%s6488_s1 + $0x328] sm:$0xff]  ;;  %v466_v58 = vld [vmem:[%s6488_s1 + $0x558] sm:$0xff] }
  0x34   : > { %743 = vmatpush.msrb.mxu1 %v446_v14  ;;  %790 = vmatpush.msrb.mxu3 %v601_v15  ;;  %v551_v59 = vld [vmem:[%s6488_s1 + $0x800] sm:$0xff]  ;;  %v306_v60 = vld [vmem:[%s6488_s1 + $0x58] sm:$0xff]  ;;  %v461_v63 = vld [vmem:[%s6488_s1 + $0x530] sm:$0xff] }
  0x35   : > { %692 = vmatmul.f32.gmra.mxu2 %v3479_v16  ;;  %722 = vmatpush.msrb.mxu0 %v356_v17  ;;  %v391_v61 = vld [vmem:[%s6488_s1 + $0x300] sm:$0xff]  ;;  %v546_v0 = vld [vmem:[%s6488_s1 + $0x7d8] sm:$0xff]  ;;  %v301_v3 = vld [vmem:[%s6488_s1 + $0x30] sm:$0xff] }
  0x36   : > { %744 = vmatpush.msrb.mxu1 %v441_v18  ;;  %769 = vmatpush.msrb.mxu2 %v511_v19  ;;  %v386_v4 = vld [vmem:[%s6488_s1 + $0x2d8] sm:$0xff]  ;;  %v456_v5 = vld [vmem:[%s6488_s1 + $0x508] sm:$0xff]  ;;  %v541_v6 = vld [vmem:[%s6488_s1 + $0x7b0] sm:$0xff] }
  0x37   : > { %791 = vmatpush.msrb.mxu3 %v596_v20  ;;  %646 = vmatmul.f32.gmra.mxu0 %v3494_v21  ;;  %v296_v7 = vld [vmem:[%s6488_s1 + $0x8] sm:$0xff]  ;;  %v381_v10 = vld [vmem:[%s6488_s1 + $0x2b0] sm:$0xff]  ;;  %v527_v13 = vld [vmem:[%s6488_s1 + $0x740] sm:$0xff] }
  0x38   : > { %715 = vmatmul.f32.gmra.mxu3 %v3498_v22  ;;  %723 = vmatpush.msrb.mxu0 %v351_v23  ;;  %v532_v9 = vld [vmem:[%s6488_s1 + $0x768] sm:$0xff]  ;;  %v367_v17 = vld [vmem:[%s6488_s1 + $0x240] sm:$0xff]  ;;  %v522_v18 = vld [vmem:[%s6488_s1 + $0x718] sm:$0xff] }
  0x39   : > { %745 = vmatpush.msrb.mxu1 %v436_v24  ;;  %770 = vmatpush.msrb.mxu2 %v506_v25  ;;  %v536_v11 = vld [vmem:[%s6488_s1 + $0x788] sm:$0xff]  ;;  %v607_v20 = vld [vmem:[%s6488_s1 + $0x9c0] sm:$0xff]  ;;  %v362_v23 = vld [vmem:[%s6488_s1 + $0x218] sm:$0xff] }
  0x3a   : > { %792 = vmatpush.msrb.mxu3 %v591_v26  ;;  %669 = vmatmul.f32.gmra.mxu1 %v3514_v27  ;;  %v372_v12 = vld [vmem:[%s6488_s1 + $0x268] sm:$0xff]  ;;  %v517_v24 = vld [vmem:[%s6488_s1 + $0x6f0] sm:$0xff]  ;;  %v447_v25 = vld [vmem:[%s6488_s1 + $0x4c0] sm:$0xff] }
  0x3b   : > { %724 = vmatpush.msrb.mxu0 %v346_v28  ;;  %746 = vmatpush.msrb.mxu1 %v431_v29  ;;  %v612_v14 = vld [vmem:[%s6488_s1 + $0x9e8] sm:$0xff]  ;;  %v602_v26 = vld [vmem:[%s6488_s1 + $0x998] sm:$0xff]  ;;  %v357_v28 = vld [vmem:[%s6488_s1 + $0x1f0] sm:$0xff] }
  0x3c   : > { %771 = vmatpush.msrb.mxu2 %v501_v30  ;;  %793 = vmatpush.msrb.mxu3 %v586_v31  ;;  %v376_v15 = vld [vmem:[%s6488_s1 + $0x288] sm:$0xff]  ;;  %v442_v29 = vld [vmem:[%s6488_s1 + $0x498] sm:$0xff]  ;;  %v597_v31 = vld [vmem:[%s6488_s1 + $0x970] sm:$0xff] }
  0x3d   : > { %725 = vmatpush.msrb.mxu0 %v341_v32  ;;  %747 = vmatpush.msrb.mxu1 %v426_v33  ;;  %v452_v19 = vld [vmem:[%s6488_s1 + $0x4e8] sm:$0xff]  ;;  %v437_v33 = vld [vmem:[%s6488_s1 + $0x470] sm:$0xff] }
  0x3e   : > { %772 = vmatpush.msrb.mxu2 %v496_v34  ;;  %794 = vmatpush.msrb.mxu3 %v581_v35  ;;  %v512_v30 = vld [vmem:[%s6488_s1 + $0x6c8] sm:$0xff]  ;;  %v507_v34 = vld [vmem:[%s6488_s1 + $0x6a0] sm:$0xff] }
  0x3f   : > { %726 = vmatpush.msrb.mxu0 %v336_v36  ;;  %748 = vmatpush.msrb.mxu1 %v421_v37  ;;  %v352_v32 = vld [vmem:[%s6488_s1 + $0x1c8] sm:$0xff]  ;;  %v347_v36 = vld [vmem:[%s6488_s1 + $0x1a0] sm:$0xff] }
  0x40   : > { %773 = vmatpush.msrb.mxu2 %v491_v38  ;;  %795 = vmatpush.msrb.mxu3 %v576_v39  ;;  %v592_v35 = vld [vmem:[%s6488_s1 + $0x948] sm:$0xff]  ;;  %v502_v38 = vld [vmem:[%s6488_s1 + $0x678] sm:$0xff]  ;;  %v587_v39 = vld [vmem:[%s6488_s1 + $0x920] sm:$0xff] }
  0x41   : > { %727 = vmatpush.msrb.mxu0 %v331_v40  ;;  %749 = vmatpush.msrb.mxu1 %v416_v41  ;;  %v432_v37 = vld [vmem:[%s6488_s1 + $0x448] sm:$0xff]  ;;  %v342_v40 = vld [vmem:[%s6488_s1 + $0x178] sm:$0xff]  ;;  %v427_v41 = vld [vmem:[%s6488_s1 + $0x420] sm:$0xff] }
  0x42   : > { %774 = vmatpush.msrb.mxu2 %v486_v42  ;;  %796 = vmatpush.msrb.mxu3 %v571_v43  ;;  %v497_v42 = vld [vmem:[%s6488_s1 + $0x650] sm:$0xff]  ;;  %v582_v43 = vld [vmem:[%s6488_s1 + $0x8f8] sm:$0xff] }
  0x43   : > { %728 = vmatpush.msrb.mxu0 %v326_v44  ;;  %750 = vmatpush.msrb.mxu1 %v411_v45  ;;  %v337_v44 = vld [vmem:[%s6488_s1 + $0x150] sm:$0xff]  ;;  %v422_v45 = vld [vmem:[%s6488_s1 + $0x3f8] sm:$0xff] }
  0x44   : > { %775 = vmatpush.msrb.mxu2 %v481_v46  ;;  %797 = vmatpush.msrb.mxu3 %v566_v47  ;;  %v492_v46 = vld [vmem:[%s6488_s1 + $0x628] sm:$0xff]  ;;  %v577_v47 = vld [vmem:[%s6488_s1 + $0x8d0] sm:$0xff] }
  0x45   : > { %729 = vmatpush.msrb.mxu0 %v321_v48  ;;  %751 = vmatpush.msrb.mxu1 %v406_v49  ;;  %v332_v48 = vld [vmem:[%s6488_s1 + $0x128] sm:$0xff]  ;;  %v417_v49 = vld [vmem:[%s6488_s1 + $0x3d0] sm:$0xff] }
  0x46   : > { %776 = vmatpush.msrb.mxu2 %v476_v50  ;;  %798 = vmatpush.msrb.mxu3 %v561_v51  ;;  %v487_v50 = vld [vmem:[%s6488_s1 + $0x600] sm:$0xff]  ;;  %v572_v51 = vld [vmem:[%s6488_s1 + $0x8a8] sm:$0xff] }
  0x47   : > { %730 = vmatpush.msrb.mxu0 %v316_v52  ;;  %752 = vmatpush.msrb.mxu1 %v401_v53  ;;  %v327_v52 = vld [vmem:[%s6488_s1 + $0x100] sm:$0xff]  ;;  %v412_v53 = vld [vmem:[%s6488_s1 + $0x3a8] sm:$0xff] }
  0x48   : > { %777 = vmatpush.msrb.mxu2 %v471_v54  ;;  %799 = vmatpush.msrb.mxu3 %v556_v55  ;;  %v482_v54 = vld [vmem:[%s6488_s1 + $0x5d8] sm:$0xff]  ;;  %v567_v55 = vld [vmem:[%s6488_s1 + $0x880] sm:$0xff] }
  0x49   : > { %731 = vmatpush.msrb.mxu0 %v311_v56  ;;  %753 = vmatpush.msrb.mxu1 %v396_v57  ;;  %v322_v56 = vld [vmem:[%s6488_s1 + $0xd8] sm:$0xff]  ;;  %v407_v57 = vld [vmem:[%s6488_s1 + $0x380] sm:$0xff] }
  0x4a   : > { %778 = vmatpush.msrb.mxu2 %v466_v58  ;;  %800 = vmatpush.msrb.mxu3 %v551_v59  ;;  %v477_v58 = vld [vmem:[%s6488_s1 + $0x5b0] sm:$0xff]  ;;  %v562_v59 = vld [vmem:[%s6488_s1 + $0x858] sm:$0xff] }
  0x4b   : > { %732 = vmatpush.msrb.mxu0 %v306_v60  ;;  %754 = vmatpush.msrb.mxu1 %v391_v61  ;;  %v317_v60 = vld [vmem:[%s6488_s1 + $0xb0] sm:$0xff]  ;;  %v402_v61 = vld [vmem:[%s6488_s1 + $0x358] sm:$0xff] }
  0x4c   : > { %779 = vmatpush.msrb.mxu2 %v461_v63  ;;  %801 = vmatpush.msrb.mxu3 %v546_v0  ;;  %v472_v63 = vld [vmem:[%s6488_s1 + $0x588] sm:$0xff]  ;;  %v557_v0 = vld [vmem:[%s6488_s1 + $0x830] sm:$0xff] }
  0x4d   : > { %733 = vmatpush.msrb.mxu0 %v301_v3  ;;  %755 = vmatpush.msrb.mxu1 %v386_v4  ;;  %v312_v3 = vld [vmem:[%s6488_s1 + $0x88] sm:$0xff]  ;;  %v397_v4 = vld [vmem:[%s6488_s1 + $0x330] sm:$0xff] }
  0x4e   : > { %780 = vmatpush.msrb.mxu2 %v456_v5  ;;  %802 = vmatpush.msrb.mxu3 %v541_v6  ;;  %v467_v5 = vld [vmem:[%s6488_s1 + $0x560] sm:$0xff]  ;;  %v552_v6 = vld [vmem:[%s6488_s1 + $0x808] sm:$0xff] }
  0x4f   : > { %781 = vmatmul.f32.vlgmr.msrb.gmra.mxu2 %v3421_v62  ;;  %734 = vmatpush.msrb.mxu0 %v296_v7  ;;  %v307_v7 = vld [vmem:[%s6488_s1 + $0x60] sm:$0xff] }
  0x50   : > { %857 = vmatpush.msra.mxu2 %v532_v9  ;;  %756 = vmatpush.msrb.mxu1 %v381_v10  ;;  %v392_v9 = vld [vmem:[%s6488_s1 + $0x308] sm:$0xff]  ;;  %v462_v10 = vld [vmem:[%s6488_s1 + $0x538] sm:$0xff] }
  0x51   : > { %803 = vmatpush.msrb.mxu3 %v536_v11  ;;  %735 = vmatmul.f32.vlgmr.msrb.gmra.mxu0 %v3430_v1  ;;  %v547_v11 = vld [vmem:[%s6488_s1 + $0x7e0] sm:$0xff] }
  0x52   : > { %804 = vmatmul.f32.vlgmr.msrb.gmra.mxu3 %v3433_v2  ;;  %811 = vmatpush.msra.mxu0 %v372_v12  ;;  %v302_v12 = vld [vmem:[%s6488_s1 + $0x38] sm:$0xff] }
  0x53   : > { %858 = vmatpush.msra.mxu2 %v527_v13  ;;  %880 = vmatpush.msra.mxu3 %v612_v14  ;;  %v387_v13 = vld [vmem:[%s6488_s1 + $0x2e0] sm:$0xff]  ;;  %v457_v14 = vld [vmem:[%s6488_s1 + $0x510] sm:$0xff] }
  0x54   : > { %757 = vmatpush.msrb.mxu1 %v376_v15  ;;  %812 = vmatpush.msra.mxu0 %v367_v17  ;;  %v542_v15 = vld [vmem:[%s6488_s1 + $0x7b8] sm:$0xff]  ;;  %v297_v17 = vld [vmem:[%s6488_s1 + $0x10] sm:$0xff] }
  0x55   : > { %758 = vmatmul.f32.vlgmr.msrb.gmra.mxu1 %v3454_v8  ;;  %859 = vmatpush.msra.mxu2 %v522_v18  ;;  %v533_v18 = vld [vmem:[%s6488_s1 + $0x770] sm:$0xff] }
  0x56   : > { %834 = vmatpush.msra.mxu1 %v452_v19  ;;  %881 = vmatpush.msra.mxu3 %v607_v20  ;;  %v382_v19 = vld [vmem:[%s6488_s1 + $0x2b8] sm:$0xff]  ;;  %v537_v20 = vld [vmem:[%s6488_s1 + $0x790] sm:$0xff] }
  0x57   : > { %813 = vmatpush.msra.mxu0 %v362_v23  ;;  %860 = vmatpush.msra.mxu2 %v517_v24  ;;  %v373_v23 = vld [vmem:[%s6488_s1 + $0x270] sm:$0xff]  ;;  %v528_v24 = vld [vmem:[%s6488_s1 + $0x748] sm:$0xff] }
  0x58   : > { %835 = vmatpush.msra.mxu1 %v447_v25  ;;  %882 = vmatpush.msra.mxu3 %v602_v26  ;;  %v613_v25 = vld [vmem:[%s6488_s1 + $0x9f0] sm:$0xff] }
  0x59   : > { %784 = vmatmul.f32.gmra.mxu2 %v3479_v16  ;;  %814 = vmatpush.msra.mxu0 %v357_v28  ;;  %v377_v26 = vld [vmem:[%s6488_s1 + $0x290] sm:$0xff]  ;;  %v368_v28 = vld [vmem:[%s6488_s1 + $0x248] sm:$0xff] }
  0x5a   : > { %836 = vmatpush.msra.mxu1 %v442_v29  ;;  %861 = vmatpush.msra.mxu2 %v512_v30  ;;  %v523_v29 = vld [vmem:[%s6488_s1 + $0x720] sm:$0xff]  ;;  %v453_v30 = vld [vmem:[%s6488_s1 + $0x4f0] sm:$0xff] }
  0x5b   : > { %883 = vmatpush.msra.mxu3 %v597_v31  ;;  %738 = vmatmul.f32.gmra.mxu0 %v3494_v21  ;;  %v608_v31 = vld [vmem:[%s6488_s1 + $0x9c8] sm:$0xff] }
  0x5c   : > { %807 = vmatmul.f32.gmra.mxu3 %v3498_v22  ;;  %815 = vmatpush.msra.mxu0 %v352_v32  ;;  %v363_v32 = vld [vmem:[%s6488_s1 + $0x220] sm:$0xff] }
  0x5d   : > { %837 = vmatpush.msra.mxu1 %v437_v33  ;;  %862 = vmatpush.msra.mxu2 %v507_v34  ;;  %v518_v33 = vld [vmem:[%s6488_s1 + $0x6f8] sm:$0xff]  ;;  %v448_v34 = vld [vmem:[%s6488_s1 + $0x4c8] sm:$0xff] }
  0x5e   : > { %884 = vmatpush.msra.mxu3 %v592_v35  ;;  %761 = vmatmul.f32.gmra.mxu1 %v3514_v27  ;;  %v603_v35 = vld [vmem:[%s6488_s1 + $0x9a0] sm:$0xff] }
  0x5f   : > { %816 = vmatpush.msra.mxu0 %v347_v36  ;;  %838 = vmatpush.msra.mxu1 %v432_v37  ;;  %v358_v36 = vld [vmem:[%s6488_s1 + $0x1f8] sm:$0xff]  ;;  %v443_v37 = vld [vmem:[%s6488_s1 + $0x4a0] sm:$0xff] }
  0x60   : > { %863 = vmatpush.msra.mxu2 %v502_v38  ;;  %885 = vmatpush.msra.mxu3 %v587_v39  ;;  %v513_v38 = vld [vmem:[%s6488_s1 + $0x6d0] sm:$0xff]  ;;  %v598_v39 = vld [vmem:[%s6488_s1 + $0x978] sm:$0xff] }
  0x61   : > { %817 = vmatpush.msra.mxu0 %v342_v40  ;;  %839 = vmatpush.msra.mxu1 %v427_v41  ;;  %v353_v40 = vld [vmem:[%s6488_s1 + $0x1d0] sm:$0xff]  ;;  %v438_v41 = vld [vmem:[%s6488_s1 + $0x478] sm:$0xff] }
  0x62   : > { %864 = vmatpush.msra.mxu2 %v497_v42  ;;  %886 = vmatpush.msra.mxu3 %v582_v43  ;;  %v508_v42 = vld [vmem:[%s6488_s1 + $0x6a8] sm:$0xff]  ;;  %v593_v43 = vld [vmem:[%s6488_s1 + $0x950] sm:$0xff] }
  0x63   : > { %818 = vmatpush.msra.mxu0 %v337_v44  ;;  %840 = vmatpush.msra.mxu1 %v422_v45  ;;  %v348_v44 = vld [vmem:[%s6488_s1 + $0x1a8] sm:$0xff]  ;;  %v433_v45 = vld [vmem:[%s6488_s1 + $0x450] sm:$0xff] }
  0x64   : > { %865 = vmatpush.msra.mxu2 %v492_v46  ;;  %887 = vmatpush.msra.mxu3 %v577_v47  ;;  %v503_v46 = vld [vmem:[%s6488_s1 + $0x680] sm:$0xff]  ;;  %v588_v47 = vld [vmem:[%s6488_s1 + $0x928] sm:$0xff] }
  0x65   : > { %819 = vmatpush.msra.mxu0 %v332_v48  ;;  %841 = vmatpush.msra.mxu1 %v417_v49  ;;  %v343_v48 = vld [vmem:[%s6488_s1 + $0x180] sm:$0xff]  ;;  %v428_v49 = vld [vmem:[%s6488_s1 + $0x428] sm:$0xff] }
  0x66   : > { %866 = vmatpush.msra.mxu2 %v487_v50  ;;  %888 = vmatpush.msra.mxu3 %v572_v51  ;;  %v498_v50 = vld [vmem:[%s6488_s1 + $0x658] sm:$0xff]  ;;  %v583_v51 = vld [vmem:[%s6488_s1 + $0x900] sm:$0xff] }
  0x67   : > { %820 = vmatpush.msra.mxu0 %v327_v52  ;;  %842 = vmatpush.msra.mxu1 %v412_v53  ;;  %v338_v52 = vld [vmem:[%s6488_s1 + $0x158] sm:$0xff]  ;;  %v423_v53 = vld [vmem:[%s6488_s1 + $0x400] sm:$0xff] }
  0x68   : > { %867 = vmatpush.msra.mxu2 %v482_v54  ;;  %889 = vmatpush.msra.mxu3 %v567_v55  ;;  %v493_v54 = vld [vmem:[%s6488_s1 + $0x630] sm:$0xff]  ;;  %v578_v55 = vld [vmem:[%s6488_s1 + $0x8d8] sm:$0xff] }
  0x69   : > { %821 = vmatpush.msra.mxu0 %v322_v56  ;;  %843 = vmatpush.msra.mxu1 %v407_v57  ;;  %v333_v56 = vld [vmem:[%s6488_s1 + $0x130] sm:$0xff]  ;;  %v418_v57 = vld [vmem:[%s6488_s1 + $0x3d8] sm:$0xff] }
  0x6a   : > { %868 = vmatpush.msra.mxu2 %v477_v58  ;;  %890 = vmatpush.msra.mxu3 %v562_v59  ;;  %v488_v58 = vld [vmem:[%s6488_s1 + $0x608] sm:$0xff]  ;;  %v573_v59 = vld [vmem:[%s6488_s1 + $0x8b0] sm:$0xff] }
  0x6b   : > { %822 = vmatpush.msra.mxu0 %v317_v60  ;;  %844 = vmatpush.msra.mxu1 %v402_v61  ;;  %v328_v60 = vld [vmem:[%s6488_s1 + $0x108] sm:$0xff]  ;;  %v413_v61 = vld [vmem:[%s6488_s1 + $0x3b0] sm:$0xff] }
  0x6c   : > { %869 = vmatpush.msra.mxu2 %v472_v63  ;;  %891 = vmatpush.msra.mxu3 %v557_v0  ;;  %v483_v63 = vld [vmem:[%s6488_s1 + $0x5e0] sm:$0xff]  ;;  %v568_v0 = vld [vmem:[%s6488_s1 + $0x888] sm:$0xff] }
  0x6d   : > { %823 = vmatpush.msra.mxu0 %v312_v3  ;;  %845 = vmatpush.msra.mxu1 %v397_v4  ;;  %v323_v3 = vld [vmem:[%s6488_s1 + $0xe0] sm:$0xff]  ;;  %v408_v4 = vld [vmem:[%s6488_s1 + $0x388] sm:$0xff] }
  0x6e   : > { %870 = vmatpush.msra.mxu2 %v467_v5  ;;  %892 = vmatpush.msra.mxu3 %v552_v6  ;;  %v478_v5 = vld [vmem:[%s6488_s1 + $0x5b8] sm:$0xff]  ;;  %v563_v6 = vld [vmem:[%s6488_s1 + $0x860] sm:$0xff] }
  0x6f   : > { %824 = vmatpush.msra.mxu0 %v307_v7  ;;  %846 = vmatpush.msra.mxu1 %v392_v9  ;;  %v318_v7 = vld [vmem:[%s6488_s1 + $0xb8] sm:$0xff]  ;;  %v403_v9 = vld [vmem:[%s6488_s1 + $0x360] sm:$0xff] }
  0x70   : > { %871 = vmatpush.msra.mxu2 %v462_v10  ;;  %893 = vmatpush.msra.mxu3 %v547_v11  ;;  %v473_v10 = vld [vmem:[%s6488_s1 + $0x590] sm:$0xff]  ;;  %v558_v11 = vld [vmem:[%s6488_s1 + $0x838] sm:$0xff] }
  0x71   : > { %825 = vmatpush.msra.mxu0 %v302_v12  ;;  %847 = vmatpush.msra.mxu1 %v387_v13  ;;  %v313_v12 = vld [vmem:[%s6488_s1 + $0x90] sm:$0xff]  ;;  %v398_v13 = vld [vmem:[%s6488_s1 + $0x338] sm:$0xff] }
  0x72   : > { %872 = vmatpush.msra.mxu2 %v457_v14  ;;  %894 = vmatpush.msra.mxu3 %v542_v15  ;;  %v468_v14 = vld [vmem:[%s6488_s1 + $0x568] sm:$0xff]  ;;  %v553_v15 = vld [vmem:[%s6488_s1 + $0x810] sm:$0xff] }
  0x73   : > { %873 = vmatmul.f32.vlgmr.msra.gmra.mxu2 %v3421_v62  ;;  %826 = vmatpush.msra.mxu0 %v297_v17  ;;  %v308_v17 = vld [vmem:[%s6488_s1 + $0x68] sm:$0xff] }
  0x74   : > { %949 = vmatpush.msrb.mxu2 %v533_v18  ;;  %848 = vmatpush.msra.mxu1 %v382_v19  ;;  %v393_v18 = vld [vmem:[%s6488_s1 + $0x310] sm:$0xff]  ;;  %v463_v19 = vld [vmem:[%s6488_s1 + $0x540] sm:$0xff] }
  0x75   : > { %895 = vmatpush.msra.mxu3 %v537_v20  ;;  %827 = vmatmul.f32.vlgmr.msra.gmra.mxu0 %v3430_v1  ;;  %v548_v20 = vld [vmem:[%s6488_s1 + $0x7e8] sm:$0xff] }
  0x76   : > { %896 = vmatmul.f32.vlgmr.msra.gmra.mxu3 %v3433_v2  ;;  %903 = vmatpush.msrb.mxu0 %v373_v23  ;;  %v303_v23 = vld [vmem:[%s6488_s1 + $0x40] sm:$0xff] }
  0x77   : > { %950 = vmatpush.msrb.mxu2 %v528_v24  ;;  %972 = vmatpush.msrb.mxu3 %v613_v25  ;;  %v388_v24 = vld [vmem:[%s6488_s1 + $0x2e8] sm:$0xff]  ;;  %v458_v25 = vld [vmem:[%s6488_s1 + $0x518] sm:$0xff] }
  0x78   : > { %849 = vmatpush.msra.mxu1 %v377_v26  ;;  %904 = vmatpush.msrb.mxu0 %v368_v28  ;;  %v543_v26 = vld [vmem:[%s6488_s1 + $0x7c0] sm:$0xff]  ;;  %v298_v28 = vld [vmem:[%s6488_s1 + $0x18] sm:$0xff] }
  0x79   : > { %850 = vmatmul.f32.vlgmr.msra.gmra.mxu1 %v3454_v8  ;;  %951 = vmatpush.msrb.mxu2 %v523_v29  ;;  %v534_v29 = vld [vmem:[%s6488_s1 + $0x778] sm:$0xff] }
  0x7a   : > { %926 = vmatpush.msrb.mxu1 %v453_v30  ;;  %973 = vmatpush.msrb.mxu3 %v608_v31  ;;  %v383_v30 = vld [vmem:[%s6488_s1 + $0x2c0] sm:$0xff]  ;;  %v538_v31 = vld [vmem:[%s6488_s1 + $0x798] sm:$0xff] }
  0x7b   : > { %905 = vmatpush.msrb.mxu0 %v363_v32  ;;  %952 = vmatpush.msrb.mxu2 %v518_v33  ;;  %v374_v32 = vld [vmem:[%s6488_s1 + $0x278] sm:$0xff]  ;;  %v529_v33 = vld [vmem:[%s6488_s1 + $0x750] sm:$0xff] }
  0x7c   : > { %927 = vmatpush.msrb.mxu1 %v448_v34  ;;  %974 = vmatpush.msrb.mxu3 %v603_v35  ;;  %v614_v34 = vld [vmem:[%s6488_s1 + $0x9f8] sm:$0xff]  ;;  %v369_v35 = vld [vmem:[%s6488_s1 + $0x250] sm:$0xff] }
  0x7d   : > { %876 = vmatmul.f32.gmra.mxu2 %v3479_v16  ;;  %906 = vmatpush.msrb.mxu0 %v358_v36  ;;  %v524_v36 = vld [vmem:[%s6488_s1 + $0x728] sm:$0xff] }
  0x7e   : > { %928 = vmatpush.msrb.mxu1 %v443_v37  ;;  %953 = vmatpush.msrb.mxu2 %v513_v38  ;;  %v609_v37 = vld [vmem:[%s6488_s1 + $0x9d0] sm:$0xff]  ;;  %v519_v38 = vld [vmem:[%s6488_s1 + $0x700] sm:$0xff] }
  0x7f   : > { %975 = vmatpush.msrb.mxu3 %v598_v39  ;;  %830 = vmatmul.f32.gmra.mxu0 %v3494_v21  ;;  %v449_v39 = vld [vmem:[%s6488_s1 + $0x4d0] sm:$0xff] }
  0x80   : > { %899 = vmatmul.f32.gmra.mxu3 %v3498_v22  ;;  %907 = vmatpush.msrb.mxu0 %v353_v40  ;;  %v604_v40 = vld [vmem:[%s6488_s1 + $0x9a8] sm:$0xff] }
  0x81   : > { %929 = vmatpush.msrb.mxu1 %v438_v41  ;;  %954 = vmatpush.msrb.mxu2 %v508_v42  ;;  %v359_v41 = vld [vmem:[%s6488_s1 + $0x200] sm:$0xff]  ;;  %v514_v42 = vld [vmem:[%s6488_s1 + $0x6d8] sm:$0xff] }
  0x82   : > { %976 = vmatpush.msrb.mxu3 %v593_v43  ;;  %853 = vmatmul.f32.gmra.mxu1 %v3514_v27  ;;  %v599_v43 = vld [vmem:[%s6488_s1 + $0x980] sm:$0xff] }
  0x83   : > { %908 = vmatpush.msrb.mxu0 %v348_v44  ;;  %930 = vmatpush.msrb.mxu1 %v433_v45  ;;  %v354_v44 = vld [vmem:[%s6488_s1 + $0x1d8] sm:$0xff]  ;;  %v439_v45 = vld [vmem:[%s6488_s1 + $0x480] sm:$0xff] }
  0x84   : > { %955 = vmatpush.msrb.mxu2 %v503_v46  ;;  %977 = vmatpush.msrb.mxu3 %v588_v47  ;;  %v509_v46 = vld [vmem:[%s6488_s1 + $0x6b0] sm:$0xff] }
  0x85   : > { %909 = vmatpush.msrb.mxu0 %v343_v48  ;;  %931 = vmatpush.msrb.mxu1 %v428_v49  ;;  %v349_v47 = vld [vmem:[%s6488_s1 + $0x1b0] sm:$0xff]  ;;  %v434_v48 = vld [vmem:[%s6488_s1 + $0x458] sm:$0xff]  ;;  %v4126_v49 = vld [vmem:[%s6489_s2] sm:$0x1f] }
  0x86   : > { %956 = vmatpush.msrb.mxu2 %v498_v50  ;;  %978 = vmatpush.msrb.mxu3 %v583_v51  ;;  %v344_v50 = vld [vmem:[%s6488_s1 + $0x188] sm:$0xff]  ;;  %v429_v51 = vld [vmem:[%s6488_s1 + $0x430] sm:$0xff] }
  0x87   : > { %910 = vmatpush.msrb.mxu0 %v338_v52  ;;  %932 = vmatpush.msrb.mxu1 %v423_v53  ;;  %v499_v52 = vld [vmem:[%s6488_s1 + $0x660] sm:$0xff]  ;;  %v584_v53 = vld [vmem:[%s6488_s1 + $0x908] sm:$0xff] }
  0x88   : > { %957 = vmatpush.msrb.mxu2 %v493_v54  ;;  %979 = vmatpush.msrb.mxu3 %v578_v55  ;;  %v339_v54 = vld [vmem:[%s6488_s1 + $0x160] sm:$0xff]  ;;  %v424_v55 = vld [vmem:[%s6488_s1 + $0x408] sm:$0xff] }
  0x89   : > { %911 = vmatpush.msrb.mxu0 %v333_v56  ;;  %933 = vmatpush.msrb.mxu1 %v418_v57  ;;  %v494_v56 = vld [vmem:[%s6488_s1 + $0x638] sm:$0xff]  ;;  %v579_v57 = vld [vmem:[%s6488_s1 + $0x8e0] sm:$0xff] }
  0x8a   : > { %958 = vmatpush.msrb.mxu2 %v488_v58  ;;  %980 = vmatpush.msrb.mxu3 %v573_v59  ;;  %v334_v58 = vld [vmem:[%s6488_s1 + $0x138] sm:$0xff]  ;;  %v419_v59 = vld [vmem:[%s6488_s1 + $0x3e0] sm:$0xff] }
  0x8b   : > { %912 = vmatpush.msrb.mxu0 %v328_v60  ;;  %934 = vmatpush.msrb.mxu1 %v413_v61  ;;  %v489_v61 = vld [vmem:[%s6488_s1 + $0x610] sm:$0xff] }
  0x8c   : > { %959 = vmatpush.msrb.mxu2 %v483_v63  ;;  %981 = vmatpush.msrb.mxu3 %v568_v0  ;;  %v574_v63 = vld [vmem:[%s6488_s1 + $0x8b8] sm:$0xff] }
  0x8d   : > { %913 = vmatpush.msrb.mxu0 %v323_v3  ;;  %935 = vmatpush.msrb.mxu1 %v408_v4  ;;  %v329_v3 = vld [vmem:[%s6488_s1 + $0x110] sm:$0xff]  ;;  %v414_v4 = vld [vmem:[%s6488_s1 + $0x3b8] sm:$0xff] }
  0x8e   : > { %960 = vmatpush.msrb.mxu2 %v478_v5  ;;  %982 = vmatpush.msrb.mxu3 %v563_v6  ;;  %v484_v5 = vld [vmem:[%s6488_s1 + $0x5e8] sm:$0xff]  ;;  %v569_v6 = vld [vmem:[%s6488_s1 + $0x890] sm:$0xff] }
  0x8f   : > { %914 = vmatpush.msrb.mxu0 %v318_v7  ;;  %936 = vmatpush.msrb.mxu1 %v403_v9  ;;  %v324_v7 = vld [vmem:[%s6488_s1 + $0xe8] sm:$0xff]  ;;  %v409_v9 = vld [vmem:[%s6488_s1 + $0x390] sm:$0xff] }
  0x90   : > { %961 = vmatpush.msrb.mxu2 %v473_v10  ;;  %983 = vmatpush.msrb.mxu3 %v558_v11  ;;  %v479_v11 = vld [vmem:[%s6488_s1 + $0x5c0] sm:$0xff] }
  0x91   : > { %915 = vmatpush.msrb.mxu0 %v313_v12  ;;  %937 = vmatpush.msrb.mxu1 %v398_v13  ;;  %v564_v12 = vld [vmem:[%s6488_s1 + $0x868] sm:$0xff] }
  0x92   : > { %962 = vmatpush.msrb.mxu2 %v468_v14  ;;  %984 = vmatpush.msrb.mxu3 %v553_v15  ;;  %v319_v15 = vld [vmem:[%s6488_s1 + $0xc0] sm:$0xff] }
  0x93   : > { %916 = vmatpush.msrb.mxu0 %v308_v17  ;;  %938 = vmatpush.msrb.mxu1 %v393_v18  ;;  %v404_v17 = vld [vmem:[%s6488_s1 + $0x368] sm:$0xff]  ;;  %v474_v18 = vld [vmem:[%s6488_s1 + $0x598] sm:$0xff] }
  0x94   : > { %963 = vmatpush.msrb.mxu2 %v463_v19  ;;  %985 = vmatpush.msrb.mxu3 %v548_v20  ;;  %v559_v19 = vld [vmem:[%s6488_s1 + $0x840] sm:$0xff] }
  0x95   : > { %917 = vmatpush.msrb.mxu0 %v303_v23  ;;  %939 = vmatpush.msrb.mxu1 %v388_v24  ;;  %v314_v24 = vld [vmem:[%s6488_s1 + $0x98] sm:$0xff] }
  0x96   : > { %964 = vmatpush.msrb.mxu2 %v458_v25  ;;  %986 = vmatpush.msrb.mxu3 %v543_v26  ;;  %v399_v25 = vld [vmem:[%s6488_s1 + $0x340] sm:$0xff]  ;;  %v469_v26 = vld [vmem:[%s6488_s1 + $0x570] sm:$0xff] }
  0x97   : > { %965 = vmatmul.f32.vlgmr.msrb.gmra.mxu2 %v3421_v62  ;;  %918 = vmatpush.msrb.mxu0 %v298_v28  ;;  %v378_v62 = vld [vmem:[%s6488_s1 + $0x298] sm:$0xff] }
  0x98   : > { %1041 = vmatpush.msra.mxu2 %v534_v29  ;;  %940 = vmatpush.msrb.mxu1 %v383_v30  ;;  %v554_v28 = vld [vmem:[%s6488_s1 + $0x818] sm:$0xff]  ;;  %v309_v30 = vld [vmem:[%s6488_s1 + $0x70] sm:$0xff] }
  0x99   : > { %987 = vmatpush.msrb.mxu3 %v538_v31  ;;  %919 = vmatmul.f32.vlgmr.msrb.gmra.mxu0 %v3430_v1  ;;  %v454_v1 = vld [vmem:[%s6488_s1 + $0x4f8] sm:$0xff] }
  0x9a   : > { %988 = vmatmul.f32.vlgmr.msrb.gmra.mxu3 %v3433_v2  ;;  %995 = vmatpush.msra.mxu0 %v374_v32  ;;  %v364_v2 = vld [vmem:[%s6488_s1 + $0x228] sm:$0xff]  ;;  %v394_v31 = vld [vmem:[%s6488_s1 + $0x318] sm:$0xff] }
  0x9b   : > { %1042 = vmatpush.msra.mxu2 %v529_v33  ;;  %1064 = vmatpush.msra.mxu3 %v614_v34  ;;  %v464_v33 = vld [vmem:[%s6488_s1 + $0x548] sm:$0xff]  ;;  %v549_v34 = vld [vmem:[%s6488_s1 + $0x7f0] sm:$0xff] }
  0x9c   : > { %941 = vmatpush.msrb.mxu1 %v378_v62  ;;  %996 = vmatpush.msra.mxu0 %v369_v35 }
  0x9d   : > { %942 = vmatmul.f32.vlgmr.msrb.gmra.mxu1 %v3454_v8  ;;  %1043 = vmatpush.msra.mxu2 %v524_v36  ;;  %v444_v8 = vld [vmem:[%s6488_s1 + $0x4a8] sm:$0xff] }
  0x9e   : > { %1018 = vmatpush.msra.mxu1 %v454_v1  ;;  %1065 = vmatpush.msra.mxu3 %v609_v37  ;;  %v304_v36 = vld [vmem:[%s6488_s1 + $0x48] sm:$0xff]  ;;  %v389_v1 = vld [vmem:[%s6488_s1 + $0x2f0] sm:$0xff]  ;;  %v459_v37 = vld [vmem:[%s6488_s1 + $0x520] sm:$0xff] }
  0x9f   : > { %997 = vmatpush.msra.mxu0 %v364_v2  ;;  %1044 = vmatpush.msra.mxu2 %v519_v38  ;;  %v544_v2 = vld [vmem:[%s6488_s1 + $0x7c8] sm:$0xff] }
  0xa0   : > { %1019 = vmatpush.msra.mxu1 %v449_v39  ;;  %1066 = vmatpush.msra.mxu3 %v604_v40  ;;  %v299_v40 = vld [vmem:[%s6488_s1 + $0x20] sm:$0xff] }
  0xa1   : > { %968 = vmatmul.f32.gmra.mxu2 %v3479_v16  ;;  %998 = vmatpush.msra.mxu0 %v359_v41  ;;  %v594_v16 = vld [vmem:[%s6488_s1 + $0x958] sm:$0xff] }
  0xa2   : > { %1020 = vmatpush.msra.mxu1 %v444_v8  ;;  %1045 = vmatpush.msra.mxu2 %v514_v42  ;;  %v384_v42 = vld [vmem:[%s6488_s1 + $0x2c8] sm:$0xff] }
  0xa3   : > { %1067 = vmatpush.msra.mxu3 %v599_v43  ;;  %922 = vmatmul.f32.gmra.mxu0 %v3494_v21  ;;  %v504_v21 = vld [vmem:[%s6488_s1 + $0x688] sm:$0xff]  ;;  %v539_v43 = vld [vmem:[%s6488_s1 + $0x7a0] sm:$0xff] }
  0xa4   : > { %991 = vmatmul.f32.gmra.mxu3 %v3498_v22  ;;  %999 = vmatpush.msra.mxu0 %v354_v44  ;;  %v589_v22 = vld [vmem:[%s6488_s1 + $0x930] sm:$0xff] }
  0xa5   : > { %1021 = vmatpush.msra.mxu1 %v439_v45  ;;  %1046 = vmatpush.msra.mxu2 %v509_v46  ;;  %v3151_v46 = vld [vmem:[%s3406_s17 + $0x10] sm:$0xff] }
  0xa6   : > { %1068 = vmatpush.msra.mxu3 %v594_v16  ;;  %945 = vmatmul.f32.gmra.mxu1 %v3514_v27  ;;  %v617_v27 = vperm.slane %v4126_v49, 0  ;;  %v379_v16 = vld [vmem:[%s6488_s1 + $0x2a0] sm:$0xff] }
  0xa7   : > { %1000 = vmatpush.msra.mxu0 %v349_v47  ;;  %1022 = vmatpush.msra.mxu1 %v434_v48 }
  0xa8   : > { %1047 = vmatpush.msra.mxu2 %v504_v21  ;;  %1069 = vmatpush.msra.mxu3 %v589_v22  ;;  %v3152_v22 = vld [vmem:[%s3406_s17] sm:$0xff] }
  0xa9   : > { %1001 = vmatpush.msra.mxu0 %v344_v50  ;;  %1023 = vmatpush.msra.mxu1 %v429_v51  ;;  %v3153_v50 = vld [vmem:[%s3406_s17 + $0x18] sm:$0xff]  ;;  %v1547_v51 = vld [vmem:[%s6490_s3 + $0x1e0] sm:$0xff] }
  0xaa   : > { %1048 = vmatpush.msra.mxu2 %v499_v52  ;;  %1070 = vmatpush.msra.mxu3 %v584_v53  ;;  %v644_v60 = vpop.f32.mrf.mxu0  ;;  %v3154_v53 = vld [vmem:[%s3406_s17 + $0x8] sm:$0xff] }
  0xab   : > { %1002 = vmatpush.msra.mxu0 %v339_v54  ;;  %1024 = vmatpush.msra.mxu1 %v424_v55  ;;  %v645_v0 = vadd.f32 %v644_v60, %v617_v27  ;;  %v1539_v55 = vld [vmem:[%s6490_s3 + $0x1a0] sm:$0xff] }
  0xac   : > { %1049 = vmatpush.msra.mxu2 %v494_v56  ;;  %1071 = vmatpush.msra.mxu3 %v579_v57 }
  0xad   : > { %1003 = vmatpush.msra.mxu0 %v334_v58  ;;  %1025 = vmatpush.msra.mxu1 %v419_v59  ;;  %v3155_v58 = vld [vmem:[%s3406_s17 + $0x30] sm:$0xff]  ;;  %v1535_v59 = vld [vmem:[%s6490_s3 + $0x180] sm:$0xff] }
  0xae   : > { %1050 = vmatpush.msra.mxu2 %v489_v61  ;;  %1072 = vmatpush.msra.mxu3 %v574_v63  ;;  %v667_v10 = vpop.f32.mrf.mxu1 }
  0xaf   : > { %1004 = vmatpush.msra.mxu0 %v329_v3  ;;  %1026 = vmatpush.msra.mxu1 %v414_v4  ;;  %v668_v13 = vadd.f32 %v667_v10, %v645_v0  ;;  %v690_v14 = vpop.f32.mrf.mxu2  ;;  %v3156_v0 = vld [vmem:[%s3406_s17 + $0x20] sm:$0xff]  ;;  %v3157_v3 = vld [vmem:[%s3406_s17 + $0x38] sm:$0xff] }
  0xb0   : > { %1051 = vmatpush.msra.mxu2 %v484_v5  ;;  %1073 = vmatpush.msra.mxu3 %v569_v6  ;;  %v1531_v4 = vld [vmem:[%s6490_s3 + $0x160] sm:$0xff] }
  0xb1   : > { %1005 = vmatpush.msra.mxu0 %v324_v7  ;;  %1027 = vmatpush.msra.mxu1 %v409_v9  ;;  %v691_v20 = vadd.f32 %v690_v14, %v668_v13  ;;  %v713_v23 = vpop.f32.mrf.mxu3  ;;  %v3158_v7 = vld [vmem:[%s3406_s17 + $0x28] sm:$0xff]  ;;  %v1527_v9 = vld [vmem:[%s6490_s3 + $0x140] sm:$0xff] }
  0xb2   : > { %1052 = vmatpush.msra.mxu2 %v479_v11  ;;  %1074 = vmatpush.msra.mxu3 %v564_v12  ;;  %v1523_v12 = vld [vmem:[%s6490_s3 + $0x120] sm:$0xff] }
  0xb3   : > { %1006 = vmatpush.msra.mxu0 %v319_v15  ;;  %1028 = vmatpush.msra.mxu1 %v404_v17  ;;  %v4222_v29 = vadd.f32 %v713_v23, %v691_v20  ;;  %v618_v15 = vperm.slane %v4126_v49, 1  ;;  %v1519_v17 = vld [vmem:[%s6490_s3 + $0x100] sm:$0xff] }
  0xb4   : > { %1053 = vmatpush.msra.mxu2 %v474_v18  ;;  %1075 = vmatpush.msra.mxu3 %v559_v19  ;;  %v647_v32 = vpop.f32.mrf.mxu0 }
  0xb5   : > { %1007 = vmatpush.msra.mxu0 %v314_v24  ;;  %1029 = vmatpush.msra.mxu1 %v399_v25  ;;  %v4237_v62 = vmul.f32 0.70710677, %v4222_v29  ;;  %v648_v35 = vadd.f32 %v647_v32, %v617_v27  ;;  %v1543_v27 = vld [vmem:[%s6490_s3 + $0x1c0] sm:$0xff] }
  0xb6   : > { %1054 = vmatpush.msra.mxu2 %v469_v26  ;;  %1076 = vmatpush.msra.mxu3 %v554_v28  ;;  %v1515_v24 = vld [vmem:[%s6490_s3 + $0xe0] sm:$0xff] }
  0xb7   : > { %1008 = vmatpush.msra.mxu0 %v309_v30  ;;  %1030 = vmatpush.msra.mxu1 %v394_v31  ;;  %v4254_v38 = vand.u32 2147483647, %v4237_v62  ;;  %v670_v39 = vpop.f32.mrf.mxu1  ;;  %v1611_v25 = vld [vmem:[%s6490_s3 + $0x3e0] sm:$0xff]  ;;  %vm1437_vm8 = vcmp.ge.f32.partialorder %v4237_v62, 0.0 }
  0xb8   : > { %1055 = vmatpush.msra.mxu2 %v464_v33  ;;  %1077 = vmatpush.msra.mxu3 %v549_v34  ;;  %v671_v41 = vadd.f32 %v670_v39, %v648_v35  ;;  %v693_v8 = vpop.f32.mrf.mxu2  ;;  %v1511_v35 = vld [vmem:[%s6490_s3 + $0xc0] sm:$0xff] }
  0xb9   : > { %1009 = vmatpush.msra.mxu0 %v304_v36  ;;  %1031 = vmatpush.msra.mxu1 %v389_v1  ;;  %v1117_v44 = vmul.f32 0.3275911, %v4254_v38  ;;  %v1377_v14 = vsub.f32 0.0, %v4254_v38  ;;  %v1607_v36 = vld [vmem:[%s6490_s3 + $0x3c0] sm:$0xff] }
  0xba   : > { %1056 = vmatpush.msra.mxu2 %v459_v37  ;;  %1078 = vmatpush.msra.mxu3 %v544_v2  ;;  %v694_v45 = vadd.f32 %v693_v8, %v671_v41  ;;  %v1507_v2 = vld [vmem:[%s6490_s3 + $0xa0] sm:$0xff] }
  0xbb   : > { %1057 = vmatmul.f32.vlgmr.msra.gmra.mxu2 %v3151_v46  ;;  %1010 = vmatpush.msra.mxu0 %v299_v40  ;;  %v1127_v47 = vadd.f32 1.0, %v1117_v44  ;;  %v716_v48 = vpop.f32.mrf.mxu3  ;;  %v1387_v28 = vmul.f32 %v1377_v14, %v4254_v38  ;;  %v1603_v38 = vld [vmem:[%s6490_s3 + $0x3a0] sm:$0xff] }
  0xbc   : > { %1032 = vmatpush.msra.mxu1 %v384_v42  ;;  %1079 = vmatpush.msra.mxu3 %v539_v43  ;;  %v4270_v21 = vadd.f32 %v716_v48, %v694_v45  ;;  %v1503_v46 = vld [vmem:[%s6490_s3 + $0x80] sm:$0xff] }
  0xbd   : > { %1011 = vmatmul.f32.vlgmr.msra.gmra.mxu0 %v3152_v22  ;;  %1080 = vmatmul.f32.vlgmr.msra.gmra.mxu3 %v3153_v50  ;;  %3095 = vrcp.f32 %v1127_v47  ;;  %vm1142_vm0 = vweird.f32 %v1127_v47  ;;  %v1148_v63 = vand.u32 2147483648, %v1127_v47  ;;  %v1146_v6 = vand.u32 2147483647, %v1127_v47 }
  0xbe   : > { %1033 = vmatpush.msra.mxu1 %v379_v16  ;;  %v4278_v52 = vmul.f32 0.70710677, %v4270_v21  ;;  %1782 = vmatpush.msrb.mxu0 %v1547_v51  ;;  %v1397_v43 = vmul.f32 1.442695, %v1387_v28  ;;  %v1599_v16 = vld [vmem:[%s6490_s3 + $0x380] sm:$0xff] }
  0xbf   : > { %1034 = vmatmul.f32.vlgmr.msra.gmra.mxu1 %v3154_v53  ;;  %v1149_v11 = vor.u32 1.1754944e-38, %v1148_v63  ;;  %vm1147_vm3 = vcmp.eq.f32.partialorder %v1146_v6, 8.507059e+37  ;;  %v1499_v53 = vld [vmem:[%s6490_s3 + $0x60] sm:$0xff] }
  0xc0   : > { %v4285_v54 = vand.u32 2147483647, %v4278_v52  ;;  %1783 = vmatpush.msrb.mxu0 %v1543_v27  ;;  %1805 = vmatpush.msrb.mxu1 %v1611_v25  ;;  %v1595_v27 = vld [vmem:[%s6490_s3 + $0x360] sm:$0xff]  ;;  %vm1442_vm11 = vcmp.ge.f32.partialorder %v4278_v52, 0.0 }
  0xc1   : > { %v1491_v6 = vld [vmem:[%s6490_s3 + $0x20] sm:$0xff] }
  0xc2   : > { %v1122_v56 = vmul.f32 0.3275911, %v4285_v54  ;;  %1784 = vmatpush.msrb.mxu0 %v1539_v55  ;;  %1806 = vmatpush.msrb.mxu1 %v1607_v36  ;;  %v1382_v48 = vsub.f32 0.0, %v4285_v54  ;;  %v1579_v25 = vld [vmem:[%s6490_s3 + $0x2e0] sm:$0xff] }
  0xc3   : > { %v3096_v57 = vpop.eup %3095  ;;  %1060 = vmatmul.f32.gmra.mxu2 %v3155_v58  ;;  %v1643_v52 = vld [vmem:[%s6490_s3 + $0x4e0] sm:$0xff] }
  0xc4   : > { %v1138_v60 = vmul.f32 %v3096_v57, %v1127_v47  ;;  %v4295_v61 = vadd.f32 1.0, %v1122_v56  ;;  %1785 = vmatpush.msrb.mxu0 %v1535_v59  ;;  %vm1143_vm1 = vweird.f32 %v3096_v57  ;;  %1807 = vmatpush.msrb.mxu1 %v1603_v38  ;;  %v1495_v59 = vld [vmem:[%s6490_s3 + $0x40] sm:$0xff]  ;;  %v1392_v63 = vmul.f32 %v1382_v48, %v4285_v54 }
  0xc5   : > { %1014 = vmatmul.f32.gmra.mxu0 %v3156_v0  ;;  %1083 = vmatmul.f32.gmra.mxu3 %v3157_v3  ;;  %vm1144_vm2 = vmor %vm1142_vm0, %vm1143_vm1  ;;  %v1587_v54 = vld [vmem:[%s6490_s3 + $0x320] sm:$0xff] }
  0xc6   : > { %v1139_v5 = vsub.f32 1.0, %v1138_v60  ;;  %3097 = vrcp.f32 %v4295_v61  ;;  %1786 = vmatpush.msrb.mxu0 %v1531_v4  ;;  %vm1217_vm4 = vweird.f32 %v4295_v61  ;;  %v1223_v30 = vand.u32 2147483648, %v4295_v61  ;;  %1808 = vmatpush.msrb.mxu1 %v1599_v16  ;;  %v1591_v60 = vld [vmem:[%s6490_s3 + $0x340] sm:$0xff] }
  0xc7   : > { %1037 = vmatmul.f32.gmra.mxu1 %v3158_v7  ;;  %v1221_v33 = vand.u32 2147483647, %v4295_v61  ;;  %3099 = vpow2.f32 %v1397_v43 }
  0xc8   : > { %v1140_v10 = vmul.f32 %v3096_v57, %v1139_v5  ;;  %1787 = vmatpush.msrb.mxu0 %v1527_v9  ;;  %v1224_v41 = vor.u32 1.1754944e-38, %v1223_v30  ;;  %1809 = vmatpush.msrb.mxu1 %v1595_v27  ;;  %v1655_v27 = vld [vmem:[%s6490_s3 + $0x540] sm:$0xff] }
  0xc9   : > { %vm1222_vm7 = vcmp.eq.f32.partialorder %v1221_v33, 8.507059e+37 }
  0xca   : > { %v1141_v13 = vadd.f32 %v3096_v57, %v1140_v10  ;;  %1788 = vmatpush.msrb.mxu0 %v1523_v12  ;;  %1810 = vmatpush.msrb.mxu1 %v1591_v60  ;;  %v1487_v12 = vld [vmem:[%s6490_s3] sm:$0xff] }
  0xcb   : > { %v1555_v60 = vld [vmem:[%s6490_s3 + $0x220] sm:$0xff] }
  0xcc   : > { %v3098_v18 = vpop.eup %3097  ;;  %v1145_v19 = vsel %vm1144_vm2, %v3096_v57, %v1141_v13  ;;  %1789 = vmatpush.msrb.mxu0 %v1519_v17  ;;  %1811 = vmatpush.msrb.mxu1 %v1587_v54  ;;  %v1583_v13 = vld [vmem:[%s6490_s3 + $0x300] sm:$0xff]  ;;  %v1548_v54 = vld [vmem:[%s6490_s3 + $0x1e8] sm:$0xff] }
  0xcd   : > { %v4316_v20 = vsel %vm1147_vm3, %v1149_v11, %v1145_v19  ;;  %v1213_v23 = vmul.f32 %v3098_v18, %v4295_v61  ;;  %vm1218_vm5 = vweird.f32 %v3098_v18  ;;  %v3100_v19 = vpop.eup %3099 }
  0xce   : > { %v1287_v26 = vmul.f32 1.0614054, %v4316_v20  ;;  %v736_v31 = vpop.f32.mrf.mxu0  ;;  %1790 = vmatpush.msrb.mxu0 %v1515_v24  ;;  %vm4347_vm6 = vmor %vm1217_vm4, %vm1218_vm5  ;;  %1812 = vmatpush.msrb.mxu1 %v1583_v13 }
  0xcf   : > { %v1214_v32 = vsub.f32 1.0, %v1213_v23  ;;  %v737_v34 = vadd.f32 %v736_v31, %v618_v15 }
  0xd0   : > { %v1297_v1 = vadd.f32 -1.4531521, %v1287_v26  ;;  %1791 = vmatpush.msrb.mxu0 %v1511_v35  ;;  %v1675_v26 = vld [vmem:[%s6490_s3 + $0x5e0] sm:$0xff]  ;;  %1813 = vmatpush.msrb.mxu1 %v1579_v25 }
  0xd1   : > { %v1215_v37 = vmul.f32 %v3098_v18, %v1214_v32  ;;  %1828 = vmatpush.msrb.mxu2 %v1675_v26  ;;  %v1671_v35 = vld [vmem:[%s6490_s3 + $0x5c0] sm:$0xff] }
  0xd2   : > { %v1307_v39 = vmul.f32 %v1297_v1, %v4316_v20  ;;  %v759_v8 = vpop.f32.mrf.mxu1  ;;  %v782_v42 = vpop.f32.mrf.mxu2  ;;  %1792 = vmatpush.msrb.mxu0 %v1507_v2  ;;  %v1667_v2 = vld [vmem:[%s6490_s3 + $0x5a0] sm:$0xff] }
  0xd3   : > { %v1216_v44 = vadd.f32 %v3098_v18, %v1215_v37  ;;  %v760_v45 = vadd.f32 %v759_v8, %v737_v34  ;;  %v1575_v34 = vld [vmem:[%s6490_s3 + $0x2c0] sm:$0xff]  ;;  %1829 = vmatpush.msrb.mxu2 %v1671_v35 }
  0xd4   : > { %v1317_v47 = vadd.f32 1.4214138, %v1307_v39  ;;  %1793 = vmatpush.msrb.mxu0 %v1503_v46  ;;  %1814 = vmatpush.msrb.mxu1 %v1575_v34  ;;  %v1571_v37 = vld [vmem:[%s6490_s3 + $0x2a0] sm:$0xff] }
  0xd5   : > { %v1220_v22 = vsel %vm4347_vm6, %v3098_v18, %v1216_v44  ;;  %v783_v50 = vadd.f32 %v782_v42, %v760_v45  ;;  %v805_v51 = vpop.f32.mrf.mxu3  ;;  %1830 = vmatpush.msrb.mxu2 %v1667_v2  ;;  %v1663_v8 = vld [vmem:[%s6490_s3 + $0x580] sm:$0xff] }
  0xd6   : > { %v1327_v55 = vmul.f32 %v1317_v47, %v4316_v20  ;;  %v4367_v56 = vsel %vm1222_vm7, %v1224_v41, %v1220_v22  ;;  %1794 = vmatpush.msrb.mxu0 %v1499_v53  ;;  %1815 = vmatpush.msrb.mxu1 %v1571_v37  ;;  %v1567_v41 = vld [vmem:[%s6490_s3 + $0x280] sm:$0xff] }
  0xd7   : > { %v1292_v57 = vmul.f32 1.0614054, %v4367_v56  ;;  %v4370_v58 = vadd.f32 %v805_v51, %v783_v50  ;;  %1831 = vmatpush.msrb.mxu2 %v1663_v8  ;;  %v1563_v45 = vld [vmem:[%s6490_s3 + $0x260] sm:$0xff]  ;;  %v1087_v50 = vmul.f32 0.5, %v4222_v29 }
  0xd8   : > { %v1337_v61 = vadd.f32 -0.28449672, %v1327_v55  ;;  %v739_v0 = vpop.f32.mrf.mxu0  ;;  %1795 = vmatpush.msrb.mxu0 %v1495_v59  ;;  %1816 = vmatpush.msrb.mxu1 %v1567_v41  ;;  %v1659_v46 = vld [vmem:[%s6490_s3 + $0x560] sm:$0xff]  ;;  %v1532_v41 = vld [vmem:[%s6490_s3 + $0x168] sm:$0xff] }
  0xd9   : > { %v1302_v3 = vadd.f32 -1.4531521, %v1292_v57  ;;  %v4380_v4 = vmul.f32 0.70710677, %v4370_v58  ;;  %v740_v5 = vadd.f32 %v739_v0, %v618_v15  ;;  %v1407_v15 = vmul.f32 1.442695, %v1392_v63  ;;  %1832 = vmatpush.msrb.mxu2 %v1659_v46 }
  0xda   : > { %v1347_v7 = vmul.f32 %v1337_v61, %v4316_v20  ;;  %1796 = vmatpush.msrb.mxu0 %v1491_v6  ;;  %1817 = vmatpush.msrb.mxu1 %v1563_v45  ;;  %v1559_v53 = vld [vmem:[%s6490_s3 + $0x240] sm:$0xff] }
  0xdb   : > { %v1312_v9 = vmul.f32 %v1302_v3, %v4367_v56  ;;  %v4393_v10 = vand.u32 2147483647, %v4380_v4  ;;  %v762_v11 = vpop.f32.mrf.mxu1  ;;  %3101 = vpow2.f32 %v1407_v15  ;;  %1833 = vmatpush.msrb.mxu2 %v1655_v27  ;;  %v1651_v61 = vld [vmem:[%s6490_s3 + $0x520] sm:$0xff]  ;;  %v1544_v15 = vld [vmem:[%s6490_s3 + $0x1c8] sm:$0xff]  ;;  %vm1438_vm2 = vcmp.ge.f32.partialorder %v4380_v4, 0.0 }
  0xdc   : > { %v1357_v14 = vadd.f32 0.2548296, %v1347_v7  ;;  %v763_v17 = vadd.f32 %v762_v11, %v740_v5  ;;  %v785_v18 = vpop.f32.mrf.mxu2  ;;  %1797 = vmatpush.msrb.mxu0 %v1487_v12  ;;  %1818 = vmatpush.msrb.mxu1 %v1559_v53  ;;  %v1551_v5 = vld [vmem:[%s6490_s3 + $0x200] sm:$0xff]  ;;  %v1584_v4 = vld [vmem:[%s6490_s3 + $0x308] sm:$0xff] }
  0xdd   : > { %v1322_v23 = vadd.f32 1.4214138, %v1312_v9  ;;  %v1118_v24 = vmul.f32 0.3275911, %v4393_v10  ;;  %1834 = vmatpush.msrb.mxu2 %v1651_v61  ;;  %v1647_v6 = vld [vmem:[%s6490_s3 + $0x500] sm:$0xff]  ;;  %v1378_v13 = vsub.f32 0.0, %v4393_v10 }
  0xde   : > { %v1367_v28 = vmul.f32 %v1357_v14, %v4316_v20  ;;  %v786_v30 = vadd.f32 %v785_v18, %v763_v17  ;;  %1819 = vmatpush.msrb.mxu1 %v1555_v60  ;;  %v619_v18 = vperm.slane %v4126_v49, 2  ;;  %v1619_v60 = vld [vmem:[%s6490_s3 + $0x420] sm:$0xff] }
  0xdf   : > { %v1332_v31 = vmul.f32 %v1322_v23, %v4367_v56  ;;  %v4410_v32 = vadd.f32 1.0, %v1118_v24  ;;  %v808_v33 = vpop.f32.mrf.mxu3  ;;  %1835 = vmatpush.msrb.mxu2 %v1647_v6  ;;  %v1092_v24 = vmul.f32 0.5, %v4270_v21  ;;  %v1635_v21 = vld [vmem:[%s6490_s3 + $0x4a0] sm:$0xff] }
  0xe0   : > { %v1417_v36 = vmul.f32 %v3100_v19, %v1367_v28  ;;  %v4418_v1 = vadd.f32 %v808_v33, %v786_v30  ;;  %1820 = vmatpush.msrb.mxu1 %v1551_v5  ;;  %v1639_v19 = vld [vmem:[%s6490_s3 + $0x4c0] sm:$0xff]  ;;  %v1540_v28 = vld [vmem:[%s6490_s3 + $0x1a8] sm:$0xff] }
  0xe1   : > { %v1342_v20 = vadd.f32 -0.28449672, %v1332_v31  ;;  %3103 = vrcp.f32 %v4410_v32  ;;  %v3102_v16 = vpop.eup %3101  ;;  %vm1157_vm9 = vweird.f32 %v4410_v32  ;;  %v1161_v0 = vand.u32 2147483647, %v4410_v32  ;;  %1836 = vmatpush.msrb.mxu2 %v1643_v52  ;;  %v1615_v6 = vld [vmem:[%s6490_s3 + $0x400] sm:$0xff] }
  0xe2   : > { %v1427_v38 = vsub.f32 1.0, %v1417_v36  ;;  %v4428_v39 = vmul.f32 0.70710677, %v4418_v1  ;;  %1897 = vmatpush.msra.mxu1 %v1548_v54  ;;  %v1388_v31 = vmul.f32 %v1378_v13, %v4393_v10  ;;  %v1536_v10 = vld [vmem:[%s6490_s3 + $0x188] sm:$0xff] }
  0xe3   : > { %v1352_v40 = vmul.f32 %v1342_v20, %v4367_v56  ;;  %vm1162_vm13 = vcmp.eq.f32.partialorder %v1161_v0, 8.507059e+37  ;;  %1837 = vmatpush.msrb.mxu2 %v1639_v19  ;;  %v1520_v0 = vld [vmem:[%s6490_s3 + $0x108] sm:$0xff] }
  0xe4   : > { %v1447_v42 = vsub.f32 0.0, %v1427_v38  ;;  %v4438_v43 = vand.u32 2147483647, %v4428_v39  ;;  %1898 = vmatpush.msra.mxu1 %v1544_v15  ;;  %v1612_v13 = vld [vmem:[%s6490_s3 + $0x3e8] sm:$0xff]  ;;  %vm1443_vm5 = vcmp.ge.f32.partialorder %v4428_v39, 0.0 }
  0xe5   : > { %v1362_v44 = vadd.f32 0.2548296, %v1352_v40  ;;  %1838 = vmatpush.msrb.mxu2 %v1635_v21  ;;  %v1512_v19 = vld [vmem:[%s6490_s3 + $0xc8] sm:$0xff] }
  0xe6   : > { %v1457_v47 = vsel %vm1437_vm8, %v1427_v38, %v1447_v42  ;;  %v1123_v48 = vmul.f32 0.3275911, %v4438_v43  ;;  %1899 = vmatpush.msra.mxu1 %v1540_v28  ;;  %v1631_v38 = vld [vmem:[%s6490_s3 + $0x480] sm:$0xff]  ;;  %v1383_v27 = vsub.f32 0.0, %v4438_v43 }
  0xe7   : > { %v3104_v22 = vpop.eup %3103  ;;  %v1467_v51 = vadd.f32 1.0, %v1457_v47  ;;  %v1372_v62 = vmul.f32 %v1362_v44, %v4367_v56  ;;  %v1163_v56 = vand.u32 2147483648, %v4410_v32  ;;  %1839 = vmatpush.msrb.mxu2 %v1631_v38  ;;  %v1627_v42 = vld [vmem:[%s6490_s3 + $0x460] sm:$0xff] }
  0xe8   : > { %v1153_v55 = vmul.f32 %v3104_v22, %v4410_v32  ;;  %v4457_v57 = vadd.f32 1.0, %v1123_v48  ;;  %vm1158_vm10 = vweird.f32 %v3104_v22  ;;  %1900 = vmatpush.msra.mxu1 %v1536_v10  ;;  %v1528_v48 = vld [vmem:[%s6490_s3 + $0x148] sm:$0xff] }
  0xe9   : > { %v4459_v59 = vmul.f32 %v1467_v51, %v1087_v50  ;;  %v1422_v29 = vmul.f32 %v3102_v16, %v1372_v62  ;;  %vm4484_vm12 = vmor %vm1157_vm9, %vm1158_vm10  ;;  %v1164_v12 = vor.u32 1.1754944e-38, %v1163_v56  ;;  %1840 = vmatpush.msrb.mxu2 %v1627_v42  ;;  %v1623_v62 = vld [vmem:[%s6490_s3 + $0x440] sm:$0xff] }
  0xea   : > { %v1154_v63 = vsub.f32 1.0, %v1153_v55  ;;  %3105 = vrcp.f32 %v4457_v57  ;;  %vm1232_vm14 = vweird.f32 %v4457_v57  ;;  %v1238_v35 = vand.u32 2147483648, %v4457_v57  ;;  %1901 = vmatpush.msra.mxu1 %v1532_v41  ;;  %v1524_v55 = vld [vmem:[%s6490_s3 + $0x128] sm:$0xff] }
  0xeb   : > { %v1432_v3 = vsub.f32 1.0, %v1422_v29  ;;  %1798 = vmatmul.f32.vlgmr.msrb.gmra.mxu0 %v4459_v59  ;;  %v1236_v37 = vand.u32 2147483647, %v4457_v57  ;;  %1841 = vmatpush.msrb.mxu2 %v1623_v62  ;;  %v1600_v41 = vld [vmem:[%s6490_s3 + $0x388] sm:$0xff] }
  0xec   : > { %v1155_v7 = vmul.f32 %v3104_v22, %v1154_v63  ;;  %v1239_v46 = vor.u32 1.1754944e-38, %v1238_v35  ;;  %1902 = vmatpush.msra.mxu1 %v1528_v48  ;;  %v1604_v35 = vld [vmem:[%s6490_s3 + $0x3a8] sm:$0xff] }
  0xed   : > { %v1452_v9 = vsub.f32 0.0, %v1432_v3  ;;  %vm1237_vm1 = vcmp.eq.f32.partialorder %v1236_v37, 8.507059e+37  ;;  %1842 = vmatpush.msrb.mxu2 %v1619_v60  ;;  %v1727_v37 = vld [vmem:[%s6490_s3 + $0x780] sm:$0xff]  ;;  %v1592_v62 = vld [vmem:[%s6490_s3 + $0x348] sm:$0xff] }
  0xee   : > { %v1156_v14 = vadd.f32 %v3104_v22, %v1155_v7  ;;  %1903 = vmatpush.msra.mxu1 %v1524_v55  ;;  %v1739_v7 = vld [vmem:[%s6490_s3 + $0x7e0] sm:$0xff] }
  0xef   : > { %v1462_v17 = vsel %vm1442_vm11, %v1432_v3, %v1452_v9  ;;  %v1393_v9 = vmul.f32 %v1383_v27, %v4438_v43  ;;  %1851 = vmatpush.msrb.mxu3 %v1739_v7  ;;  %1843 = vmatpush.msrb.mxu2 %v1615_v6  ;;  %v1735_v43 = vld [vmem:[%s6490_s3 + $0x7c0] sm:$0xff]  ;;  %v1488_v7 = vld [vmem:[%s6490_s3 + $0x8] sm:$0xff] }
  0xf0   : > { %v3106_v23 = vpop.eup %3105  ;;  %v1472_v25 = vadd.f32 1.0, %v1462_v17  ;;  %v1160_v26 = vsel %vm4484_vm12, %v3104_v22, %v1156_v14  ;;  %v1399_v22 = vmul.f32 1.442695, %v1388_v31  ;;  %1904 = vmatpush.msra.mxu1 %v1520_v0  ;;  %v1715_v55 = vld [vmem:[%s6490_s3 + $0x720] sm:$0xff] }
  0xf1   : > { %v4505_v30 = vsel %vm1162_vm13, %v1164_v12, %v1160_v26  ;;  %v1228_v32 = vmul.f32 %v3106_v23, %v4457_v57  ;;  %vm1233_vm15 = vweird.f32 %v3106_v23  ;;  %v1516_v12 = vld [vmem:[%s6490_s3 + $0xe8] sm:$0xff]  ;;  %1920 = vmatpush.msra.mxu2 %v1612_v13  ;;  %1852 = vmatpush.msrb.mxu3 %v1735_v43  ;;  %v1731_v26 = vld [vmem:[%s6490_s3 + $0x7a0] sm:$0xff]  ;;  %v1409_v31 = vmul.f32 1.442695, %v1393_v9 }
  0xf2   : > { %v4512_v33 = vmul.f32 %v1472_v25, %v1092_v24  ;;  %v1288_v34 = vmul.f32 1.0614054, %v4505_v30  ;;  %v828_v36 = vpop.f32.mrf.mxu0  ;;  %vm4536_vm0 = vmor %vm1232_vm14, %vm1233_vm15  ;;  %3107 = vpow2.f32 %v1399_v22  ;;  %1905 = vmatpush.msra.mxu1 %v1516_v12  ;;  %v1719_v22 = vld [vmem:[%s6490_s3 + $0x740] sm:$0xff]  ;;  %v1088_v9 = vmul.f32 0.5, %v4370_v58  ;;  %v1580_v43 = vld [vmem:[%s6490_s3 + $0x2e8] sm:$0xff] }
  0xf3   : > { %v1229_v20 = vsub.f32 1.0, %v1228_v32  ;;  %v829_v2 = vadd.f32 %v828_v36, %v619_v18  ;;  %1853 = vmatpush.msrb.mxu3 %v1731_v26  ;;  %3109 = vpow2.f32 %v1409_v31  ;;  %v1711_v0 = vld [vmem:[%s6490_s3 + $0x700] sm:$0xff]  ;;  %v1576_v26 = vld [vmem:[%s6490_s3 + $0x2c8] sm:$0xff] }
  0xf4   : > { %v1298_v40 = vadd.f32 -1.4531521, %v1288_v34  ;;  %1801 = vmatmul.f32.gmra.mxu0 %v4512_v33  ;;  %1906 = vmatpush.msra.mxu1 %v1512_v19  ;;  %v1508_v34 = vld [vmem:[%s6490_s3 + $0xa8] sm:$0xff]  ;;  %v1699_v31 = vld [vmem:[%s6490_s3 + $0x6a0] sm:$0xff] }
  0xf5   : > { %v1230_v8 = vmul.f32 %v3106_v23, %v1229_v20  ;;  %1854 = vmatpush.msrb.mxu3 %v1727_v37 }
  0xf6   : > { %v1308_v44 = vmul.f32 %v1298_v40, %v4505_v30  ;;  %v851_v16 = vpop.f32.mrf.mxu1  ;;  %v874_v47 = vpop.f32.mrf.mxu2  ;;  %1907 = vmatpush.msra.mxu1 %v1508_v34  ;;  %v1504_v40 = vld [vmem:[%s6490_s3 + $0x88] sm:$0xff] }
  0xf7   : > { %v1231_v50 = vadd.f32 %v3106_v23, %v1230_v8  ;;  %v852_v51 = vadd.f32 %v851_v16, %v829_v2  ;;  %v1500_v16 = vld [vmem:[%s6490_s3 + $0x68] sm:$0xff] }
  0xf8   : > { %v1318_v53 = vadd.f32 1.4214138, %v1308_v44  ;;  %v3108_v36 = vpop.eup %3107  ;;  %1908 = vmatpush.msra.mxu1 %v1504_v40  ;;  %v1691_v40 = vld [vmem:[%s6490_s3 + $0x660] sm:$0xff] }
  0xf9   : > { %v1235_v57 = vsel %vm4536_vm0, %v3106_v23, %v1231_v50  ;;  %v875_v29 = vadd.f32 %v874_v47, %v852_v51  ;;  %v897_v56 = vpop.f32.mrf.mxu3  ;;  %v1608_v23 = vld [vmem:[%s6490_s3 + $0x3c8] sm:$0xff] }
  0xfa   : > { %v1328_v61 = vmul.f32 %v1318_v53, %v4505_v30  ;;  %v4556_v63 = vsel %vm1237_vm1, %v1239_v46, %v1235_v57  ;;  %1921 = vmatpush.msra.mxu2 %v1608_v23  ;;  %v1596_v47 = vld [vmem:[%s6490_s3 + $0x368] sm:$0xff]  ;;  %1909 = vmatpush.msra.mxu1 %v1500_v16  ;;  %v1703_v23 = vld [vmem:[%s6490_s3 + $0x6c0] sm:$0xff] }
  0xfb   : > { %v1293_v3 = vmul.f32 1.0614054, %v4556_v63  ;;  %v4562_v5 = vadd.f32 %v897_v56, %v875_v29  ;;  %v1496_v51 = vld [vmem:[%s6490_s3 + $0x48] sm:$0xff]  ;;  %v1687_v16 = vld [vmem:[%s6490_s3 + $0x640] sm:$0xff] }
  0xfc   : > { %v1338_v54 = vadd.f32 -0.28449672, %v1328_v61  ;;  %v831_v11 = vpop.f32.mrf.mxu0  ;;  %1922 = vmatpush.msra.mxu2 %v1604_v35  ;;  %1910 = vmatpush.msra.mxu1 %v1496_v51  ;;  %v1492_v29 = vld [vmem:[%s6490_s3 + $0x28] sm:$0xff] }
  0xfd   : > { %v1303_v52 = vadd.f32 -1.4531521, %v1293_v3  ;;  %v4578_v14 = vmul.f32 0.70710677, %v4562_v5  ;;  %v832_v15 = vadd.f32 %v831_v11, %v619_v18  ;;  %v1588_v56 = vld [vmem:[%s6490_s3 + $0x328] sm:$0xff]  ;;  %v3110_v3 = vpop.eup %3109 }
  0xfe   : > { %v1348_v17 = vmul.f32 %v1338_v54, %v4505_v30  ;;  %1923 = vmatpush.msra.mxu2 %v1600_v41  ;;  %1911 = vmatpush.msra.mxu1 %v1492_v29  ;;  %v1093_v41 = vmul.f32 0.5, %v4418_v1 }
  0xff   : > { %v1313_v24 = vmul.f32 %v1303_v52, %v4556_v63  ;;  %v4594_v18 = vand.u32 2147483647, %v4578_v14  ;;  %v854_v25 = vpop.f32.mrf.mxu1  ;;  %v1707_v52 = vld [vmem:[%s6490_s3 + $0x6e0] sm:$0xff]  ;;  %vm1439_vm12 = vcmp.ge.f32.partialorder %v4578_v14, 0.0  ;;  %v1640_v14 = vld [vmem:[%s6490_s3 + $0x4c8] sm:$0xff] }
 0x100   : > { %v1358_v28 = vadd.f32 0.2548296, %v1348_v17  ;;  %v855_v32 = vadd.f32 %v854_v25, %v832_v15  ;;  %v877_v21 = vpop.f32.mrf.mxu2  ;;  %1924 = vmatpush.msra.mxu2 %v1596_v47  ;;  %1912 = vmatpush.msra.mxu1 %v1488_v7 }
 0x101   : > { %v1323_v10 = vadd.f32 1.4214138, %v1313_v24  ;;  %v1119_v20 = vmul.f32 0.3275911, %v4594_v18 }
 0x102   : > { %v1368_v2 = vmul.f32 %v1358_v28, %v4505_v30  ;;  %v878_v38 = vadd.f32 %v877_v21, %v855_v32  ;;  %v1723_v30 = vld [vmem:[%s6490_s3 + $0x760] sm:$0xff]  ;;  %1925 = vmatpush.msra.mxu2 %v1592_v62  ;;  %v1572_v21 = vld [vmem:[%s6490_s3 + $0x2a8] sm:$0xff] }
 0x103   : > { %v1333_v8 = vmul.f32 %v1323_v10, %v4556_v63  ;;  %v4617_v42 = vadd.f32 1.0, %v1119_v20  ;;  %v900_v44 = vpop.f32.mrf.mxu3  ;;  %1855 = vmatpush.msrb.mxu3 %v1723_v30  ;;  %v1695_v10 = vld [vmem:[%s6490_s3 + $0x680] sm:$0xff]  ;;  %v1568_v20 = vld [vmem:[%s6490_s3 + $0x288] sm:$0xff] }
 0x104   : > { %v1418_v45 = vmul.f32 %v3108_v36, %v1368_v2  ;;  %v4622_v46 = vadd.f32 %v900_v44, %v878_v38  ;;  %1926 = vmatpush.msra.mxu2 %v1588_v56  ;;  %v1379_v2 = vsub.f32 0.0, %v4594_v18  ;;  %v620_v38 = vperm.slane %v4126_v49, 3  ;;  %v1564_v44 = vld [vmem:[%s6490_s3 + $0x268] sm:$0xff] }
 0x105   : > { %v1343_v48 = vadd.f32 -0.28449672, %v1333_v8  ;;  %3111 = vrcp.f32 %v4617_v42  ;;  %1856 = vmatpush.msrb.mxu3 %v1719_v22  ;;  %vm1172_vm3 = vweird.f32 %v4617_v42  ;;  %v1176_v25 = vand.u32 2147483647, %v4617_v42 }
 0x106   : > { %v1428_v50 = vsub.f32 1.0, %v1418_v45  ;;  %v4642_v27 = vmul.f32 0.70710677, %v4622_v46  ;;  %1927 = vmatpush.msra.mxu2 %v1584_v4  ;;  %v1389_v51 = vmul.f32 %v1379_v2, %v4594_v18  ;;  %v1556_v18 = vld [vmem:[%s6490_s3 + $0x228] sm:$0xff] }
 0x107   : > { %v1353_v53 = vmul.f32 %v1343_v48, %v4556_v63  ;;  %1857 = vmatpush.msrb.mxu3 %v1715_v55  ;;  %vm1177_vm7 = vcmp.eq.f32.partialorder %v1176_v25, 8.507059e+37  ;;  %v1683_v55 = vld [vmem:[%s6490_s3 + $0x620] sm:$0xff]  ;;  %v1552_v4 = vld [vmem:[%s6490_s3 + $0x208] sm:$0xff] }
 0x108   : > { %v1448_v57 = vsub.f32 0.0, %v1428_v50  ;;  %v4655_v61 = vand.u32 2147483647, %v4642_v27  ;;  %1928 = vmatpush.msra.mxu2 %v1580_v43  ;;  %v1668_v25 = vld [vmem:[%s6490_s3 + $0x5a8] sm:$0xff]  ;;  %vm1444_vm1 = vcmp.ge.f32.partialorder %v4642_v27, 0.0 }
 0x109   : > { %v1363_v60 = vadd.f32 0.2548296, %v1353_v53  ;;  %1858 = vmatpush.msrb.mxu3 %v1711_v0  ;;  %v1660_v2 = vld [vmem:[%s6490_s3 + $0x568] sm:$0xff] }
 0x10a   : > { %v1458_v6 = vsel %vm1438_vm2, %v1428_v50, %v1448_v57  ;;  %v1124_v13 = vmul.f32 0.3275911, %v4655_v61  ;;  %1929 = vmatpush.msra.mxu2 %v1576_v26  ;;  %v1560_v50 = vld [vmem:[%s6490_s3 + $0x248] sm:$0xff]  ;;  %v1384_v43 = vsub.f32 0.0, %v4655_v61 }
 0x10b   : > { %v3112_v54 = vpop.eup %3111  ;;  %v1468_v11 = vadd.f32 1.0, %v1458_v6  ;;  %v1373_v12 = vmul.f32 %v1363_v60, %v4556_v63  ;;  %v1178_v63 = vand.u32 2147483648, %v4617_v42  ;;  %1859 = vmatpush.msrb.mxu3 %v1707_v52  ;;  %v1679_v60 = vld [vmem:[%s6490_s3 + $0x600] sm:$0xff] }
 0x10c   : > { %v1168_v15 = vmul.f32 %v3112_v54, %v4617_v42  ;;  %v4679_v19 = vadd.f32 1.0, %v1124_v13  ;;  %vm1173_vm4 = vweird.f32 %v3112_v54  ;;  %1930 = vmatpush.msra.mxu2 %v1572_v21  ;;  %v1394_v21 = vmul.f32 %v1384_v43, %v4655_v61  ;;  %v1768_v43 = vld [vmem:[%s6490_s3 + $0x8c8] sm:$0xff] }
 0x10d   : > { %v4676_v17 = vmul.f32 %v1468_v11, %v1088_v9  ;;  %v1423_v58 = vmul.f32 %v3110_v3, %v1373_v12  ;;  %1860 = vmatpush.msrb.mxu3 %v1703_v23  ;;  %vm4700_vm6 = vmor %vm1172_vm3, %vm1173_vm4  ;;  %v1179_v36 = vor.u32 1.1754944e-38, %v1178_v63  ;;  %v1401_v9 = vmul.f32 1.442695, %v1389_v51  ;;  %v1652_v51 = vld [vmem:[%s6490_s3 + $0x528] sm:$0xff]  ;;  %v1767_v11 = vld [vmem:[%s6490_s3 + $0x8c0] sm:$0xff] }
 0x10e   : > { %v1169_v24 = vsub.f32 1.0, %v1168_v15  ;;  %3113 = vrcp.f32 %v4679_v19  ;;  %1931 = vmatpush.msra.mxu2 %v1568_v20  ;;  %vm1247_vm8 = vweird.f32 %v4679_v19  ;;  %v1253_v62 = vand.u32 2147483648, %v4679_v19 }
 0x10f   : > { %v1433_v28 = vsub.f32 1.0, %v1423_v58  ;;  %1821 = vmatmul.f32.vlgmr.msrb.gmra.mxu1 %v4676_v17  ;;  %1861 = vmatpush.msrb.mxu3 %v1699_v31  ;;  %v1251_v56 = vand.u32 2147483647, %v4679_v19  ;;  %v1672_v58 = vld [vmem:[%s6490_s3 + $0x5c8] sm:$0xff]  ;;  %3115 = vpow2.f32 %v1401_v9 }
 0x110   : > { %v1170_v32 = vmul.f32 %v3112_v54, %v1169_v24  ;;  %1932 = vmatpush.msra.mxu2 %v1564_v44  ;;  %v1254_v12 = vor.u32 1.1754944e-38, %v1253_v62 }
 0x111   : > { %v1453_v34 = vsub.f32 0.0, %v1433_v28  ;;  %1862 = vmatpush.msrb.mxu3 %v1695_v10  ;;  %vm1252_vm11 = vcmp.eq.f32.partialorder %v1251_v56, 8.507059e+37  ;;  %v1664_v10 = vld [vmem:[%s6490_s3 + $0x588] sm:$0xff] }
 0x112   : > { %v1171_v39 = vadd.f32 %v3112_v54, %v1170_v32  ;;  %1933 = vmatpush.msra.mxu2 %v1560_v50  ;;  %v1648_v56 = vld [vmem:[%s6490_s3 + $0x508] sm:$0xff] }
 0x113   : > { %v1463_v37 = vsel %vm1443_vm5, %v1433_v28, %v1453_v34  ;;  %1863 = vmatpush.msrb.mxu3 %v1691_v40 }
 0x114   : > { %v1473_v8 = vadd.f32 1.0, %v1463_v37  ;;  %v1175_v42 = vsel %vm4700_vm6, %v3112_v54, %v1171_v39  ;;  %v3114_v30 = vpop.eup %3113  ;;  %1934 = vmatpush.msra.mxu2 %v1556_v18  ;;  %v1676_v54 = vld [vmem:[%s6490_s3 + $0x5e8] sm:$0xff] }
 0x115   : > { %v4721_v45 = vsel %vm1177_vm7, %v1179_v36, %v1175_v42  ;;  %v1243_v48 = vmul.f32 %v3114_v30, %v4679_v19  ;;  %1864 = vmatpush.msrb.mxu3 %v1687_v16  ;;  %vm1248_vm9 = vweird.f32 %v3114_v30  ;;  %v3116_v42 = vpop.eup %3115 }
 0x116   : > { %v4726_v47 = vmul.f32 %v1473_v8, %v1093_v41  ;;  %v1289_v1 = vmul.f32 1.0614054, %v4721_v45  ;;  %v920_v22 = vpop.f32.mrf.mxu0  ;;  %vm4759_vm10 = vmor %vm1247_vm8, %vm1248_vm9  ;;  %1935 = vmatpush.msra.mxu2 %v1552_v4 }
 0x117   : > { %v921_v53 = vadd.f32 %v920_v22, %v620_v38  ;;  %v1244_v29 = vsub.f32 1.0, %v1243_v48  ;;  %1865 = vmatpush.msrb.mxu3 %v1683_v55 }
 0x118   : > { %v1299_v57 = vadd.f32 -1.4531521, %v1289_v1  ;;  %1824 = vmatmul.f32.gmra.mxu1 %v4726_v47 }
 0x119   : > { %v1245_v3 = vmul.f32 %v3114_v30, %v1244_v29  ;;  %1866 = vmatpush.msrb.mxu3 %v1679_v60 }
 0x11a   : > { %v1309_v0 = vmul.f32 %v1299_v57, %v4721_v45  ;;  %v943_v6 = vpop.f32.mrf.mxu1  ;;  %v966_v7 = vpop.f32.mrf.mxu2 }
 0x11b   : > { %v944_v13 = vadd.f32 %v943_v6, %v921_v53  ;;  %v1246_v15 = vadd.f32 %v3114_v30, %v1245_v3  ;;  %1943 = vmatpush.msra.mxu3 %v1676_v54  ;;  %v1644_v3 = vld [vmem:[%s6490_s3 + $0x4e8] sm:$0xff] }
 0x11c   : > { %v1319_v52 = vadd.f32 1.4214138, %v1309_v0  ;;  %v1771_v0 = vld [vmem:[%s6490_s3 + $0x8e0] sm:$0xff] }
 0x11d   : > { %v967_v63 = vadd.f32 %v966_v7, %v944_v13  ;;  %v989_v19 = vpop.f32.mrf.mxu3  ;;  %v1250_v24 = vsel %vm4759_vm10, %v3114_v30, %v1246_v15  ;;  %1944 = vmatpush.msra.mxu3 %v1672_v58  ;;  %v1656_v30 = vld [vmem:[%s6490_s3 + $0x548] sm:$0xff]  ;;  %1882 = vmatpush.msra.mxu0 %v1771_v0  ;;  %v1089_v13 = vmul.f32 0.5, %v4562_v5 }
 0x11e   : > { %v1329_v23 = vmul.f32 %v1319_v52, %v4721_v45  ;;  %v4773_v26 = vsel %vm1252_vm11, %v1254_v12, %v1250_v24  ;;  %v1772_v7 = vld [vmem:[%s6490_s3 + $0x8e8] sm:$0xff] }
 0x11f   : > { %v4775_v28 = vadd.f32 %v989_v19, %v967_v63  ;;  %v1294_v32 = vmul.f32 1.0614054, %v4773_v26  ;;  %1945 = vmatpush.msra.mxu3 %v1668_v25  ;;  %1997 = vmatpush.msrb.mxu1 %v1772_v7  ;;  %v1763_v19 = vld [vmem:[%s6490_s3 + $0x8a0] sm:$0xff]  ;;  %v1636_v5 = vld [vmem:[%s6490_s3 + $0x4a8] sm:$0xff]  ;;  %v1533_v7 = vld [vmem:[%s6490_s3 + $0x170] sm:$0xff] }
 0x120   : > { %v1339_v31 = vadd.f32 -0.28449672, %v1329_v23  ;;  %v923_v34 = vpop.f32.mrf.mxu0  ;;  %1913 = vmatmul.f32.vlgmr.msra.gmra.mxu1 %v4459_v59  ;;  %1883 = vmatpush.msra.mxu0 %v1767_v11  ;;  %v1743_v11 = vld [vmem:[%s6490_s3 + $0x800] sm:$0xff] }
 0x121   : > { %v4781_v35 = vmul.f32 0.70710677, %v4775_v28  ;;  %v924_v36 = vadd.f32 %v923_v34, %v620_v38  ;;  %v1304_v20 = vadd.f32 -1.4531521, %v1294_v32  ;;  %1946 = vmatpush.msra.mxu3 %v1664_v10  ;;  %v1411_v38 = vmul.f32 1.442695, %v1394_v21  ;;  %1998 = vmatpush.msrb.mxu1 %v1768_v43 }
 0x122   : > { %v1349_v39 = vmul.f32 %v1339_v31, %v4721_v45  ;;  %1884 = vmatpush.msra.mxu0 %v1763_v19  ;;  %v1764_v31 = vld [vmem:[%s6490_s3 + $0x8a8] sm:$0xff] }
 0x123   : > { %v4790_v61 = vand.u32 2147483647, %v4781_v35  ;;  %v946_v37 = vpop.f32.mrf.mxu1  ;;  %v1314_v49 = vmul.f32 %v1304_v20, %v4773_v26  ;;  %1947 = vmatpush.msra.mxu3 %v1660_v2  ;;  %3117 = vpow2.f32 %v1411_v38  ;;  %1999 = vmatpush.msrb.mxu1 %v1764_v31  ;;  %v1632_v10 = vld [vmem:[%s6490_s3 + $0x488] sm:$0xff]  ;;  %vm1440_vm6 = vcmp.ge.f32.partialorder %v4781_v35, 0.0 }
 0x124   : > { %v1359_v40 = vadd.f32 0.2548296, %v1349_v39  ;;  %v947_v41 = vadd.f32 %v946_v37, %v924_v36  ;;  %v969_v8 = vpop.f32.mrf.mxu2  ;;  %v1759_v36 = vld [vmem:[%s6490_s3 + $0x880] sm:$0xff]  ;;  %v1545_v39 = vld [vmem:[%s6490_s3 + $0x1d0] sm:$0xff]  ;;  %v1760_v20 = vld [vmem:[%s6490_s3 + $0x888] sm:$0xff]  ;;  %v1090_v35 = vmul.f32 0.5, %v4775_v28 }
 0x125   : > { %v1120_v44 = vmul.f32 0.3275911, %v4790_v61  ;;  %v1324_v1 = vadd.f32 1.4214138, %v1314_v49  ;;  %1948 = vmatpush.msra.mxu3 %v1656_v30  ;;  %1885 = vmatpush.msra.mxu0 %v1759_v36  ;;  %v1628_v49 = vld [vmem:[%s6490_s3 + $0x468] sm:$0xff]  ;;  %v1693_v28 = vld [vmem:[%s6490_s3 + $0x670] sm:$0xff] }
 0x126   : > { %v1369_v16 = vmul.f32 %v1359_v40, %v4721_v45  ;;  %v970_v48 = vadd.f32 %v969_v8, %v947_v41  ;;  %v1755_v40 = vld [vmem:[%s6490_s3 + $0x860] sm:$0xff]  ;;  %v1541_v8 = vld [vmem:[%s6490_s3 + $0x1b0] sm:$0xff]  ;;  %2000 = vmatpush.msrb.mxu1 %v1760_v20  ;;  %v1740_v43 = vld [vmem:[%s6490_s3 + $0x7e8] sm:$0xff] }
 0x127   : > { %v4801_v22 = vadd.f32 1.0, %v1120_v44  ;;  %v992_v50 = vpop.f32.mrf.mxu3  ;;  %v1334_v53 = vmul.f32 %v1324_v1, %v4773_v26  ;;  %1949 = vmatpush.msra.mxu3 %v1652_v51  ;;  %1886 = vmatpush.msra.mxu0 %v1755_v40  ;;  %v1751_v1 = vld [vmem:[%s6490_s3 + $0x840] sm:$0xff]  ;;  %v1537_v51 = vld [vmem:[%s6490_s3 + $0x190] sm:$0xff] }
 0x128   : > { %v1419_v62 = vmul.f32 %v3116_v42, %v1369_v16  ;;  %v4807_v55 = vadd.f32 %v992_v50, %v970_v48  ;;  %1916 = vmatmul.f32.gmra.mxu1 %v4512_v33  ;;  %v1756_v42 = vld [vmem:[%s6490_s3 + $0x868] sm:$0xff]  ;;  %v1521_v40 = vld [vmem:[%s6490_s3 + $0x110] sm:$0xff] }
 0x129   : > { %3119 = vrcp.f32 %v4801_v22  ;;  %v1344_v57 = vadd.f32 -0.28449672, %v1334_v53  ;;  %1950 = vmatpush.msra.mxu3 %v1648_v56  ;;  %v3118_v4 = vpop.eup %3117  ;;  %vm1187_vm13 = vweird.f32 %v4801_v22  ;;  %v1193_v24 = vand.u32 2147483648, %v4801_v22  ;;  %v1624_v48 = vld [vmem:[%s6490_s3 + $0x448] sm:$0xff]  ;;  %2001 = vmatpush.msrb.mxu1 %v1756_v42  ;;  %v1497_v20 = vld [vmem:[%s6490_s3 + $0x50] sm:$0xff] }
 0x12a   : > { %v1429_v45 = vsub.f32 1.0, %v1419_v62  ;;  %v4812_v29 = vmul.f32 0.70710677, %v4807_v55  ;;  %v1191_v34 = vand.u32 2147483647, %v4801_v22  ;;  %1887 = vmatpush.msra.mxu0 %v1751_v1  ;;  %v1752_v62 = vld [vmem:[%s6490_s3 + $0x848] sm:$0xff] }
 0x12b   : > { %v1354_v60 = vmul.f32 %v1344_v57, %v4773_v26  ;;  %1951 = vmatpush.msra.mxu3 %v1644_v3  ;;  %v1194_v41 = vor.u32 1.1754944e-38, %v1193_v24  ;;  %v1620_v57 = vld [vmem:[%s6490_s3 + $0x428] sm:$0xff]  ;;  %v1380_v3 = vsub.f32 0.0, %v4790_v61  ;;  %2002 = vmatpush.msrb.mxu1 %v1752_v62  ;;  %v1729_v62 = vld [vmem:[%s6490_s3 + $0x790] sm:$0xff] }
 0x12c   : > { %v1449_v18 = vsub.f32 0.0, %v1429_v45  ;;  %v4826_v6 = vand.u32 2147483647, %v4812_v29  ;;  %vm4903_vm0 = vcmp.eq.f32.partialorder %v1191_v34, 8.507059e+37  ;;  %v1736_v34 = vld [vmem:[%s6490_s3 + $0x7c8] sm:$0xff]  ;;  %vm1445_vm11 = vcmp.ge.f32.partialorder %v4812_v29, 0.0 }
 0x12d   : > { %v1364_v9 = vadd.f32 0.2548296, %v1354_v60  ;;  %1952 = vmatpush.msra.mxu3 %v1640_v14  ;;  %v1616_v14 = vld [vmem:[%s6490_s3 + $0x408] sm:$0xff]  ;;  %v1390_v31 = vmul.f32 %v1380_v3, %v4790_v61  ;;  %v1737_v61 = vld [vmem:[%s6490_s3 + $0x7d0] sm:$0xff] }
 0x12e   : > { %v1459_v54 = vsel %vm1439_vm12, %v1429_v45, %v1449_v18  ;;  %v1125_v15 = vmul.f32 0.3275911, %v4826_v6  ;;  %v1747_v45 = vld [vmem:[%s6490_s3 + $0x820] sm:$0xff]  ;;  %v1094_v18 = vmul.f32 0.5, %v4622_v46  ;;  %v1728_v16 = vld [vmem:[%s6490_s3 + $0x788] sm:$0xff]  ;;  %v1681_v29 = vld [vmem:[%s6490_s3 + $0x610] sm:$0xff] }
 0x12f   : > { %v4837_v12 = vpop.eup %3119  ;;  %v1469_v52 = vadd.f32 1.0, %v1459_v54  ;;  %v1374_v58 = vmul.f32 %v1364_v9, %v4773_v26  ;;  %v1549_v26 = vld [vmem:[%s6490_s3 + $0x1f0] sm:$0xff]  ;;  %1953 = vmatpush.msra.mxu3 %v1636_v5  ;;  %1888 = vmatpush.msra.mxu0 %v1747_v45  ;;  %v1403_v42 = vmul.f32 1.442695, %v1390_v31 }
 0x130   : > { %v1183_v63 = vmul.f32 %v4837_v12, %v4801_v22  ;;  %v4857_v25 = vadd.f32 1.0, %v1125_v15  ;;  %vm1188_vm14 = vweird.f32 %v4837_v12  ;;  %v4917_v22 = vld [vmem:[%s6489_s2] sm:$0x1f]  ;;  %v1529_v15 = vld [vmem:[%s6490_s3 + $0x150] sm:$0xff] }
 0x131   : > { %v4853_v23 = vmul.f32 %v1469_v52, %v1089_v13  ;;  %v1424_v32 = vmul.f32 %v3118_v4, %v1374_v58  ;;  %1954 = vmatpush.msra.mxu3 %v1632_v10  ;;  %vm4892_vm15 = vmor %vm1187_vm13, %vm1188_vm14  ;;  %v621_v50 = vperm.slane %v4917_v22, 4  ;;  %v1748_v4 = vld [vmem:[%s6490_s3 + $0x828] sm:$0xff]  ;;  %1889 = vmatpush.msra.mxu0 %v1743_v11  ;;  %v1725_v22 = vld [vmem:[%s6490_s3 + $0x770] sm:$0xff] }
 0x132   : > { %v1184_v21 = vsub.f32 1.0, %v1183_v63  ;;  %3121 = vrcp.f32 %v4857_v25  ;;  %vm1262_vm2 = vweird.f32 %v4857_v25  ;;  %v1268_v13 = vand.u32 2147483648, %v4857_v25  ;;  %2003 = vmatpush.msrb.mxu1 %v1748_v4  ;;  %v1744_v58 = vld [vmem:[%s6490_s3 + $0x808] sm:$0xff] }
 0x133   : > { %1844 = vmatmul.f32.vlgmr.msrb.gmra.mxu2 %v4853_v23  ;;  %v1434_v37 = vsub.f32 1.0, %v1424_v32  ;;  %1955 = vmatpush.msra.mxu3 %v1628_v49  ;;  %v1266_v5 = vand.u32 2147483647, %v4857_v25  ;;  %v1732_v49 = vld [vmem:[%s6490_s3 + $0x7a8] sm:$0xff]  ;;  %3123 = vpow2.f32 %v1403_v42  ;;  %v1705_v42 = vld [vmem:[%s6490_s3 + $0x6d0] sm:$0xff] }
 0x134   : > { %v1185_v2 = vmul.f32 %v4837_v12, %v1184_v21  ;;  %2012 = vmatpush.msrb.mxu2 %v1549_v26  ;;  %v1741_v26 = vld [vmem:[%s6490_s3 + $0x7f0] sm:$0xff]  ;;  %1966 = vmatpush.msrb.mxu0 %v1740_v43 }
 0x135   : > { %v1454_v44 = vsub.f32 0.0, %v1434_v37  ;;  %1956 = vmatpush.msra.mxu3 %v1624_v48  ;;  %v1525_v21 = vld [vmem:[%s6490_s3 + $0x130] sm:$0xff]  ;;  %2004 = vmatpush.msrb.mxu1 %v1744_v58  ;;  %vm1267_vm5 = vcmp.eq.f32.partialorder %v1266_v5, 8.507059e+37 }
 0x136   : > { %v1186_v30 = vadd.f32 %v4837_v12, %v1185_v2  ;;  %2013 = vmatpush.msrb.mxu2 %v1545_v39  ;;  %1967 = vmatpush.msrb.mxu0 %v1736_v34  ;;  %v1505_v58 = vld [vmem:[%s6490_s3 + $0x90] sm:$0xff] }
 0x137   : > { %v1464_v53 = vsel %vm1444_vm1, %v1434_v37, %v1454_v44  ;;  %1957 = vmatpush.msra.mxu3 %v1620_v57  ;;  %v1269_v37 = vor.u32 1.1754944e-38, %v1268_v13  ;;  %2081 = vmatpush.msra.mxu1 %v1741_v26  ;;  %v1721_v13 = vld [vmem:[%s6490_s3 + $0x750] sm:$0xff]  ;;  %vm1775_vm1 = vcmask 523264  }
 0x138   : > { %v1190_v27 = vsel %vm4892_vm15, %v4837_v12, %v1186_v30  ;;  %2014 = vmatpush.msrb.mxu2 %v1541_v8  ;;  %v4935_v56 = vpop.eup %3121  ;;  %v1474_v60 = vadd.f32 1.0, %v1464_v53  ;;  %v1733_v8 = vld [vmem:[%s6490_s3 + $0x7b0] sm:$0xff]  ;;  %1968 = vmatpush.msrb.mxu0 %v1732_v49 }
 0x139   : > { %v4940_v0 = vsel %vm4903_vm0, %v1194_v41, %v1190_v27  ;;  %v1258_v46 = vmul.f32 %v4935_v56, %v4857_v25  ;;  %vm1263_vm3 = vweird.f32 %v4935_v56  ;;  %1958 = vmatpush.msra.mxu3 %v1616_v14  ;;  %v1517_v30 = vld [vmem:[%s6490_s3 + $0xf0] sm:$0xff]  ;;  %2082 = vmatpush.msra.mxu1 %v1737_v61  ;;  %v1385_v27 = vsub.f32 0.0, %v4826_v6 }
 0x13a   : > { %v1290_v54 = vmul.f32 1.0614054, %v4940_v0  ;;  %v1012_v9 = vpop.f32.mrf.mxu0  ;;  %2015 = vmatpush.msrb.mxu2 %v1537_v51  ;;  %v4958_v12 = vmul.f32 %v1474_v60, %v1094_v18  ;;  %vm4995_vm4 = vmor %vm1262_vm2, %vm1263_vm3  ;;  %1969 = vmatpush.msrb.mxu0 %v1728_v16  ;;  %v1724_v18 = vld [vmem:[%s6490_s3 + $0x768] sm:$0xff]  ;;  %v1489_v16 = vld [vmem:[%s6490_s3 + $0x10] sm:$0xff] }
 0x13b   : > { %v1013_v52 = vadd.f32 %v1012_v9, %v621_v50  ;;  %v1259_v19 = vsub.f32 1.0, %v1258_v46  ;;  %2083 = vmatpush.msra.mxu1 %v1733_v8  ;;  %v1720_v46 = vld [vmem:[%s6490_s3 + $0x748] sm:$0xff] }
 0x13c   : > { %v1300_v63 = vadd.f32 -1.4531521, %v1290_v54  ;;  %v1035_v24 = vpop.f32.mrf.mxu1  ;;  %2016 = vmatpush.msrb.mxu2 %v1533_v7  ;;  %v1509_v54 = vld [vmem:[%s6490_s3 + $0xb0] sm:$0xff]  ;;  %1970 = vmatpush.msrb.mxu0 %v1724_v18  ;;  %v1696_v18 = vld [vmem:[%s6490_s3 + $0x688] sm:$0xff] }
 0x13d   : > { %v1036_v32 = vadd.f32 %v1035_v24, %v1013_v52  ;;  %1847 = vmatmul.f32.gmra.mxu2 %v4958_v12  ;;  %v1260_v10 = vmul.f32 %v4935_v56, %v1259_v19  ;;  %2084 = vmatpush.msra.mxu1 %v1729_v62  ;;  %v1395_v52 = vmul.f32 %v1385_v27, %v4826_v6  ;;  %v1717_v6 = vld [vmem:[%s6490_s3 + $0x730] sm:$0xff] }
 0x13e   : > { %v1310_v36 = vmul.f32 %v1300_v63, %v4940_v0  ;;  %v1058_v39 = vpop.f32.mrf.mxu2  ;;  %2017 = vmatpush.msrb.mxu2 %v1529_v15  ;;  %v1716_v63 = vld [vmem:[%s6490_s3 + $0x728] sm:$0xff]  ;;  %1971 = vmatpush.msrb.mxu0 %v1720_v46  ;;  %v1773_v62 = vld [vmem:[%s6490_s3 + $0x8f0] sm:$0xff] }
 0x13f   : > { %v1059_v2 = vadd.f32 %v1058_v39, %v1036_v32  ;;  %v1261_v41 = vadd.f32 %v4935_v56, %v1260_v10  ;;  %2085 = vmatpush.msra.mxu1 %v1725_v22  ;;  %v1501_v32 = vld [vmem:[%s6490_s3 + $0x70] sm:$0xff]  ;;  %v3124_v39 = vpop.eup %3123  ;;  %v1413_v61 = vmul.f32 1.442695, %v1395_v52 }
 0x140   : > { %v1320_v38 = vadd.f32 1.4214138, %v1310_v36  ;;  %v1081_v25 = vpop.f32.mrf.mxu3  ;;  %2018 = vmatpush.msrb.mxu2 %v1525_v21  ;;  %v1712_v21 = vld [vmem:[%s6490_s3 + $0x708] sm:$0xff]  ;;  %1972 = vmatpush.msrb.mxu0 %v1716_v63  ;;  %v1713_v10 = vld [vmem:[%s6490_s3 + $0x710] sm:$0xff] }
 0x141   : > { %v5009_v44 = vadd.f32 %v1081_v25, %v1059_v2  ;;  %v1265_v48 = vsel %vm4995_vm4, %v4935_v56, %v1261_v41  ;;  %v1513_v56 = vld [vmem:[%s6490_s3 + $0xd0] sm:$0xff]  ;;  %2086 = vmatpush.msra.mxu1 %v1721_v13  ;;  %v1704_v41 = vld [vmem:[%s6490_s3 + $0x6c8] sm:$0xff] }
 0x142   : > { %v1330_v1 = vmul.f32 %v1320_v38, %v4940_v0  ;;  %v1015_v51 = vpop.f32.mrf.mxu0  ;;  %2019 = vmatpush.msrb.mxu2 %v1521_v40  ;;  %v5024_v53 = vsel %vm1267_vm5, %v1269_v37, %v1265_v48  ;;  %1973 = vmatpush.msrb.mxu0 %v1712_v21  ;;  %v1709_v40 = vld [vmem:[%s6490_s3 + $0x6f0] sm:$0xff] }
 0x143   : > { %v5028_v45 = vmul.f32 0.70710677, %v5009_v44  ;;  %v1016_v57 = vadd.f32 %v1015_v51, %v621_v50  ;;  %v1295_v3 = vmul.f32 1.0614054, %v5024_v53  ;;  %2087 = vmatpush.msra.mxu1 %v1717_v6  ;;  %v1493_v38 = vld [vmem:[%s6490_s3 + $0x30] sm:$0xff] }
 0x144   : > { %v1340_v60 = vadd.f32 -0.28449672, %v1330_v1  ;;  %v1038_v7 = vpop.f32.mrf.mxu1  ;;  %2020 = vmatpush.msrb.mxu2 %v1517_v30  ;;  %v1700_v1 = vld [vmem:[%s6490_s3 + $0x6a8] sm:$0xff]  ;;  %v1701_v27 = vld [vmem:[%s6490_s3 + $0x6b0] sm:$0xff] }
 0x145   : > { %v5043_v50 = vand.u32 2147483647, %v5028_v45  ;;  %v1039_v4 = vadd.f32 %v1038_v7, %v1016_v57  ;;  %1936 = vmatmul.f32.vlgmr.msra.gmra.mxu2 %v4676_v17  ;;  %v1305_v11 = vadd.f32 -1.4531521, %v1295_v3  ;;  %2088 = vmatpush.msra.mxu1 %v1713_v10  ;;  %v1697_v22 = vld [vmem:[%s6490_s3 + $0x690] sm:$0xff]  ;;  %vm1441_vm0 = vcmp.ge.f32.partialorder %v5028_v45, 0.0 }
 0x146   : > { %v1350_v9 = vmul.f32 %v1340_v60, %v4940_v0  ;;  %v1061_v14 = vpop.f32.mrf.mxu2  ;;  %2021 = vmatpush.msrb.mxu2 %v1513_v56  ;;  %v1769_v46 = vld [vmem:[%s6490_s3 + $0x8d0] sm:$0xff] }
 0x147   : > { %v1121_v15 = vmul.f32 0.3275911, %v5043_v50  ;;  %v1062_v43 = vadd.f32 %v1061_v14, %v1039_v4  ;;  %v1315_v5 = vmul.f32 %v1305_v11, %v5024_v53  ;;  %2089 = vmatpush.msra.mxu1 %v1709_v40  ;;  %v1609_v6 = vld [vmem:[%s6490_s3 + $0x3d0] sm:$0xff] }
 0x148   : > { %v1360_v19 = vadd.f32 0.2548296, %v1350_v9  ;;  %v1084_v24 = vpop.f32.mrf.mxu3  ;;  %2022 = vmatpush.msrb.mxu2 %v1509_v54  ;;  %v1692_v9 = vld [vmem:[%s6490_s3 + $0x668] sm:$0xff]  ;;  %v1685_v10 = vld [vmem:[%s6490_s3 + $0x630] sm:$0xff] }
 0x149   : > { %v5068_v26 = vadd.f32 1.0, %v1121_v15  ;;  %v5070_v31 = vadd.f32 %v1084_v24, %v1062_v43  ;;  %v1325_v36 = vadd.f32 1.4214138, %v1315_v5  ;;  %2090 = vmatpush.msra.mxu1 %v1705_v42  ;;  %v1613_v43 = vld [vmem:[%s6490_s3 + $0x3f0] sm:$0xff]  ;;  %v1688_v5 = vld [vmem:[%s6490_s3 + $0x648] sm:$0xff] }
 0x14a   : > { %v1370_v34 = vmul.f32 %v1360_v19, %v4940_v0  ;;  %2023 = vmatpush.msrb.mxu2 %v1505_v58  ;;  %v1708_v0 = vld [vmem:[%s6490_s3 + $0x6e8] sm:$0xff]  ;;  %v1689_v24 = vld [vmem:[%s6490_s3 + $0x650] sm:$0xff] }
 0x14b   : > { %3125 = vrcp.f32 %v5068_v26  ;;  %v1335_v2 = vmul.f32 %v1325_v36, %v5024_v53  ;;  %v5094_v49 = vmul.f32 0.70710677, %v5070_v31  ;;  %1974 = vmatpush.msrb.mxu0 %v1708_v0  ;;  %2091 = vmatpush.msra.mxu1 %v1701_v27  ;;  %v1208_v15 = vand.u32 2147483648, %v5068_v26  ;;  %v1684_v36 = vld [vmem:[%s6490_s3 + $0x628] sm:$0xff]  ;;  %v1749_v27 = vld [vmem:[%s6490_s3 + $0x830] sm:$0xff] }
 0x14c   : > { %v1420_v37 = vmul.f32 %v3124_v39, %v1370_v34  ;;  %2024 = vmatpush.msrb.mxu2 %v1501_v32  ;;  %3127 = vpow2.f32 %v1413_v61  ;;  %v1206_v19 = vand.u32 2147483647, %v5068_v26  ;;  %v1761_v32 = vld [vmem:[%s6490_s3 + $0x890] sm:$0xff]  ;;  %vm1202_vm8 = vweird.f32 %v5068_v26 }
 0x14d   : > { %1939 = vmatmul.f32.gmra.mxu2 %v4726_v47  ;;  %v1345_v8 = vadd.f32 -0.28449672, %v1335_v2  ;;  %v5107_v30 = vand.u32 2147483647, %v5094_v49  ;;  %1975 = vmatpush.msrb.mxu0 %v1704_v41  ;;  %v1209_v39 = vor.u32 1.1754944e-38, %v1208_v15  ;;  %v1605_v61 = vld [vmem:[%s6490_s3 + $0x3b0] sm:$0xff] }
 0x14e   : > { %v1430_v25 = vsub.f32 1.0, %v1420_v37  ;;  %2025 = vmatpush.msrb.mxu2 %v1497_v20  ;;  %2092 = vmatpush.msra.mxu1 %v1697_v22  ;;  %vm1207_vm10 = vcmp.eq.f32.partialorder %v1206_v19, 8.507059e+37  ;;  %v1680_v37 = vld [vmem:[%s6490_s3 + $0x608] sm:$0xff]  ;;  %v1601_v41 = vld [vmem:[%s6490_s3 + $0x390] sm:$0xff]  ;;  %vm1446_vm2 = vcmp.ge.f32.partialorder %v5094_v49, 0.0  ;;  %v1690_v49 = vld [vmem:[%s6490_s3 + $0x658] sm:$0xff] }
 0x14f   : > { %v1355_v51 = vmul.f32 %v1345_v8, %v5024_v53  ;;  %v1126_v56 = vmul.f32 0.3275911, %v5107_v30  ;;  %1976 = vmatpush.msrb.mxu0 %v1700_v1  ;;  %v1095_v1 = vmul.f32 0.5, %v4807_v55  ;;  %v1581_v19 = vld [vmem:[%s6490_s3 + $0x2f0] sm:$0xff] }
 0x150   : > { %v1450_v48 = vsub.f32 0.0, %v1430_v25  ;;  %2026 = vmatpush.msrb.mxu2 %v1493_v38  ;;  %2093 = vmatpush.msra.mxu1 %v1693_v28  ;;  %v1381_v38 = vsub.f32 0.0, %v5043_v50 }
 0x151   : > { %v5122_v57 = vpop.eup %3125  ;;  %v1365_v3 = vadd.f32 0.2548296, %v1355_v51  ;;  %v5135_v54 = vadd.f32 1.0, %v1126_v56  ;;  %1977 = vmatpush.msrb.mxu0 %v1696_v18 }
 0x152   : > { %v1460_v60 = vsel %vm1440_vm6, %v1430_v25, %v1450_v48  ;;  %v1198_v7 = vmul.f32 %v5122_v57, %v5068_v26  ;;  %2027 = vmatpush.msrb.mxu2 %v1489_v16  ;;  %v3128_v13 = vpop.eup %3127  ;;  %vm1203_vm7 = vweird.f32 %v5122_v57  ;;  %v1757_v26 = vld [vmem:[%s6490_s3 + $0x870] sm:$0xff]  ;;  %2094 = vmatpush.msra.mxu1 %v1689_v24 }
 0x153   : > { %v1470_v4 = vadd.f32 1.0, %v1460_v60  ;;  %v1375_v11 = vmul.f32 %v1365_v3, %v5024_v53  ;;  %3129 = vrcp.f32 %v5135_v54  ;;  %v1765_v53 = vld [vmem:[%s6490_s3 + $0x8b0] sm:$0xff]  ;;  %1978 = vmatpush.msrb.mxu0 %v1692_v9  ;;  %vm1204_vm9 = vmor %vm1202_vm8, %vm1203_vm7  ;;  %vm1277_vm12 = vweird.f32 %v5135_v54 }
 0x154   : > { %2112 = vmatpush.msra.mxu2 %v1773_v62  ;;  %v1199_v14 = vsub.f32 1.0, %v1198_v7  ;;  %v1753_v25 = vld [vmem:[%s6490_s3 + $0x850] sm:$0xff]  ;;  %2095 = vmatpush.msra.mxu1 %v1685_v10  ;;  %v1283_v51 = vand.u32 2147483648, %v5135_v54  ;;  %v1281_v55 = vand.u32 2147483647, %v5135_v54  ;;  %v1391_v60 = vmul.f32 %v1381_v38, %v5043_v50 }
 0x155   : > { %v5147_v52 = vmul.f32 %v1470_v4, %v1090_v35  ;;  %2028 = vmatmul.f32.vlgmr.msrb.gmra.mxu2 %v4459_v59  ;;  %v1425_v58 = vmul.f32 %v3128_v13, %v1375_v11  ;;  %1979 = vmatpush.msrb.mxu0 %v1688_v5  ;;  %v1597_v62 = vld [vmem:[%s6490_s3 + $0x370] sm:$0xff]  ;;  %v1742_v4 = vld [vmem:[%s6490_s3 + $0x7f8] sm:$0xff] }
 0x156   : > { %v1200_v63 = vmul.f32 %v5122_v57, %v1199_v14  ;;  %2113 = vmatpush.msra.mxu2 %v1769_v46  ;;  %v1593_v3 = vld [vmem:[%s6490_s3 + $0x350] sm:$0xff]  ;;  %2096 = vmatpush.msra.mxu1 %v1681_v29  ;;  %v1284_v46 = vor.u32 1.1754944e-38, %v1283_v51  ;;  %vm1282_vm15 = vcmp.eq.f32.partialorder %v1281_v55, 8.507059e+37  ;;  %v1405_v28 = vmul.f32 1.442695, %v1391_v60 }
 0x157   : > { %1867 = vmatmul.f32.vlgmr.msrb.gmra.mxu3 %v5147_v52  ;;  %v1435_v21 = vsub.f32 1.0, %v1425_v58  ;;  %1980 = vmatpush.msrb.mxu0 %v1684_v36  ;;  %v1745_v7 = vld [vmem:[%s6490_s3 + $0x810] sm:$0xff]  ;;  %v1726_v36 = vld [vmem:[%s6490_s3 + $0x778] sm:$0xff] }
 0x158   : > { %v1201_v34 = vadd.f32 %v5122_v57, %v1200_v63  ;;  %2035 = vmatpush.msrb.mxu3 %v1613_v43  ;;  %2114 = vmatpush.msra.mxu2 %v1765_v53  ;;  %v1589_v9 = vld [vmem:[%s6490_s3 + $0x330] sm:$0xff]  ;;  %v1734_v53 = vld [vmem:[%s6490_s3 + $0x7b8] sm:$0xff]  ;;  %v1386_v63 = vsub.f32 0.0, %v5107_v30  ;;  %3131 = vpow2.f32 %v1405_v28 }
 0x159   : > { %v1455_v20 = vsub.f32 0.0, %v1435_v21  ;;  %v3130_v2 = vpop.eup %3129  ;;  %1981 = vmatpush.msrb.mxu0 %v1680_v37  ;;  %v1585_v13 = vld [vmem:[%s6490_s3 + $0x310] sm:$0xff]  ;;  %v1674_v28 = vld [vmem:[%s6490_s3 + $0x5d8] sm:$0xff] }
 0x15a   : > { %v1205_v0 = vsel %vm1204_vm9, %v5122_v57, %v1201_v34  ;;  %2036 = vmatpush.msrb.mxu3 %v1609_v6  ;;  %2115 = vmatpush.msra.mxu2 %v1761_v32  ;;  %v1273_v16 = vmul.f32 %v3130_v2, %v5135_v54  ;;  %vm1278_vm13 = vweird.f32 %v3130_v2  ;;  %v1738_v54 = vld [vmem:[%s6490_s3 + $0x7d8] sm:$0xff]  ;;  %v1577_v32 = vld [vmem:[%s6490_s3 + $0x2d0] sm:$0xff]  ;;  %v1396_v10 = vmul.f32 %v1386_v63, %v5107_v30 }
 0x15b   : > { %v5195_v40 = vsel %vm1207_vm10, %v1209_v39, %v1205_v0  ;;  %v1465_v8 = vsel %vm1445_vm11, %v1435_v21, %v1455_v20  ;;  %vm5235_vm14 = vmor %vm1277_vm12, %vm1278_vm13  ;;  %v1730_v6 = vld [vmem:[%s6490_s3 + $0x798] sm:$0xff]  ;;  %v1573_v39 = vld [vmem:[%s6490_s3 + $0x2b0] sm:$0xff] }
 0x15c   : > { %v1291_v42 = vmul.f32 1.0614054, %v5195_v40  ;;  %2037 = vmatpush.msrb.mxu3 %v1605_v61  ;;  %2116 = vmatpush.msra.mxu2 %v1757_v26  ;;  %v1475_v48 = vadd.f32 1.0, %v1465_v8  ;;  %v1274_v56 = vsub.f32 1.0, %v1273_v16  ;;  %v1722_v20 = vld [vmem:[%s6490_s3 + $0x758] sm:$0xff]  ;;  %v1569_v0 = vld [vmem:[%s6490_s3 + $0x290] sm:$0xff] }
 0x15d   : > { %2031 = vmatmul.f32.gmra.mxu2 %v4512_v33  ;;  %v1561_v16 = vld [vmem:[%s6490_s3 + $0x250] sm:$0xff]  ;;  %v1694_v63 = vld [vmem:[%s6490_s3 + $0x678] sm:$0xff] }
 0x15e   : > { %v1301_v57 = vadd.f32 -1.4531521, %v1291_v42  ;;  %2038 = vmatpush.msrb.mxu3 %v1601_v41  ;;  %2117 = vmatpush.msra.mxu2 %v1753_v25  ;;  %v5220_v18 = vmul.f32 %v1475_v48, %v1095_v1  ;;  %v1275_v35 = vmul.f32 %v3130_v2, %v1274_v56  ;;  %v3132_v38 = vpop.eup %3131  ;;  %v1415_v41 = vmul.f32 1.442695, %v1396_v10  ;;  %v1565_v25 = vld [vmem:[%s6490_s3 + $0x270] sm:$0xff]  ;;  %v1710_v48 = vld [vmem:[%s6490_s3 + $0x6f8] sm:$0xff] }
 0x15f   : > { %v1557_v51 = vld [vmem:[%s6490_s3 + $0x230] sm:$0xff] }
 0x160   : > { %v1311_v22 = vmul.f32 %v1301_v57, %v5195_v40  ;;  %2039 = vmatpush.msrb.mxu3 %v1597_v62  ;;  %2118 = vmatpush.msra.mxu2 %v1749_v27  ;;  %v1276_v14 = vadd.f32 %v3130_v2, %v1275_v35  ;;  %3133 = vpow2.f32 %v1415_v41  ;;  %v1706_v57 = vld [vmem:[%s6490_s3 + $0x6d8] sm:$0xff]  ;;  %v1553_v56 = vld [vmem:[%s6490_s3 + $0x210] sm:$0xff] }
 0x161   : > { %1870 = vmatmul.f32.gmra.mxu3 %v5220_v18  ;;  %v1522_v41 = vld [vmem:[%s6490_s3 + $0x118] sm:$0xff] }
 0x162   : > { %v1321_v11 = vadd.f32 1.4214138, %v1311_v22  ;;  %2040 = vmatpush.msrb.mxu3 %v1593_v3  ;;  %2119 = vmatpush.msra.mxu2 %v1745_v7  ;;  %v1280_v43 = vsel %vm5235_vm14, %v3130_v2, %v1276_v14  ;;  %v1718_v2 = vld [vmem:[%s6490_s3 + $0x738] sm:$0xff]  ;;  %v1091_v22 = vmul.f32 0.5, %v5009_v44  ;;  %v1673_v44 = vld [vmem:[%s6490_s3 + $0x5d0] sm:$0xff] }
 0x163   : > { %v1285_v58 = vsel %vm1282_vm15, %v1284_v46, %v1280_v43  ;;  %v1550_v3 = vld [vmem:[%s6490_s3 + $0x1f8] sm:$0xff]  ;;  %v1677_v46 = vld [vmem:[%s6490_s3 + $0x5f0] sm:$0xff] }
 0x164   : > { %2196 = vmatpush.msrb.mxu2 %v1742_v4  ;;  %v1331_v15 = vmul.f32 %v1321_v11, %v5195_v40  ;;  %2041 = vmatpush.msrb.mxu3 %v1589_v9  ;;  %v1296_v24 = vmul.f32 1.0614054, %v1285_v58  ;;  %v1702_v7 = vld [vmem:[%s6490_s3 + $0x6b8] sm:$0xff] }
 0x165   : > { %v1678_v11 = vld [vmem:[%s6490_s3 + $0x5f8] sm:$0xff] }
 0x166   : > { %2197 = vmatpush.msrb.mxu2 %v1738_v54  ;;  %v1341_v5 = vadd.f32 -0.28449672, %v1331_v15  ;;  %2042 = vmatpush.msrb.mxu3 %v1585_v13  ;;  %v1306_v34 = vadd.f32 -1.4531521, %v1296_v24  ;;  %v3134_v4 = vpop.eup %3133  ;;  %v1546_v14 = vld [vmem:[%s6490_s3 + $0x1d8] sm:$0xff]  ;;  %v1669_v15 = vld [vmem:[%s6490_s3 + $0x5b0] sm:$0xff] }
 0x167   : > { %v1698_v13 = vld [vmem:[%s6490_s3 + $0x698] sm:$0xff] }
 0x168   : > { %2198 = vmatpush.msrb.mxu2 %v1734_v53  ;;  %v1351_v21 = vmul.f32 %v1341_v5, %v5195_v40  ;;  %2043 = vmatpush.msrb.mxu3 %v1581_v19  ;;  %v1316_v26 = vmul.f32 %v1306_v34, %v1285_v58  ;;  %v1542_v43 = vld [vmem:[%s6490_s3 + $0x1b8] sm:$0xff]  ;;  %v1665_v19 = vld [vmem:[%s6490_s3 + $0x590] sm:$0xff] }
 0x169   : > { %1959 = vmatmul.f32.vlgmr.msra.gmra.mxu3 %v4853_v23  ;;  %v1538_v5 = vld [vmem:[%s6490_s3 + $0x198] sm:$0xff]  ;;  %v1661_v34 = vld [vmem:[%s6490_s3 + $0x570] sm:$0xff] }
 0x16a   : > { %2199 = vmatpush.msrb.mxu2 %v1730_v6  ;;  %v1361_v61 = vadd.f32 0.2548296, %v1351_v21  ;;  %2044 = vmatpush.msrb.mxu3 %v1577_v32  ;;  %v1326_v37 = vadd.f32 1.4214138, %v1316_v26  ;;  %v1666_v6 = vld [vmem:[%s6490_s3 + $0x598] sm:$0xff]  ;;  %v1096_v32 = vmul.f32 0.5, %v5070_v31 }
 0x16b   : > { %v1662_v31 = vld [vmem:[%s6490_s3 + $0x578] sm:$0xff] }
 0x16c   : > { %2200 = vmatpush.msrb.mxu2 %v1726_v36  ;;  %v1371_v30 = vmul.f32 %v1361_v61, %v5195_v40  ;;  %2045 = vmatpush.msrb.mxu3 %v1573_v39  ;;  %v1336_v42 = vmul.f32 %v1326_v37, %v1285_v58  ;;  %v1714_v40 = vld [vmem:[%s6490_s3 + $0x718] sm:$0xff]  ;;  %v1657_v39 = vld [vmem:[%s6490_s3 + $0x550] sm:$0xff] }
 0x16d   : > { %v1534_v36 = vld [vmem:[%s6490_s3 + $0x178] sm:$0xff] }
 0x16e   : > { %2201 = vmatpush.msrb.mxu2 %v1722_v20  ;;  %v1421_v8 = vmul.f32 %v3132_v38, %v1371_v30  ;;  %2046 = vmatpush.msrb.mxu3 %v1569_v0  ;;  %v1346_v1 = vadd.f32 -0.28449672, %v1336_v42  ;;  %v1530_v61 = vld [vmem:[%s6490_s3 + $0x158] sm:$0xff]  ;;  %v1653_v0 = vld [vmem:[%s6490_s3 + $0x530] sm:$0xff] }
 0x16f   : > { %v1686_v26 = vld [vmem:[%s6490_s3 + $0x638] sm:$0xff]  ;;  %v1649_v38 = vld [vmem:[%s6490_s3 + $0x510] sm:$0xff] }
 0x170   : > { %2202 = vmatpush.msrb.mxu2 %v1718_v2  ;;  %v1431_v29 = vsub.f32 1.0, %v1421_v8  ;;  %2047 = vmatpush.msrb.mxu3 %v1565_v25  ;;  %v1356_v27 = vmul.f32 %v1346_v1, %v1285_v58  ;;  %v1658_v20 = vld [vmem:[%s6490_s3 + $0x558] sm:$0xff]  ;;  %v1645_v8 = vld [vmem:[%s6490_s3 + $0x4f0] sm:$0xff] }
 0x171   : > { %1962 = vmatmul.f32.gmra.mxu3 %v4958_v12  ;;  %v1526_v30 = vld [vmem:[%s6490_s3 + $0x138] sm:$0xff] }
 0x172   : > { %2203 = vmatpush.msrb.mxu2 %v1714_v40  ;;  %v1451_v62 = vsub.f32 0.0, %v1431_v29  ;;  %2048 = vmatpush.msrb.mxu3 %v1561_v16  ;;  %v1366_v60 = vadd.f32 0.2548296, %v1356_v27  ;;  %v1682_v37 = vld [vmem:[%s6490_s3 + $0x618] sm:$0xff]  ;;  %v1641_v16 = vld [vmem:[%s6490_s3 + $0x4d0] sm:$0xff] }
 0x173   : > { %v1654_v2 = vld [vmem:[%s6490_s3 + $0x538] sm:$0xff] }
 0x174   : > { %2204 = vmatpush.msrb.mxu2 %v1710_v48  ;;  %v1461_v55 = vsel %vm1441_vm0, %v1431_v29, %v1451_v62  ;;  %2049 = vmatpush.msrb.mxu3 %v1557_v51  ;;  %v1376_v45 = vmul.f32 %v1366_v60, %v1285_v58  ;;  %v1670_v58 = vld [vmem:[%s6490_s3 + $0x5b8] sm:$0xff]  ;;  %v1637_v48 = vld [vmem:[%s6490_s3 + $0x4b0] sm:$0xff] }
 0x175   : > { %v1471_v35 = vadd.f32 1.0, %v1461_v55  ;;  %v1650_v25 = vld [vmem:[%s6490_s3 + $0x518] sm:$0xff] }
 0x176   : > { %2205 = vmatpush.msrb.mxu2 %v1706_v57  ;;  %2050 = vmatpush.msrb.mxu3 %v1553_v56  ;;  %v1426_v9 = vmul.f32 %v3134_v4, %v1376_v45  ;;  %v1518_v42 = vld [vmem:[%s6490_s3 + $0xf8] sm:$0xff]  ;;  %v1629_v56 = vld [vmem:[%s6490_s3 + $0x470] sm:$0xff] }
 0x177   : > { %v5314_v50 = vmul.f32 %v1471_v35, %v1091_v22  ;;  %v1646_v40 = vld [vmem:[%s6490_s3 + $0x4f8] sm:$0xff]  ;;  %v1621_v35 = vld [vmem:[%s6490_s3 + $0x430] sm:$0xff] }
 0x178   : > { %2127 = vmatpush.msra.mxu3 %v1550_v3  ;;  %2206 = vmatpush.msrb.mxu2 %v1702_v7  ;;  %v1436_v54 = vsub.f32 1.0, %v1426_v9  ;;  %v1514_v29 = vld [vmem:[%s6490_s3 + $0xd8] sm:$0xff]  ;;  %v1625_v3 = vld [vmem:[%s6490_s3 + $0x450] sm:$0xff] }
 0x179   : > { %3075 = vmatmul.msk.f32.vlgmr.msra.gmra.mxu0 %vm1775_vm1, %v5314_v50  ;;  %3077 = vmatmul.msk.f32.vlgmr.msrb.gmra.mxu1 %vm1775_vm1, %v5314_v50  ;;  %v1642_v1 = vld [vmem:[%s6490_s3 + $0x4d8] sm:$0xff] }
 0x17a   : > { %2058 = vmatpush.msra.mxu0 %v1677_v46  ;;  %3079 = vmatmul.msk.f32.vlgmr.msra.gmra.mxu2 %vm1775_vm1, %v5314_v50  ;;  %v1456_v53 = vsub.f32 0.0, %v1436_v54  ;;  %v1510_v51 = vld [vmem:[%s6490_s3 + $0xb8] sm:$0xff] }
 0x17b   : > { %2051 = vmatmul.f32.vlgmr.msrb.gmra.mxu3 %v4676_v17  ;;  %2173 = vmatpush.msrb.mxu1 %v1678_v11  ;;  %v1638_v62 = vld [vmem:[%s6490_s3 + $0x4b8] sm:$0xff] }
 0x17c   : > { %2059 = vmatpush.msra.mxu0 %v1673_v44  ;;  %2128 = vmatpush.msra.mxu3 %v1546_v14  ;;  %v1466_v24 = vsel %vm1446_vm2, %v1436_v54, %v1456_v53  ;;  %v1506_v27 = vld [vmem:[%s6490_s3 + $0x98] sm:$0xff] }
 0x17d   : > { %2174 = vmatpush.msrb.mxu1 %v1674_v28  ;;  %2207 = vmatpush.msrb.mxu2 %v1698_v13  ;;  %v1476_v21 = vadd.f32 1.0, %v1466_v24  ;;  %v1634_v57 = vld [vmem:[%s6490_s3 + $0x498] sm:$0xff] }
 0x17e   : > { %2060 = vmatpush.msra.mxu0 %v1669_v15  ;;  %2129 = vmatpush.msra.mxu3 %v1542_v43  ;;  %v1502_v55 = vld [vmem:[%s6490_s3 + $0x78] sm:$0xff] }
 0x17f   : > { %2175 = vmatpush.msrb.mxu1 %v1670_v58  ;;  %2208 = vmatpush.msrb.mxu2 %v1694_v63  ;;  %v5373_v10 = vmul.f32 %v1476_v21, %v1096_v32  ;;  %v1630_v60 = vld [vmem:[%s6490_s3 + $0x478] sm:$0xff]  ;;  %v2370_v21 = vld [vmem:[%s6491_s4 + $0x3c0] sm:$0xff] }
 0x180   : > { %2061 = vmatpush.msra.mxu0 %v1665_v19  ;;  %2130 = vmatpush.msra.mxu3 %v1538_v5  ;;  %v1498_v7 = vld [vmem:[%s6490_s3 + $0x58] sm:$0xff] }
 0x181   : > { %2176 = vmatpush.msrb.mxu1 %v1666_v6  ;;  %2209 = vmatpush.msrb.mxu2 %v1690_v49  ;;  %v1626_v22 = vld [vmem:[%s6490_s3 + $0x458] sm:$0xff]  ;;  %v2374_v49 = vld [vmem:[%s6491_s4 + $0x3e0] sm:$0xff] }
 0x182   : > { %2062 = vmatpush.msra.mxu0 %v1661_v34  ;;  %2131 = vmatpush.msra.mxu3 %v1534_v36  ;;  %v1494_v45 = vld [vmem:[%s6490_s3 + $0x38] sm:$0xff]  ;;  %v2366_v34 = vld [vmem:[%s6491_s4 + $0x3a0] sm:$0xff] }
 0x183   : > { %3076 = vmatmul.msk.f32.gmra.mxu0 %vm1775_vm1, %v5373_v10  ;;  %3078 = vmatmul.msk.f32.gmra.mxu1 %vm1775_vm1, %v5373_v10  ;;  %v1622_v4 = vld [vmem:[%s6490_s3 + $0x438] sm:$0xff] }
 0x184   : > { %3080 = vmatmul.msk.f32.gmra.mxu2 %vm1775_vm1, %v5373_v10  ;;  %2054 = vmatmul.f32.gmra.mxu3 %v4726_v47  ;;  %v1490_v46 = vld [vmem:[%s6490_s3 + $0x18] sm:$0xff] }
 0x185   : > { %2177 = vmatpush.msrb.mxu1 %v1662_v31  ;;  %2063 = vmatpush.msra.mxu0 %v1657_v39  ;;  %v1614_v9 = vld [vmem:[%s6490_s3 + $0x3f8] sm:$0xff]  ;;  %v2362_v31 = vld [vmem:[%s6491_s4 + $0x380] sm:$0xff] }
 0x186   : > { %2132 = vmatpush.msra.mxu3 %v1530_v61  ;;  %2210 = vmatpush.msrb.mxu2 %v1686_v26  ;;  %v1618_v11 = vld [vmem:[%s6490_s3 + $0x418] sm:$0xff]  ;;  %v2358_v61 = vld [vmem:[%s6491_s4 + $0x360] sm:$0xff] }
 0x187   : > { %2178 = vmatpush.msrb.mxu1 %v1658_v20  ;;  %2064 = vmatpush.msra.mxu0 %v1653_v0  ;;  %v1774_v44 = vld [vmem:[%s6490_s3 + $0x8f8] sm:$0xff]  ;;  %v2310_v20 = vld [vmem:[%s6491_s4 + $0x1e0] sm:$0xff] }
 0x188   : > { %2133 = vmatpush.msra.mxu3 %v1526_v30  ;;  %2211 = vmatpush.msrb.mxu2 %v1682_v37  ;;  %v1610_v14 = vld [vmem:[%s6490_s3 + $0x3d8] sm:$0xff]  ;;  %v2350_v0 = vld [vmem:[%s6491_s4 + $0x320] sm:$0xff] }
 0x189   : > { %2179 = vmatpush.msrb.mxu1 %v1654_v2  ;;  %2065 = vmatpush.msra.mxu0 %v1649_v38  ;;  %v1770_v54 = vld [vmem:[%s6490_s3 + $0x8d8] sm:$0xff]  ;;  %v2306_v30 = vld [vmem:[%s6491_s4 + $0x1c0] sm:$0xff] }
 0x18a   : > { %2134 = vmatpush.msra.mxu3 %v1522_v41  ;;  %v1606_v28 = vld [vmem:[%s6490_s3 + $0x3b8] sm:$0xff]  ;;  %v2346_v37 = vld [vmem:[%s6491_s4 + $0x300] sm:$0xff] }
 0x18b   : > { %2180 = vmatpush.msrb.mxu1 %v1650_v25  ;;  %1982 = vmatmul.f32.vlgmr.msrb.gmra.mxu0 %v5147_v52  ;;  %v1602_v13 = vld [vmem:[%s6490_s3 + $0x398] sm:$0xff]  ;;  %v2302_v2 = vld [vmem:[%s6491_s4 + $0x1a0] sm:$0xff] }
 0x18c   : > { %2066 = vmatpush.msra.mxu0 %v1645_v8  ;;  %2097 = vmatmul.f32.vlgmr.msra.gmra.mxu1 %v5147_v52  ;;  %v1598_v15 = vld [vmem:[%s6490_s3 + $0x378] sm:$0xff]  ;;  %v2342_v38 = vld [vmem:[%s6491_s4 + $0x2e0] sm:$0xff] }
 0x18d   : > { %2135 = vmatpush.msra.mxu3 %v1518_v42  ;;  %2212 = vmatmul.f32.vlgmr.msrb.gmra.mxu2 %v5147_v52  ;;  %v1633_v52 = vld [vmem:[%s6490_s3 + $0x490] sm:$0xff]  ;;  %v1758_v43 = vld [vmem:[%s6490_s3 + $0x878] sm:$0xff]  ;;  %v2338_v41 = vld [vmem:[%s6491_s4 + $0x2c0] sm:$0xff] }
 0x18e   : > { %2181 = vmatpush.msrb.mxu1 %v1646_v40  ;;  %2067 = vmatpush.msra.mxu0 %v1641_v16  ;;  %v1594_v53 = vld [vmem:[%s6490_s3 + $0x358] sm:$0xff]  ;;  %v2438_v25 = vld [vmem:[%s6491_s4 + $0x5e0] sm:$0xff] }
 0x18f   : > { %2136 = vmatpush.msra.mxu3 %v1514_v29  ;;  %v1754_v58 = vld [vmem:[%s6490_s3 + $0x858] sm:$0xff]  ;;  %2552 = vmatpush.msra.mxu2 %v2438_v25  ;;  %v2294_v8 = vld [vmem:[%s6491_s4 + $0x160] sm:$0xff] }
 0x190   : > { %2182 = vmatpush.msrb.mxu1 %v1642_v1  ;;  %2068 = vmatpush.msra.mxu0 %v1637_v48  ;;  %v1590_v63 = vld [vmem:[%s6490_s3 + $0x338] sm:$0xff]  ;;  %v2334_v42 = vld [vmem:[%s6491_s4 + $0x2a0] sm:$0xff] }
 0x191   : > { %2137 = vmatpush.msra.mxu3 %v1510_v51  ;;  %v1750_v19 = vld [vmem:[%s6490_s3 + $0x838] sm:$0xff]  ;;  %v2434_v40 = vld [vmem:[%s6491_s4 + $0x5c0] sm:$0xff] }
 0x192   : > { %2183 = vmatpush.msrb.mxu1 %v1638_v62  ;;  %2069 = vmatpush.msra.mxu0 %v1633_v52  ;;  %v1582_v5 = vld [vmem:[%s6490_s3 + $0x2f8] sm:$0xff]  ;;  %v2290_v16 = vld [vmem:[%s6491_s4 + $0x140] sm:$0xff] }
 0x193   : > { %2138 = vmatpush.msra.mxu3 %v1506_v27  ;;  %1985 = vmatmul.f32.gmra.mxu0 %v5220_v18  ;;  %v1578_v24 = vld [vmem:[%s6490_s3 + $0x2d8] sm:$0xff]  ;;  %v2330_v29 = vld [vmem:[%s6491_s4 + $0x280] sm:$0xff] }
 0x194   : > { %2184 = vmatpush.msrb.mxu1 %v1634_v57  ;;  %2070 = vmatpush.msra.mxu0 %v1629_v56  ;;  %v1574_v6 = vld [vmem:[%s6490_s3 + $0x2b8] sm:$0xff]  ;;  %v2430_v1 = vld [vmem:[%s6491_s4 + $0x5a0] sm:$0xff] }
 0x195   : > { %2100 = vmatmul.f32.gmra.mxu1 %v5220_v18  ;;  %2139 = vmatpush.msra.mxu3 %v1502_v55  ;;  %v1570_v32 = vld [vmem:[%s6490_s3 + $0x298] sm:$0xff]  ;;  %v2286_v48 = vld [vmem:[%s6491_s4 + $0x120] sm:$0xff] }
 0x196   : > { %2215 = vmatmul.f32.gmra.mxu2 %v5220_v18  ;;  %2185 = vmatpush.msrb.mxu1 %v1630_v60  ;;  %v1617_v18 = vld [vmem:[%s6490_s3 + $0x410] sm:$0xff]  ;;  %v1562_v36 = vld [vmem:[%s6490_s3 + $0x258] sm:$0xff]  ;;  %v2426_v51 = vld [vmem:[%s6491_s4 + $0x580] sm:$0xff] }
 0x197   : > { %2071 = vmatpush.msra.mxu0 %v1625_v3  ;;  %2140 = vmatpush.msra.mxu3 %v1498_v7  ;;  %v1558_v39 = vld [vmem:[%s6490_s3 + $0x238] sm:$0xff]  ;;  %v2282_v62 = vld [vmem:[%s6491_s4 + $0x100] sm:$0xff] }
 0x198   : > { %2186 = vmatpush.msrb.mxu1 %v1626_v22  ;;  %v1554_v26 = vld [vmem:[%s6490_s3 + $0x218] sm:$0xff]  ;;  %2553 = vmatpush.msra.mxu2 %v2434_v40  ;;  %v2322_v52 = vld [vmem:[%s6491_s4 + $0x240] sm:$0xff]  ;;  %v2427_v40 = vld [vmem:[%s6491_s4 + $0x588] sm:$0xff] }
 0x199   : > { %2072 = vmatpush.msra.mxu0 %v1621_v35  ;;  %2141 = vmatpush.msra.mxu3 %v1494_v45  ;;  %v2422_v27 = vld [vmem:[%s6491_s4 + $0x560] sm:$0xff]  ;;  %v2375_v35 = vld [vmem:[%s6491_s4 + $0x3e8] sm:$0xff] }
 0x19a   : > { %2187 = vmatpush.msrb.mxu1 %v1622_v4  ;;  %2554 = vmatpush.msra.mxu2 %v2430_v1  ;;  %v2278_v57 = vld [vmem:[%s6491_s4 + $0xe0] sm:$0xff] }
 0x19b   : > { %2073 = vmatpush.msra.mxu0 %v1617_v18  ;;  %2142 = vmatpush.msra.mxu3 %v1490_v46  ;;  %v2318_v56 = vld [vmem:[%s6491_s4 + $0x220] sm:$0xff]  ;;  %v2371_v18 = vld [vmem:[%s6491_s4 + $0x3c8] sm:$0xff] }
 0x19c   : > { %2143 = vmatmul.f32.vlgmr.msra.gmra.mxu3 %v4459_v59  ;;  %2188 = vmatpush.msrb.mxu1 %v1618_v11  ;;  %v1766_v59 = vld [vmem:[%s6490_s3 + $0x8b8] sm:$0xff]  ;;  %v2418_v55 = vld [vmem:[%s6491_s4 + $0x540] sm:$0xff]  ;;  %v2367_v11 = vld [vmem:[%s6491_s4 + $0x3a8] sm:$0xff] }
 0x19d   : > { %2150 = vmatpush.msrb.mxu0 %v1614_v9  ;;  %2189 = vmatmul.f32.vlgmr.msrb.gmra.mxu1 %v4853_v23  ;;  %v2274_v60 = vld [vmem:[%s6491_s4 + $0xc0] sm:$0xff] }
 0x19e   : > { %2074 = vmatmul.f32.vlgmr.msra.gmra.mxu0 %v4853_v23  ;;  %2227 = vmatpush.msrb.mxu3 %v1774_v44  ;;  %v1762_v23 = vld [vmem:[%s6490_s3 + $0x898] sm:$0xff]  ;;  %v2314_v3 = vld [vmem:[%s6491_s4 + $0x200] sm:$0xff] }
 0x19f   : > { %2151 = vmatpush.msrb.mxu0 %v1610_v14  ;;  %2529 = vmatpush.msra.mxu1 %v2374_v49  ;;  %v2414_v7 = vld [vmem:[%s6491_s4 + $0x520] sm:$0xff]  ;;  %v5757_v49 = vpop.f32.mrf.mxu1 }
 0x1a0   : > { %2228 = vmatpush.msrb.mxu3 %v1770_v54  ;;  %2555 = vmatpush.msra.mxu2 %v2426_v51  ;;  %v2270_v22 = vld [vmem:[%s6491_s4 + $0xa0] sm:$0xff]  ;;  %v2363_v54 = vld [vmem:[%s6491_s4 + $0x388] sm:$0xff] }
 0x1a1   : > { %2152 = vmatpush.msrb.mxu0 %v1606_v28  ;;  %2530 = vmatpush.msra.mxu1 %v2370_v21  ;;  %v2410_v45 = vld [vmem:[%s6491_s4 + $0x500] sm:$0xff]  ;;  %v2423_v51 = vld [vmem:[%s6491_s4 + $0x568] sm:$0xff] }
 0x1a2   : > { %2229 = vmatpush.msrb.mxu3 %v1766_v59  ;;  %2556 = vmatpush.msra.mxu2 %v2422_v27  ;;  %v2266_v4 = vld [vmem:[%s6491_s4 + $0x80] sm:$0xff]  ;;  %v2319_v27 = vld [vmem:[%s6491_s4 + $0x228] sm:$0xff] }
 0x1a3   : > { %2153 = vmatpush.msrb.mxu0 %v1602_v13  ;;  %2531 = vmatpush.msra.mxu1 %v2366_v34  ;;  %v2406_v46 = vld [vmem:[%s6491_s4 + $0x4e0] sm:$0xff]  ;;  %v2343_v34 = vld [vmem:[%s6491_s4 + $0x2e8] sm:$0xff] }
 0x1a4   : > { %2230 = vmatpush.msrb.mxu3 %v1762_v23  ;;  %2557 = vmatpush.msra.mxu2 %v2418_v55  ;;  %v2262_v9 = vld [vmem:[%s6491_s4 + $0x60] sm:$0xff]  ;;  %v2311_v23 = vld [vmem:[%s6491_s4 + $0x1e8] sm:$0xff] }
 0x1a5   : > { %2146 = vmatmul.f32.gmra.mxu3 %v4512_v33  ;;  %2154 = vmatpush.msrb.mxu0 %v1598_v15  ;;  %v1586_v33 = vld [vmem:[%s6490_s3 + $0x318] sm:$0xff]  ;;  %v2402_v44 = vld [vmem:[%s6491_s4 + $0x4c0] sm:$0xff]  ;;  %v2359_v15 = vld [vmem:[%s6491_s4 + $0x368] sm:$0xff] }
 0x1a6   : > { %2077 = vmatmul.f32.gmra.mxu0 %v4958_v12  ;;  %2192 = vmatmul.f32.gmra.mxu1 %v4958_v12  ;;  %v1746_v12 = vld [vmem:[%s6490_s3 + $0x818] sm:$0xff]  ;;  %v2258_v14 = vld [vmem:[%s6491_s4 + $0x40] sm:$0xff] }
 0x1a7   : > { %2231 = vmatpush.msrb.mxu3 %v1758_v43  ;;  %2155 = vmatpush.msrb.mxu0 %v1594_v53  ;;  %v2398_v28 = vld [vmem:[%s6491_s4 + $0x4a0] sm:$0xff]  ;;  %v2355_v53 = vld [vmem:[%s6491_s4 + $0x348] sm:$0xff]  ;;  %v5809_v25 = vpop.f32.mrf.mxu1 }
 0x1a8   : > { %2532 = vmatpush.msra.mxu1 %v2362_v31  ;;  %2558 = vmatpush.msra.mxu2 %v2414_v7  ;;  %v2254_v59 = vld [vmem:[%s6491_s4 + $0x20] sm:$0xff]  ;;  %v1799_v31 = vpop.f32.mrf.mxu0 }
 0x1a9   : > { %2232 = vmatpush.msrb.mxu3 %v1754_v58  ;;  %2156 = vmatpush.msrb.mxu0 %v1590_v63  ;;  %v2250_v13 = vld [vmem:[%s6491_s4] sm:$0xff]  ;;  %v2307_v63 = vld [vmem:[%s6491_s4 + $0x1c8] sm:$0xff] }
 0x1aa   : > { %2533 = vmatpush.msra.mxu1 %v2358_v61  ;;  %2559 = vmatpush.msra.mxu2 %v2410_v45  ;;  %v2394_v43 = vld [vmem:[%s6491_s4 + $0x480] sm:$0xff]  ;;  %v2439_v61 = vld [vmem:[%s6491_s4 + $0x5e8] sm:$0xff] }
 0x1ab   : > { %2233 = vmatpush.msrb.mxu3 %v1750_v19  ;;  %2157 = vmatpush.msrb.mxu0 %v1586_v33  ;;  %v2390_v58 = vld [vmem:[%s6491_s4 + $0x460] sm:$0xff]  ;;  %v2351_v19 = vld [vmem:[%s6491_s4 + $0x328] sm:$0xff] }
 0x1ac   : > { %2560 = vmatpush.msra.mxu2 %v2406_v46  ;;  %v2386_v33 = vld [vmem:[%s6491_s4 + $0x440] sm:$0xff] }
 0x1ad   : > { %2234 = vmatpush.msrb.mxu3 %v1746_v12  ;;  %2158 = vmatpush.msrb.mxu0 %v1582_v5  ;;  %v2303_v12 = vld [vmem:[%s6491_s4 + $0x1a8] sm:$0xff]  ;;  %v2482_v55 = vld [vmem:[%s6491_s4 + $0x740] sm:$0xff] }
 0x1ae   : > { %3081 = vmatmul.msk.f32.vlgmr.msrb.gmra.mxu3 %vm1775_vm1, %v5314_v50  ;;  %v1566_v50 = vld [vmem:[%s6490_s3 + $0x278] sm:$0xff]  ;;  %2561 = vmatpush.msra.mxu2 %v2402_v44  ;;  %v2347_v5 = vld [vmem:[%s6491_s4 + $0x308] sm:$0xff]  ;;  %v2478_v7 = vld [vmem:[%s6491_s4 + $0x720] sm:$0xff] }
 0x1af   : > { %2159 = vmatpush.msrb.mxu0 %v1578_v24  ;;  %v2299_v24 = vld [vmem:[%s6491_s4 + $0x188] sm:$0xff]  ;;  %v2474_v46 = vld [vmem:[%s6491_s4 + $0x700] sm:$0xff] }
 0x1b0   : > { %2562 = vmatpush.msra.mxu2 %v2398_v28  ;;  %v2255_v44 = vld [vmem:[%s6491_s4 + $0x28] sm:$0xff] }
 0x1b1   : > { %2160 = vmatpush.msrb.mxu0 %v1574_v6  ;;  %v2382_v6 = vld [vmem:[%s6491_s4 + $0x420] sm:$0xff] }
 0x1b2   : > { %2563 = vmatpush.msra.mxu2 %v2394_v43 }
 0x1b3   : > { %2161 = vmatpush.msrb.mxu0 %v1570_v32  ;;  %v2295_v32 = vld [vmem:[%s6491_s4 + $0x168] sm:$0xff] }
 0x1b4   : > { %2564 = vmatpush.msra.mxu2 %v2390_v58 }
 0x1b5   : > { %2162 = vmatpush.msrb.mxu0 %v1566_v50  ;;  %v2291_v50 = vld [vmem:[%s6491_s4 + $0x148] sm:$0xff] }
 0x1b6   : > { %3082 = vmatmul.msk.f32.gmra.mxu3 %vm1775_vm1, %v5373_v10  ;;  %v2354_v10 = vld [vmem:[%s6491_s4 + $0x340] sm:$0xff]  ;;  %2565 = vmatpush.msra.mxu2 %v2386_v33  ;;  %v5762_v21 = vpop.f32.mrf.mxu2 }
 0x1b7   : > { %2163 = vmatpush.msrb.mxu0 %v1562_v36  ;;  %2534 = vmatpush.msra.mxu1 %v2354_v10  ;;  %v2378_v36 = vld [vmem:[%s6491_s4 + $0x400] sm:$0xff]  ;;  %v2287_v10 = vld [vmem:[%s6491_s4 + $0x128] sm:$0xff] }
 0x1b8   : > { %2566 = vmatpush.msra.mxu2 %v2382_v6  ;;  %v2462_v33 = vld [vmem:[%s6491_s4 + $0x6a0] sm:$0xff] }
 0x1b9   : > { %2164 = vmatpush.msrb.mxu0 %v1558_v39  ;;  %2535 = vmatpush.msra.mxu1 %v2350_v0  ;;  %v2339_v39 = vld [vmem:[%s6491_s4 + $0x2c8] sm:$0xff]  ;;  %v2458_v6 = vld [vmem:[%s6491_s4 + $0x680] sm:$0xff] }
 0x1ba   : > { %2567 = vmatpush.msra.mxu2 %v2378_v36  ;;  %v2435_v0 = vld [vmem:[%s6491_s4 + $0x5c8] sm:$0xff] }
 0x1bb   : > { %2165 = vmatpush.msrb.mxu0 %v1554_v26  ;;  %2536 = vmatpush.msra.mxu1 %v2346_v37  ;;  %v2502_v26 = vld [vmem:[%s6491_s4 + $0x7e0] sm:$0xff]  ;;  %v2283_v37 = vld [vmem:[%s6491_s4 + $0x108] sm:$0xff] }
 0x1bc   : > { %2166 = vmatmul.f32.vlgmr.msrb.gmra.mxu0 %v4676_v17  ;;  %v2298_v17 = vld [vmem:[%s6491_s4 + $0x180] sm:$0xff]  ;;  %2575 = vmatpush.msra.mxu3 %v2502_v26 }
 0x1bd   : > { %2506 = vmatpush.msra.mxu0 %v2310_v20  ;;  %2537 = vmatpush.msra.mxu1 %v2342_v38  ;;  %v2335_v20 = vld [vmem:[%s6491_s4 + $0x2a8] sm:$0xff]  ;;  %v2450_v26 = vld [vmem:[%s6491_s4 + $0x640] sm:$0xff] }
 0x1be   : > { %2644 = vmatpush.msrb.mxu2 %v2439_v61  ;;  %v2431_v38 = vld [vmem:[%s6491_s4 + $0x5a8] sm:$0xff] }
 0x1bf   : > { %2507 = vmatpush.msra.mxu0 %v2306_v30  ;;  %2538 = vmatpush.msra.mxu1 %v2338_v41  ;;  %v2498_v30 = vld [vmem:[%s6491_s4 + $0x7c0] sm:$0xff]  ;;  %v2279_v41 = vld [vmem:[%s6491_s4 + $0xe8] sm:$0xff] }
 0x1c0   : > { %2576 = vmatpush.msra.mxu3 %v2498_v30  ;;  %2645 = vmatpush.msrb.mxu2 %v2435_v0  ;;  %v5826_v1 = vpop.f32.mrf.mxu2  ;;  %v2296_v30 = vld [vmem:[%s6491_s4 + $0x170] sm:$0xff] }
 0x1c1   : > { %2508 = vmatpush.msra.mxu0 %v2302_v2  ;;  %2539 = vmatpush.msra.mxu1 %v2334_v42  ;;  %v2331_v2 = vld [vmem:[%s6491_s4 + $0x288] sm:$0xff] }
 0x1c2   : > { %2646 = vmatpush.msrb.mxu2 %v2431_v38  ;;  %v2327_v42 = vld [vmem:[%s6491_s4 + $0x268] sm:$0xff] }
 0x1c3   : > { %2509 = vmatpush.msra.mxu0 %v2298_v17  ;;  %2540 = vmatpush.msra.mxu1 %v2330_v29  ;;  %v2494_v17 = vld [vmem:[%s6491_s4 + $0x7a0] sm:$0xff] }
 0x1c4   : > { %2169 = vmatmul.f32.gmra.mxu0 %v4726_v47  ;;  %v2326_v47 = vld [vmem:[%s6491_s4 + $0x260] sm:$0xff]  ;;  %2577 = vmatpush.msra.mxu3 %v2494_v17  ;;  %v2292_v17 = vld [vmem:[%s6491_s4 + $0x150] sm:$0xff] }
 0x1c5   : > { %2510 = vmatpush.msra.mxu0 %v2294_v8  ;;  %2541 = vmatpush.msra.mxu1 %v2326_v47  ;;  %v2275_v8 = vld [vmem:[%s6491_s4 + $0xc8] sm:$0xff]  ;;  %v2490_v29 = vld [vmem:[%s6491_s4 + $0x780] sm:$0xff] }
 0x1c6   : > { %2647 = vmatpush.msrb.mxu2 %v2427_v40  ;;  %2578 = vmatpush.msra.mxu3 %v2490_v29  ;;  %v2323_v47 = vld [vmem:[%s6491_s4 + $0x248] sm:$0xff] }
 0x1c7   : > { %2511 = vmatpush.msra.mxu0 %v2290_v16  ;;  %2542 = vmatpush.msra.mxu1 %v2322_v52  ;;  %v2271_v16 = vld [vmem:[%s6491_s4 + $0xa8] sm:$0xff]  ;;  %v1802_v52 = vpop.f32.mrf.mxu0 }
 0x1c8   : > { %2648 = vmatpush.msrb.mxu2 %v2423_v51  ;;  %v2503_v40 = vld [vmem:[%s6491_s4 + $0x7e8] sm:$0xff] }
 0x1c9   : > { %2512 = vmatpush.msra.mxu0 %v2286_v48  ;;  %2543 = vmatpush.msra.mxu1 %v2318_v56  ;;  %v2267_v56 = vld [vmem:[%s6491_s4 + $0x88] sm:$0xff] }
 0x1cb   : > { %2513 = vmatpush.msra.mxu0 %v2282_v62  ;;  %2544 = vmatpush.msra.mxu1 %v2314_v3  ;;  %v2486_v62 = vld [vmem:[%s6491_s4 + $0x760] sm:$0xff]  ;;  %v2415_v3 = vld [vmem:[%s6491_s4 + $0x528] sm:$0xff] }
 0x1cc   : > { %2579 = vmatpush.msra.mxu3 %v2486_v62  ;;  %v2280_v62 = vld [vmem:[%s6491_s4 + $0xf0] sm:$0xff] }
 0x1cd   : > { %2514 = vmatpush.msra.mxu0 %v2278_v57  ;;  %2621 = vmatpush.msrb.mxu1 %v2375_v35  ;;  %v2419_v57 = vld [vmem:[%s6491_s4 + $0x548] sm:$0xff] }
 0x1ce   : > { %v2263_v35 = vld [vmem:[%s6491_s4 + $0x68] sm:$0xff]  ;;  %2649 = vmatpush.msrb.mxu2 %v2419_v57  ;;  %2580 = vmatpush.msra.mxu3 %v2482_v55 }
 0x1cf   : > { %2515 = vmatpush.msra.mxu0 %v2274_v60  ;;  %2622 = vmatpush.msrb.mxu1 %v2371_v18  ;;  %v2315_v60 = vld [vmem:[%s6491_s4 + $0x208] sm:$0xff] }
 0x1d0   : > { %2650 = vmatpush.msrb.mxu2 %v2415_v3  ;;  %2581 = vmatpush.msra.mxu3 %v2478_v7  ;;  %v2411_v18 = vld [vmem:[%s6491_s4 + $0x508] sm:$0xff] }
 0x1d1   : > { %2516 = vmatpush.msra.mxu0 %v2270_v22  ;;  %2623 = vmatpush.msrb.mxu1 %v2367_v11  ;;  %v1823_v22 = vadd.f32 %v5757_v49, %v1799_v31  ;;  %v2300_v31 = vld [vmem:[%s6491_s4 + $0x190] sm:$0xff] }
 0x1d2   : > { %2651 = vmatpush.msrb.mxu2 %v2411_v18  ;;  %2582 = vmatpush.msra.mxu3 %v2474_v46  ;;  %v2372_v18 = vld [vmem:[%s6491_s4 + $0x3d0] sm:$0xff] }
 0x1d3   : > { %2517 = vmatpush.msra.mxu0 %v2266_v4  ;;  %2624 = vmatpush.msrb.mxu1 %v2363_v54  ;;  %v1846_v45 = vadd.f32 %v5762_v21, %v1823_v22  ;;  %v2259_v4 = vld [vmem:[%s6491_s4 + $0x48] sm:$0xff]  ;;  %v2470_v54 = vld [vmem:[%s6491_s4 + $0x6e0] sm:$0xff]  ;;  %v2376_v22 = vld [vmem:[%s6491_s4 + $0x3f0] sm:$0xff] }
 0x1d4   : > { %2583 = vmatpush.msra.mxu3 %v2470_v54  ;;  %v2391_v21 = vld [vmem:[%s6491_s4 + $0x468] sm:$0xff]  ;;  %v2268_v46 = vld [vmem:[%s6491_s4 + $0x90] sm:$0xff] }
 0x1d5   : > { %2518 = vmatpush.msra.mxu0 %v2262_v9  ;;  %2625 = vmatpush.msrb.mxu1 %v2359_v15  ;;  %v5872_v9 = vpop.f32.mrf.mxu1  ;;  %v2368_v54 = vld [vmem:[%s6491_s4 + $0x3b0] sm:$0xff] }
 0x1d7   : > { %2519 = vmatpush.msra.mxu0 %v2258_v14  ;;  %2626 = vmatpush.msrb.mxu1 %v2355_v53  ;;  %v2407_v14 = vld [vmem:[%s6491_s4 + $0x4e8] sm:$0xff] }
 0x1d8   : > { %v2251_v53 = vld [vmem:[%s6491_s4 + $0x8] sm:$0xff]  ;;  %2652 = vmatpush.msrb.mxu2 %v2407_v14 }
 0x1d9   : > { %2520 = vmatpush.msra.mxu0 %v2254_v59  ;;  %2627 = vmatpush.msrb.mxu1 %v2351_v19  ;;  %v2403_v59 = vld [vmem:[%s6491_s4 + $0x4c8] sm:$0xff] }
 0x1da   : > { %v1868_v48 = vpop.f32.mrf.mxu3  ;;  %2653 = vmatpush.msrb.mxu2 %v2403_v59  ;;  %v2399_v19 = vld [vmem:[%s6491_s4 + $0x4a8] sm:$0xff] }
 0x1db   : > { %2521 = vmatpush.msra.mxu0 %v2250_v13  ;;  %2628 = vmatpush.msrb.mxu1 %v2347_v5  ;;  %v1869_v11 = vadd.f32 %v1868_v48, %v1846_v45  ;;  %v2466_v13 = vld [vmem:[%s6491_s4 + $0x6c0] sm:$0xff]  ;;  %v2308_v5 = vld [vmem:[%s6491_s4 + $0x1d0] sm:$0xff]  ;;  %v2499_v48 = vld [vmem:[%s6491_s4 + $0x7c8] sm:$0xff] }
 0x1dc   : > { %2584 = vmatpush.msra.mxu3 %v2466_v13  ;;  %2654 = vmatpush.msrb.mxu2 %v2399_v19  ;;  %v2487_v45 = vld [vmem:[%s6491_s4 + $0x768] sm:$0xff] }
 0x1dd   : > { %2598 = vmatpush.msrb.mxu0 %v2311_v23  ;;  %2629 = vmatpush.msrb.mxu1 %v2343_v34  ;;  %v1937_v23 = vpop.f32.mrf.mxu2  ;;  %v1917_v34 = vpop.f32.mrf.mxu1  ;;  %v2479_v59 = vld [vmem:[%s6491_s4 + $0x728] sm:$0xff] }
 0x1de   : > { %2585 = vmatpush.msra.mxu3 %v2462_v33 }
 0x1df   : > { %2599 = vmatpush.msrb.mxu0 %v2307_v63  ;;  %2630 = vmatpush.msrb.mxu1 %v2339_v39  ;;  %v2312_v63 = vld [vmem:[%s6491_s4 + $0x1f0] sm:$0xff]  ;;  %v2387_v39 = vld [vmem:[%s6491_s4 + $0x448] sm:$0xff] }
 0x1e0   : > { %2586 = vmatpush.msra.mxu3 %v2458_v6  ;;  %v2356_v6 = vld [vmem:[%s6491_s4 + $0x350] sm:$0xff] }
 0x1e1   : > { %2600 = vmatpush.msrb.mxu0 %v2303_v12  ;;  %2631 = vmatpush.msrb.mxu1 %v2335_v20  ;;  %v1826_v12 = vadd.f32 %v5809_v25, %v1802_v52  ;;  %v2442_v25 = vld [vmem:[%s6491_s4 + $0x600] sm:$0xff]  ;;  %v2495_v52 = vld [vmem:[%s6491_s4 + $0x7a8] sm:$0xff] }
 0x1e3   : > { %2601 = vmatpush.msrb.mxu0 %v2299_v24  ;;  %2632 = vmatpush.msrb.mxu1 %v2331_v2  ;;  %v2395_v24 = vld [vmem:[%s6491_s4 + $0x488] sm:$0xff]  ;;  %v1849_v49 = vadd.f32 %v5826_v1, %v1826_v12  ;;  %v2446_v2 = vld [vmem:[%s6491_s4 + $0x620] sm:$0xff]  ;;  %v2284_v1 = vld [vmem:[%s6491_s4 + $0x110] sm:$0xff] }
 0x1e4   : > { %v1871_v15 = vpop.f32.mrf.mxu3  ;;  %2655 = vmatpush.msrb.mxu2 %v2395_v24  ;;  %v2360_v12 = vld [vmem:[%s6491_s4 + $0x370] sm:$0xff]  ;;  %v2471_v24 = vld [vmem:[%s6491_s4 + $0x6e8] sm:$0xff] }
 0x1e5   : > { %2602 = vmatpush.msrb.mxu0 %v2295_v32  ;;  %2633 = vmatpush.msrb.mxu1 %v2327_v42  ;;  %v2304_v32 = vld [vmem:[%s6491_s4 + $0x1b0] sm:$0xff]  ;;  %v1872_v36 = vadd.f32 %v1871_v15, %v1849_v49 }
 0x1e6   : > { %2656 = vmatpush.msrb.mxu2 %v2391_v21  ;;  %v2288_v42 = vld [vmem:[%s6491_s4 + $0x130] sm:$0xff]  ;;  %v2313_v21 = vld [vmem:[%s6491_s4 + $0x1f8] sm:$0xff] }
 0x1e7   : > { %2603 = vmatpush.msrb.mxu0 %v2291_v50  ;;  %2634 = vmatpush.msrb.mxu1 %v2323_v47  ;;  %v2454_v50 = vld [vmem:[%s6491_s4 + $0x660] sm:$0xff]  ;;  %v2260_v15 = vld [vmem:[%s6491_s4 + $0x50] sm:$0xff] }
 0x1e8   : > { %2587 = vmatpush.msra.mxu3 %v2454_v50  ;;  %2657 = vmatpush.msrb.mxu2 %v2387_v39  ;;  %v2252_v49 = vld [vmem:[%s6491_s4 + $0x10] sm:$0xff] }
 0x1e9   : > { %2604 = vmatpush.msrb.mxu0 %v2287_v10  ;;  %2635 = vmatpush.msrb.mxu1 %v2319_v27  ;;  %v1940_v10 = vpop.f32.mrf.mxu2  ;;  %v2491_v27 = vld [vmem:[%s6491_s4 + $0x788] sm:$0xff] }
 0x1ea   : > { %2588 = vmatpush.msra.mxu3 %v2450_v26  ;;  %v1941_v3 = vadd.f32 %v1940_v10, %v1917_v34  ;;  %v2352_v34 = vld [vmem:[%s6491_s4 + $0x330] sm:$0xff]  ;;  %v2309_v10 = vld [vmem:[%s6491_s4 + $0x1d8] sm:$0xff] }
 0x1eb   : > { %2605 = vmatpush.msrb.mxu0 %v2283_v37  ;;  %2636 = vmatpush.msrb.mxu1 %v2315_v60  ;;  %v2383_v37 = vld [vmem:[%s6491_s4 + $0x428] sm:$0xff]  ;;  %v2276_v60 = vld [vmem:[%s6491_s4 + $0xd0] sm:$0xff] }
 0x1ec   : > { %v1960_v20 = vpop.f32.mrf.mxu3  ;;  %2658 = vmatpush.msrb.mxu2 %v2383_v37  ;;  %2589 = vmatpush.msra.mxu3 %v2446_v2  ;;  %v2348_v26 = vld [vmem:[%s6491_s4 + $0x310] sm:$0xff] }
 0x1ed   : > { %2606 = vmatpush.msrb.mxu0 %v2279_v41  ;;  %v2379_v41 = vld [vmem:[%s6491_s4 + $0x408] sm:$0xff]  ;;  %v2344_v2 = vld [vmem:[%s6491_s4 + $0x2f0] sm:$0xff] }
 0x1ee   : > { %2659 = vmatpush.msrb.mxu2 %v2379_v41  ;;  %2590 = vmatpush.msra.mxu3 %v2442_v25  ;;  %v2455_v41 = vld [vmem:[%s6491_s4 + $0x668] sm:$0xff] }
 0x1ef   : > { %2607 = vmatpush.msrb.mxu0 %v2275_v8  ;;  %v1938_v8 = vadd.f32 %v1937_v23, %v5872_v9  ;;  %v2483_v9 = vld [vmem:[%s6491_s4 + $0x748] sm:$0xff]  ;;  %v2364_v23 = vld [vmem:[%s6491_s4 + $0x390] sm:$0xff] }
 0x1f0   : > { %2667 = vmatpush.msrb.mxu3 %v2503_v40  ;;  %v2301_v40 = vld [vmem:[%s6491_s4 + $0x198] sm:$0xff] }
 0x1f1   : > { %2608 = vmatpush.msrb.mxu0 %v2271_v16  ;;  %v1961_v16 = vadd.f32 %v1960_v20, %v1938_v8  ;;  %v2029_v57 = vpop.f32.mrf.mxu2  ;;  %v2459_v20 = vld [vmem:[%s6491_s4 + $0x688] sm:$0xff] }
 0x1f2   : > { %2668 = vmatpush.msrb.mxu3 %v2499_v48  ;;  %v2336_v48 = vld [vmem:[%s6491_s4 + $0x2b0] sm:$0xff] }
 0x1f3   : > { %2609 = vmatpush.msrb.mxu0 %v2267_v56 }
 0x1f4   : > { %v1963_v56 = vpop.f32.mrf.mxu3  ;;  %2669 = vmatpush.msrb.mxu3 %v2495_v52 }
 0x1f5   : > { %2610 = vmatpush.msrb.mxu0 %v2263_v35  ;;  %v2272_v35 = vld [vmem:[%s6491_s4 + $0xb0] sm:$0xff] }
 0x1f6   : > { %v1891_v28 = vpop.f32.mrf.mxu0  ;;  %v2006_v29 = vpop.f32.mrf.mxu1  ;;  %2670 = vmatpush.msrb.mxu3 %v2491_v27  ;;  %v2436_v27 = vld [vmem:[%s6491_s4 + $0x5d0] sm:$0xff] }
 0x1f7   : > { %2611 = vmatpush.msrb.mxu0 %v2259_v4  ;;  %v5889_v43 = vadd.f32 %v1891_v28, %v1869_v11  ;;  %v1964_v4 = vadd.f32 %v1963_v56, %v1941_v3  ;;  %v2264_v28 = vld [vmem:[%s6491_s4 + $0x70] sm:$0xff]  ;;  %v2293_v3 = vld [vmem:[%s6491_s4 + $0x158] sm:$0xff] }
 0x1f8   : > { %2671 = vmatpush.msrb.mxu3 %v2487_v45 }
 0x1f9   : > { %2612 = vmatpush.msrb.mxu0 %v2255_v44  ;;  %v5896_v58 = vmul.f32 %v5889_v43, %v5889_v43 }
 0x1fa   : > { %2672 = vmatpush.msrb.mxu3 %v2483_v9  ;;  %v2428_v9 = vld [vmem:[%s6491_s4 + $0x590] sm:$0xff] }
 0x1fb   : > { %2613 = vmatpush.msrb.mxu0 %v2251_v53  ;;  %v2475_v53 = vld [vmem:[%s6491_s4 + $0x708] sm:$0xff] }
 0x1fc   : > { %2522 = vmatmul.f32.vlgmr.msra.gmra.mxu0 %v5896_v58  ;;  %2673 = vmatpush.msrb.mxu3 %v2479_v59  ;;  %v2424_v59 = vld [vmem:[%s6491_s4 + $0x570] sm:$0xff] }
 0x1fd   : > { %2690 = vmatpush.msra.mxu0 %v2312_v63  ;;  %v2032_v63 = vpop.f32.mrf.mxu2 }
 0x1fe   : > { %v2052_v19 = vpop.f32.mrf.mxu3  ;;  %2674 = vmatpush.msrb.mxu3 %v2475_v53  ;;  %v2420_v53 = vld [vmem:[%s6491_s4 + $0x550] sm:$0xff] }
 0x1ff   : > { %2691 = vmatpush.msra.mxu0 %v2308_v5  ;;  %v2256_v5 = vld [vmem:[%s6491_s4 + $0x30] sm:$0xff]  ;;  %v2053_v50 = vadd.f32 %v2052_v19, %v2029_v57  ;;  %v2443_v57 = vld [vmem:[%s6491_s4 + $0x608] sm:$0xff]  ;;  %v2277_v19 = vld [vmem:[%s6491_s4 + $0xd8] sm:$0xff] }
 0x200   : > { %v1894_v61 = vpop.f32.mrf.mxu0  ;;  %v2009_v44 = vpop.f32.mrf.mxu1  ;;  %2675 = vmatpush.msrb.mxu3 %v2471_v24  ;;  %v2273_v24 = vld [vmem:[%s6491_s4 + $0xb8] sm:$0xff] }
 0x201   : > { %2692 = vmatpush.msra.mxu0 %v2304_v32  ;;  %v5937_v0 = vadd.f32 %v1894_v61, %v1872_v36  ;;  %v2467_v32 = vld [vmem:[%s6491_s4 + $0x6c8] sm:$0xff] }
 0x202   : > { %2676 = vmatpush.msrb.mxu3 %v2467_v32  ;;  %v2463_v36 = vld [vmem:[%s6491_s4 + $0x6a8] sm:$0xff]  ;;  %v2269_v32 = vld [vmem:[%s6491_s4 + $0x98] sm:$0xff] }
 0x203   : > { %2693 = vmatpush.msra.mxu0 %v2300_v31  ;;  %v5950_v38 = vmul.f32 %v5937_v0, %v5937_v0 }
 0x204   : > { %2677 = vmatpush.msrb.mxu3 %v2463_v36  ;;  %v2265_v36 = vld [vmem:[%s6491_s4 + $0x78] sm:$0xff] }
 0x205   : > { %2694 = vmatpush.msra.mxu0 %v2296_v30  ;;  %v2121_v30 = vpop.f32.mrf.mxu2 }
 0x206   : > { %2525 = vmatmul.f32.gmra.mxu0 %v5950_v38  ;;  %2678 = vmatpush.msrb.mxu3 %v2459_v20  ;;  %v2257_v20 = vld [vmem:[%s6491_s4 + $0x38] sm:$0xff] }
 0x207   : > { %2695 = vmatpush.msra.mxu0 %v2292_v17  ;;  %v2305_v17 = vld [vmem:[%s6491_s4 + $0x1b8] sm:$0xff]  ;;  %v2055_v25 = vpop.f32.mrf.mxu3 }
 0x208   : > { %v1983_v47 = vpop.f32.mrf.mxu0  ;;  %2679 = vmatpush.msrb.mxu3 %v2455_v41  ;;  %v2253_v41 = vld [vmem:[%s6491_s4 + $0x18] sm:$0xff] }
 0x209   : > { %2696 = vmatpush.msra.mxu0 %v2288_v42  ;;  %v1984_v51 = vadd.f32 %v1983_v47, %v1961_v16  ;;  %v2098_v39 = vpop.f32.mrf.mxu1  ;;  %v2340_v42 = vld [vmem:[%s6491_s4 + $0x2d0] sm:$0xff]  ;;  %v2451_v16 = vld [vmem:[%s6491_s4 + $0x648] sm:$0xff] }
 0x20a   : > { %2680 = vmatpush.msrb.mxu3 %v2451_v16  ;;  %v2447_v47 = vld [vmem:[%s6491_s4 + $0x628] sm:$0xff] }
 0x20b   : > { %2697 = vmatpush.msra.mxu0 %v2284_v1  ;;  %v5984_v55 = vadd.f32 %v2006_v29, %v1984_v51  ;;  %v2440_v1 = vld [vmem:[%s6491_s4 + $0x5f0] sm:$0xff]  ;;  %v2056_v51 = vadd.f32 %v2055_v25, %v2032_v63 }
 0x20c   : > { %2681 = vmatpush.msrb.mxu3 %v2447_v47  ;;  %v2316_v63 = vld [vmem:[%s6491_s4 + $0x210] sm:$0xff]  ;;  %v2349_v47 = vld [vmem:[%s6491_s4 + $0x318] sm:$0xff] }
 0x20d   : > { %2698 = vmatpush.msra.mxu0 %v2280_v62  ;;  %v5991_v7 = vmul.f32 %v5984_v55, %v5984_v55  ;;  %v2297_v62 = vld [vmem:[%s6491_s4 + $0x178] sm:$0xff] }
 0x20e   : > { %2614 = vmatmul.f32.vlgmr.msrb.gmra.mxu0 %v5896_v58  ;;  %2682 = vmatpush.msrb.mxu3 %v2443_v57 }
 0x20f   : > { %2699 = vmatpush.msra.mxu0 %v2276_v60  ;;  %2545 = vmatmul.f32.vlgmr.msra.gmra.mxu1 %v5991_v7  ;;  %v2332_v60 = vld [vmem:[%s6491_s4 + $0x290] sm:$0xff] }
 0x210   : > { %2713 = vmatpush.msra.mxu1 %v2376_v22  ;;  %v1986_v11 = vpop.f32.mrf.mxu0 }
 0x211   : > { %2700 = vmatpush.msra.mxu0 %v2272_v35  ;;  %v1987_v14 = vadd.f32 %v1986_v11, %v1964_v4  ;;  %v2432_v35 = vld [vmem:[%s6491_s4 + $0x5b0] sm:$0xff] }
 0x212   : > { %2714 = vmatpush.msra.mxu1 %v2372_v18  ;;  %v2101_v22 = vpop.f32.mrf.mxu1  ;;  %v2328_v4 = vld [vmem:[%s6491_s4 + $0x270] sm:$0xff]  ;;  %v2289_v18 = vld [vmem:[%s6491_s4 + $0x138] sm:$0xff] }
 0x213   : > { %2701 = vmatpush.msra.mxu0 %v2268_v46  ;;  %v6022_v13 = vadd.f32 %v2009_v44, %v1987_v14  ;;  %v2124_v46 = vpop.f32.mrf.mxu2  ;;  %v2324_v44 = vld [vmem:[%s6491_s4 + $0x250] sm:$0xff]  ;;  %v2285_v14 = vld [vmem:[%s6491_s4 + $0x118] sm:$0xff] }
 0x214   : > { %2715 = vmatpush.msra.mxu1 %v2368_v54 }
 0x215   : > { %2702 = vmatpush.msra.mxu0 %v2264_v28  ;;  %v6035_v33 = vmul.f32 %v6022_v13, %v6022_v13 }
 0x216   : > { %2617 = vmatmul.f32.gmra.mxu0 %v5950_v38  ;;  %2716 = vmatpush.msra.mxu1 %v2364_v23  ;;  %v2320_v23 = vld [vmem:[%s6491_s4 + $0x230] sm:$0xff] }
 0x217   : > { %2703 = vmatpush.msra.mxu0 %v2260_v15  ;;  %2548 = vmatmul.f32.gmra.mxu1 %v6035_v33  ;;  %v2281_v15 = vld [vmem:[%s6491_s4 + $0xf8] sm:$0xff] }
 0x218   : > { %2717 = vmatpush.msra.mxu1 %v2360_v12  ;;  %v2377_v12 = vld [vmem:[%s6491_s4 + $0x3f8] sm:$0xff] }
 0x219   : > { %2704 = vmatpush.msra.mxu0 %v2256_v5  ;;  %v2416_v5 = vld [vmem:[%s6491_s4 + $0x530] sm:$0xff] }
 0x21a   : > { %2718 = vmatpush.msra.mxu1 %v2356_v6  ;;  %v2373_v6 = vld [vmem:[%s6491_s4 + $0x3d8] sm:$0xff] }
 0x21b   : > { %v2075_v31 = vpop.f32.mrf.mxu0  ;;  %2705 = vmatpush.msra.mxu0 %v2252_v49  ;;  %v2412_v49 = vld [vmem:[%s6491_s4 + $0x510] sm:$0xff]  ;;  %v2213_v16 = vpop.f32.mrf.mxu2 }
 0x21c   : > { %v2076_v61 = vadd.f32 %v2075_v31, %v2053_v50  ;;  %2719 = vmatpush.msra.mxu1 %v2352_v34  ;;  %v2369_v50 = vld [vmem:[%s6491_s4 + $0x3b8] sm:$0xff]  ;;  %v2404_v31 = vld [vmem:[%s6491_s4 + $0x4d0] sm:$0xff] }
 0x21d   : > { %2782 = vmatpush.msrb.mxu0 %v2313_v21  ;;  %v2408_v21 = vld [vmem:[%s6491_s4 + $0x4f0] sm:$0xff] }
 0x21e   : > { %v2099_v37 = vadd.f32 %v2098_v39, %v2076_v61  ;;  %2706 = vmatmul.f32.vlgmr.msra.gmra.mxu0 %v5896_v58  ;;  %2720 = vmatpush.msra.mxu1 %v2348_v26  ;;  %v2365_v39 = vld [vmem:[%s6491_s4 + $0x398] sm:$0xff]  ;;  %v2400_v26 = vld [vmem:[%s6491_s4 + $0x4b0] sm:$0xff] }
 0x21f   : > { %2783 = vmatpush.msrb.mxu0 %v2309_v10  ;;  %2637 = vmatmul.f32.vlgmr.msrb.gmra.mxu1 %v5991_v7  ;;  %v2144_v54 = vpop.f32.mrf.mxu3  ;;  %v2261_v61 = vld [vmem:[%s6491_s4 + $0x58] sm:$0xff] }
 0x220   : > { %v6085_v8 = vadd.f32 %v2121_v30, %v2099_v37  ;;  %2721 = vmatpush.msra.mxu1 %v2344_v2  ;;  %v2361_v10 = vld [vmem:[%s6491_s4 + $0x378] sm:$0xff]  ;;  %v2396_v30 = vld [vmem:[%s6491_s4 + $0x490] sm:$0xff]  ;;  %v2190_v2 = vpop.f32.mrf.mxu1 }
 0x221   : > { %2784 = vmatpush.msrb.mxu0 %v2305_v17  ;;  %v2357_v37 = vld [vmem:[%s6491_s4 + $0x358] sm:$0xff] }
 0x222   : > { %v6099_v29 = vmul.f32 %v6085_v8, %v6085_v8  ;;  %2722 = vmatpush.msra.mxu1 %v2340_v42  ;;  %v2392_v42 = vld [vmem:[%s6491_s4 + $0x470] sm:$0xff] }
 0x223   : > { %2785 = vmatpush.msrb.mxu0 %v2301_v40  ;;  %v2078_v52 = vpop.f32.mrf.mxu0  ;;  %v2353_v40 = vld [vmem:[%s6491_s4 + $0x338] sm:$0xff] }
 0x224   : > { %2568 = vmatmul.f32.vlgmr.msra.gmra.mxu2 %v6099_v29  ;;  %v2079_v56 = vadd.f32 %v2078_v52, %v2056_v51  ;;  %2723 = vmatpush.msra.mxu1 %v2336_v48  ;;  %v2388_v48 = vld [vmem:[%s6491_s4 + $0x450] sm:$0xff] }
 0x225   : > { %2736 = vmatpush.msra.mxu2 %v2440_v1  ;;  %2786 = vmatpush.msrb.mxu0 %v2297_v62  ;;  %v2384_v52 = vld [vmem:[%s6491_s4 + $0x430] sm:$0xff] }
 0x226   : > { %v2102_v45 = vadd.f32 %v2101_v22, %v2079_v56  ;;  %2709 = vmatmul.f32.gmra.mxu0 %v5950_v38  ;;  %2724 = vmatpush.msra.mxu1 %v2332_v60  ;;  %v2380_v56 = vld [vmem:[%s6491_s4 + $0x410] sm:$0xff] }
 0x227   : > { %2737 = vmatpush.msra.mxu2 %v2436_v27  ;;  %2787 = vmatpush.msrb.mxu0 %v2293_v3  ;;  %v2345_v27 = vld [vmem:[%s6491_s4 + $0x2f8] sm:$0xff] }
 0x228   : > { %v6139_v11 = vadd.f32 %v2124_v46, %v2102_v45  ;;  %2640 = vmatmul.f32.gmra.mxu1 %v6035_v33  ;;  %v2147_v34 = vpop.f32.mrf.mxu3  ;;  %v2441_v3 = vld [vmem:[%s6491_s4 + $0x5f8] sm:$0xff]  ;;  %v2504_v45 = vld [vmem:[%s6491_s4 + $0x7f0] sm:$0xff] }
 0x229   : > { %2738 = vmatpush.msra.mxu2 %v2432_v35  ;;  %2725 = vmatpush.msra.mxu1 %v2328_v4  ;;  %v2193_v4 = vpop.f32.mrf.mxu1  ;;  %v2437_v46 = vld [vmem:[%s6491_s4 + $0x5d8] sm:$0xff] }
 0x22a   : > { %2788 = vmatpush.msrb.mxu0 %v2289_v18  ;;  %v6150_v28 = vmul.f32 %v6139_v11, %v6139_v11  ;;  %v2337_v18 = vld [vmem:[%s6491_s4 + $0x2b8] sm:$0xff] }
 0x22b   : > { %2739 = vmatpush.msra.mxu2 %v2428_v9  ;;  %2726 = vmatpush.msra.mxu1 %v2324_v44  ;;  %v2500_v44 = vld [vmem:[%s6491_s4 + $0x7d0] sm:$0xff] }
 0x22c   : > { %2789 = vmatpush.msrb.mxu0 %v2285_v14  ;;  %2571 = vmatmul.f32.gmra.mxu2 %v6150_v28  ;;  %v2216_v14 = vpop.f32.mrf.mxu2 }
 0x22d   : > { %2740 = vmatpush.msra.mxu2 %v2424_v59  ;;  %2727 = vmatpush.msra.mxu1 %v2320_v23  ;;  %v2433_v59 = vld [vmem:[%s6491_s4 + $0x5b8] sm:$0xff] }
 0x22e   : > { %2790 = vmatpush.msrb.mxu0 %v2281_v15  ;;  %v2496_v15 = vld [vmem:[%s6491_s4 + $0x7b0] sm:$0xff] }
 0x22f   : > { %2741 = vmatpush.msra.mxu2 %v2420_v53  ;;  %2728 = vmatpush.msra.mxu1 %v2316_v63  ;;  %v2329_v63 = vld [vmem:[%s6491_s4 + $0x278] sm:$0xff] }
 0x230   : > { %2791 = vmatpush.msrb.mxu0 %v2277_v19  ;;  %2729 = vmatmul.f32.vlgmr.msra.gmra.mxu1 %v5991_v7  ;;  %v2429_v19 = vld [vmem:[%s6491_s4 + $0x598] sm:$0xff] }
 0x231   : > { %2805 = vmatpush.msrb.mxu1 %v2377_v12  ;;  %2742 = vmatpush.msra.mxu2 %v2416_v5  ;;  %v2236_v51 = vpop.f32.mrf.mxu3  ;;  %v2492_v5 = vld [vmem:[%s6491_s4 + $0x790] sm:$0xff] }
 0x232   : > { %2792 = vmatpush.msrb.mxu0 %v2273_v24  ;;  %v2425_v24 = vld [vmem:[%s6491_s4 + $0x578] sm:$0xff] }
 0x233   : > { %2806 = vmatpush.msrb.mxu1 %v2373_v6  ;;  %2743 = vmatpush.msra.mxu2 %v2412_v49  ;;  %v2488_v49 = vld [vmem:[%s6491_s4 + $0x770] sm:$0xff] }
 0x234   : > { %2660 = vmatmul.f32.vlgmr.msrb.gmra.mxu2 %v6099_v29  ;;  %2793 = vmatpush.msrb.mxu0 %v2269_v32  ;;  %v2321_v32 = vld [vmem:[%s6491_s4 + $0x238] sm:$0xff] }
 0x235   : > { %2744 = vmatpush.msra.mxu2 %v2408_v21  ;;  %2807 = vmatpush.msrb.mxu1 %v2369_v50  ;;  %v2421_v21 = vld [vmem:[%s6491_s4 + $0x558] sm:$0xff]  ;;  %v2484_v50 = vld [vmem:[%s6491_s4 + $0x750] sm:$0xff] }
 0x236   : > { %2794 = vmatpush.msrb.mxu0 %v2265_v36  ;;  %v2417_v36 = vld [vmem:[%s6491_s4 + $0x538] sm:$0xff] }
 0x237   : > { %2745 = vmatpush.msra.mxu2 %v2404_v31  ;;  %2808 = vmatpush.msrb.mxu1 %v2365_v39  ;;  %v2480_v31 = vld [vmem:[%s6491_s4 + $0x730] sm:$0xff]  ;;  %v2413_v39 = vld [vmem:[%s6491_s4 + $0x518] sm:$0xff] }
 0x238   : > { %2795 = vmatpush.msrb.mxu0 %v2261_v61  ;;  %2732 = vmatmul.f32.gmra.mxu1 %v6035_v33  ;;  %v2476_v61 = vld [vmem:[%s6491_s4 + $0x710] sm:$0xff] }
 0x239   : > { %2746 = vmatpush.msra.mxu2 %v2400_v26  ;;  %v2167_v17 = vpop.f32.mrf.mxu0  ;;  %2809 = vmatpush.msrb.mxu1 %v2361_v10  ;;  %v2239_v53 = vpop.f32.mrf.mxu3  ;;  %v2409_v26 = vld [vmem:[%s6491_s4 + $0x4f8] sm:$0xff]  ;;  %v2472_v10 = vld [vmem:[%s6491_s4 + $0x6f0] sm:$0xff] }
 0x23a   : > { %v2168_v25 = vadd.f32 %v2167_v17, %v2144_v54  ;;  %2796 = vmatpush.msrb.mxu0 %v2257_v20  ;;  %v2333_v54 = vld [vmem:[%s6491_s4 + $0x298] sm:$0xff]  ;;  %v2460_v17 = vld [vmem:[%s6491_s4 + $0x690] sm:$0xff] }
 0x23b   : > { %2747 = vmatpush.msra.mxu2 %v2396_v30  ;;  %2810 = vmatpush.msrb.mxu1 %v2357_v37  ;;  %v2405_v20 = vld [vmem:[%s6491_s4 + $0x4d8] sm:$0xff]  ;;  %v2464_v37 = vld [vmem:[%s6491_s4 + $0x6b0] sm:$0xff] }
 0x23c   : > { %v2191_v1 = vadd.f32 %v2190_v2, %v2168_v25  ;;  %2663 = vmatmul.f32.gmra.mxu2 %v6150_v28  ;;  %2797 = vmatpush.msrb.mxu0 %v2253_v41  ;;  %v2401_v30 = vld [vmem:[%s6491_s4 + $0x4b8] sm:$0xff]  ;;  %v2456_v25 = vld [vmem:[%s6491_s4 + $0x670] sm:$0xff] }
 0x23d   : > { %2748 = vmatpush.msra.mxu2 %v2392_v42  ;;  %2811 = vmatpush.msrb.mxu1 %v2353_v40  ;;  %v2397_v2 = vld [vmem:[%s6491_s4 + $0x498] sm:$0xff] }
 0x23e   : > { %v2214_v62 = vadd.f32 %v2213_v16, %v2191_v1  ;;  %2798 = vmatmul.f32.vlgmr.msrb.gmra.mxu0 %v5896_v58  ;;  %v2341_v58 = vld [vmem:[%s6491_s4 + $0x2d8] sm:$0xff]  ;;  %v2448_v16 = vld [vmem:[%s6491_s4 + $0x630] sm:$0xff] }
 0x23f   : > { %2749 = vmatpush.msra.mxu2 %v2388_v48  ;;  %2812 = vmatpush.msrb.mxu1 %v2349_v47  ;;  %v2393_v41 = vld [vmem:[%s6491_s4 + $0x478] sm:$0xff]  ;;  %v2444_v48 = vld [vmem:[%s6491_s4 + $0x610] sm:$0xff] }
 0x240   : > { %v6248_v57 = vadd.f32 %v2236_v51, %v2214_v62  ;;  %v2389_v42 = vld [vmem:[%s6491_s4 + $0x458] sm:$0xff] }
 0x241   : > { %2750 = vmatpush.msra.mxu2 %v2384_v52  ;;  %v2170_v60 = vpop.f32.mrf.mxu0  ;;  %2813 = vmatpush.msrb.mxu1 %v2345_v27  ;;  %v2385_v40 = vld [vmem:[%s6491_s4 + $0x438] sm:$0xff] }
 0x242   : > { %v2171_v22 = vadd.f32 %v2170_v60, %v2147_v34  ;;  %v6261_v35 = vmul.f32 %v6248_v57, %v6248_v57  ;;  %v2317_v34 = vld [vmem:[%s6491_s4 + $0x218] sm:$0xff] }
 0x243   : > { %2751 = vmatpush.msra.mxu2 %v2380_v56  ;;  %2814 = vmatpush.msrb.mxu1 %v2341_v58  ;;  %v2381_v1 = vld [vmem:[%s6491_s4 + $0x418] sm:$0xff] }
 0x244   : > { %v2194_v9 = vadd.f32 %v2193_v4, %v2171_v22  ;;  %2591 = vmatmul.f32.vlgmr.msra.gmra.mxu3 %v6261_v35  ;;  %2752 = vmatmul.f32.vlgmr.msra.gmra.mxu2 %v6099_v29  ;;  %v2505_v47 = vld [vmem:[%s6491_s4 + $0x7f8] sm:$0xff] }
 0x245   : > { %2828 = vmatpush.msrb.mxu2 %v2441_v3  ;;  %2759 = vmatpush.msra.mxu3 %v2504_v45  ;;  %v2501_v51 = vld [vmem:[%s6491_s4 + $0x7d8] sm:$0xff] }
 0x246   : > { %v2217_v23 = vadd.f32 %v2216_v14, %v2194_v9  ;;  %2815 = vmatpush.msrb.mxu1 %v2337_v18  ;;  %2801 = vmatmul.f32.gmra.mxu0 %v5950_v38  ;;  %v2325_v38 = vld [vmem:[%s6491_s4 + $0x258] sm:$0xff] }
 0x247   : > { %2829 = vmatpush.msrb.mxu2 %v2437_v46  ;;  %2760 = vmatpush.msra.mxu3 %v2500_v44  ;;  %v2497_v62 = vld [vmem:[%s6491_s4 + $0x7b8] sm:$0xff] }
 0x248   : > { %v6293_v12 = vadd.f32 %v2239_v53, %v2217_v23  ;;  %2816 = vmatpush.msrb.mxu1 %v2333_v54  ;;  %v2493_v52 = vld [vmem:[%s6491_s4 + $0x798] sm:$0xff] }
 0x249   : > { %2830 = vmatpush.msrb.mxu2 %v2433_v59  ;;  %2761 = vmatpush.msra.mxu3 %v2496_v15  ;;  %v2485_v27 = vld [vmem:[%s6491_s4 + $0x758] sm:$0xff] }
 0x24a   : > { %2817 = vmatpush.msrb.mxu1 %v2329_v63  ;;  %v6306_v6 = vmul.f32 %v6293_v12, %v6293_v12  ;;  %v2481_v56 = vld [vmem:[%s6491_s4 + $0x738] sm:$0xff] }
 0x24b   : > { %2831 = vmatpush.msrb.mxu2 %v2429_v19  ;;  %2762 = vmatpush.msra.mxu3 %v2492_v5  ;;  %v2477_v58 = vld [vmem:[%s6491_s4 + $0x718] sm:$0xff] }
 0x24c   : > { %2818 = vmatpush.msrb.mxu1 %v2325_v38  ;;  %2594 = vmatmul.f32.gmra.mxu3 %v6306_v6  ;;  %v2469_v60 = vld [vmem:[%s6491_s4 + $0x6d8] sm:$0xff] }
 0x24d   : > { %2832 = vmatpush.msrb.mxu2 %v2425_v24  ;;  %2763 = vmatpush.msra.mxu3 %v2488_v49  ;;  %v2465_v3 = vld [vmem:[%s6491_s4 + $0x6b8] sm:$0xff] }
 0x24e   : > { %2755 = vmatmul.f32.gmra.mxu2 %v6150_v28  ;;  %2819 = vmatpush.msrb.mxu1 %v2321_v32  ;;  %v2461_v22 = vld [vmem:[%s6491_s4 + $0x698] sm:$0xff] }
 0x24f   : > { %2833 = vmatpush.msrb.mxu2 %v2421_v21  ;;  %2764 = vmatpush.msra.mxu3 %v2484_v50  ;;  %v2457_v45 = vld [vmem:[%s6491_s4 + $0x678] sm:$0xff] }
 0x250   : > { %2820 = vmatpush.msrb.mxu1 %v2317_v34  ;;  %v2453_v4 = vld [vmem:[%s6491_s4 + $0x658] sm:$0xff] }
 0x251   : > { %2834 = vmatpush.msrb.mxu2 %v2417_v36  ;;  %2821 = vmatmul.f32.vlgmr.msrb.gmra.mxu1 %v5991_v7  ;;  %v2468_v7 = vld [vmem:[%s6491_s4 + $0x6d0] sm:$0xff]  ;;  %v2449_v18 = vld [vmem:[%s6491_s4 + $0x638] sm:$0xff] }
 0x252   : > { %2765 = vmatpush.msra.mxu3 %v2480_v31  ;;  %v2445_v46 = vld [vmem:[%s6491_s4 + $0x618] sm:$0xff] }
 0x253   : > { %2835 = vmatpush.msrb.mxu2 %v2413_v39 }
 0x254   : > { %2766 = vmatpush.msra.mxu3 %v2476_v61 }
 0x255   : > { %2836 = vmatpush.msrb.mxu2 %v2409_v26  ;;  %2683 = vmatmul.f32.vlgmr.msrb.gmra.mxu3 %v6261_v35 }
 0x256   : > { %2767 = vmatpush.msra.mxu3 %v2472_v10 }
 0x257   : > { %2837 = vmatpush.msrb.mxu2 %v2405_v20 }
 0x258   : > { %2768 = vmatpush.msra.mxu3 %v2468_v7 }
 0x259   : > { %2838 = vmatpush.msrb.mxu2 %v2401_v30  ;;  %2824 = vmatmul.f32.gmra.mxu1 %v6035_v33  ;;  %v2452_v33 = vld [vmem:[%s6491_s4 + $0x650] sm:$0xff] }
 0x25a   : > { %2769 = vmatpush.msra.mxu3 %v2464_v37  ;;  %v6446_v37 = vld [vmem:[%s6492_s5] sm:$0xf] }
 0x25b   : > { %2839 = vmatpush.msrb.mxu2 %v2397_v2 }
 0x25c   : > { %2770 = vmatpush.msra.mxu3 %v2460_v17 }
 0x25d   : > { %2840 = vmatpush.msrb.mxu2 %v2393_v41  ;;  %2686 = vmatmul.f32.gmra.mxu3 %v6306_v6 }
 0x25e   : > { %2771 = vmatpush.msra.mxu3 %v2456_v25 }
 0x25f   : > { %2841 = vmatpush.msrb.mxu2 %v2389_v42  ;;  %v6451_v42 = vld [vmem:[%s6493_s6] sm:$0xf] }
 0x260   : > { %2772 = vmatpush.msra.mxu3 %v2452_v33 }
 0x261   : > { %2842 = vmatpush.msrb.mxu2 %v2385_v40  ;;  %v2964_v40 = vperm.slane %v6446_v37, 0 }
 0x262   : > { %2773 = vmatpush.msra.mxu3 %v2448_v16 }
 0x263   : > { %2843 = vmatpush.msrb.mxu2 %v2381_v1 }
 0x264   : > { %2774 = vmatpush.msra.mxu3 %v2444_v48  ;;  %2844 = vmatmul.f32.vlgmr.msrb.gmra.mxu2 %v6099_v29  ;;  %v2489_v29 = vld [vmem:[%s6491_s4 + $0x778] sm:$0xff] }
 0x265   : > { %2775 = vmatmul.f32.vlgmr.msra.gmra.mxu3 %v6261_v35 }
 0x266   : > { %2851 = vmatpush.msrb.mxu3 %v2505_v47 }
 0x268   : > { %2852 = vmatpush.msrb.mxu3 %v2501_v51  ;;  %v2982_v51 = vperm.slane %v6451_v42, 0 }
 0x26a   : > { %2853 = vmatpush.msrb.mxu3 %v2497_v62 }
 0x26c   : > { %2854 = vmatpush.msrb.mxu3 %v2493_v52  ;;  %2847 = vmatmul.f32.gmra.mxu2 %v6150_v28  ;;  %v2473_v28 = vld [vmem:[%s6491_s4 + $0x6f8] sm:$0xff] }
 0x26d   : > { %2778 = vmatmul.f32.gmra.mxu3 %v6306_v6 }
 0x26e   : > { %2855 = vmatpush.msrb.mxu3 %v2489_v29 }
 0x270   : > { %2856 = vmatpush.msrb.mxu3 %v2485_v27 }
 0x272   : > { %2857 = vmatpush.msrb.mxu3 %v2481_v56 }
 0x274   : > { %2858 = vmatpush.msrb.mxu3 %v2477_v58 }
 0x276   : > { %2859 = vmatpush.msrb.mxu3 %v2473_v28 }
 0x278   : > { %2860 = vmatpush.msrb.mxu3 %v2469_v60 }
 0x279   : > { %v2523_v9 = vpop.f32.mrf.mxu0 }
 0x27a   : > { %2861 = vmatpush.msrb.mxu3 %v2465_v3  ;;  %v2524_v59 = vadd.f32 1e-05, %v2523_v9 }
 0x27c   : > { %2862 = vmatpush.msrb.mxu3 %v2461_v22 }
 0x27e   : > { %2863 = vmatpush.msrb.mxu3 %v2457_v45 }
 0x280   : > { %2864 = vmatpush.msrb.mxu3 %v2453_v4 }
 0x282   : > { %2865 = vmatpush.msrb.mxu3 %v2449_v18 }
 0x283   : > { %v2526_v54 = vpop.f32.mrf.mxu0 }
 0x284   : > { %2866 = vmatpush.msrb.mxu3 %v2445_v46  ;;  %v2527_v38 = vadd.f32 1e-05, %v2526_v54 }
 0x285   : > { %2867 = vmatmul.f32.vlgmr.msrb.gmra.mxu3 %v6261_v35 }
 0x28b   : > { %v2615_v24 = vpop.f32.mrf.mxu0 }
 0x28c   : > { %v2546_v44 = vpop.f32.mrf.mxu1  ;;  %v2616_v31 = vadd.f32 1e-05, %v2615_v24 }
 0x28d   : > { %2870 = vmatmul.f32.gmra.mxu3 %v6306_v6  ;;  %v2547_v15 = vadd.f32 %v2546_v44, %v2524_v59 }
 0x293   : > { %v2618_v61 = vpop.f32.mrf.mxu0 }
 0x294   : > { %v2549_v23 = vpop.f32.mrf.mxu1  ;;  %v2619_v1 = vadd.f32 1e-05, %v2618_v61 }
 0x295   : > { %v2550_v49 = vadd.f32 %v2549_v23, %v2527_v38 }
 0x29b   : > { %v2707_v56 = vpop.f32.mrf.mxu0 }
 0x29c   : > { %v2638_v32 = vpop.f32.mrf.mxu1  ;;  %v2708_v9 = vadd.f32 1e-05, %v2707_v56 }
 0x29d   : > { %v2639_v26 = vadd.f32 %v2638_v32, %v2616_v31 }
 0x2a5   : > { %v2641_v20 = vpop.f32.mrf.mxu1 }
 0x2a6   : > { %v2642_v52 = vadd.f32 %v2641_v20, %v2619_v1 }
 0x2a7   : > { %v2569_v14 = vpop.f32.mrf.mxu2 }
 0x2a8   : > { %v2570_v63 = vadd.f32 %v2569_v14, %v2547_v15 }
 0x2ad   : > { %v2730_v22 = vpop.f32.mrf.mxu1 }
 0x2ae   : > { %v2731_v59 = vadd.f32 %v2730_v22, %v2708_v9 }
 0x2af   : > { %v2572_v53 = vpop.f32.mrf.mxu2 }
 0x2b0   : > { %v2573_v21 = vadd.f32 %v2572_v53, %v2550_v49 }
 0x2b7   : > { %v2661_v35 = vpop.f32.mrf.mxu2 }
 0x2b8   : > { %v2662_v7 = vadd.f32 %v2661_v35, %v2639_v26  ;;  %v2733_v35 = vpop.f32.mrf.mxu1 }
 0x2bf   : > { %v2664_v41 = vpop.f32.mrf.mxu2 }
 0x2c0   : > { %v2665_v58 = vadd.f32 %v2664_v41, %v2642_v52 }
 0x2c7   : > { %v2592_v19 = vpop.f32.mrf.mxu3  ;;  %v2753_v46 = vpop.f32.mrf.mxu2 }
 0x2c8   : > { %v2593_v5 = vadd.f32 %v2592_v19, %v2570_v63  ;;  %v2754_v53 = vadd.f32 %v2753_v46, %v2731_v59 }
 0x2ca   : > { %3135 = vrsqrt.f32 %v2593_v5  ;;  %vm2880_vm4 = vweird.f32 %v2593_v5 }
 0x2cf   : > { %v2595_v6 = vpop.f32.mrf.mxu3 }
 0x2d0   : > { %v3136_v50 = vpop.eup %3135  ;;  %v2596_v36 = vadd.f32 %v2595_v6, %v2573_v21 }
 0x2d1   : > { %v2875_v34 = vmul.f32 %v3136_v50, %v2593_v5  ;;  %vm2881_vm3 = vweird.f32 %v3136_v50  ;;  %v2710_v5 = vpop.f32.mrf.mxu0 }
 0x2d2   : > { %3137 = vrsqrt.f32 %v2596_v36  ;;  %vm2882_vm5 = vmor %vm2880_vm4, %vm2881_vm3  ;;  %vm2920_vm7 = vweird.f32 %v2596_v36 }
 0x2d3   : > { %v2876_v39 = vmul.f32 %v3136_v50, %v2875_v34 }
 0x2d5   : > { %v2877_v10 = vmul.f32 0.5, %v2876_v39  ;;  %v2983_v39 = vperm.slane %v6451_v42, 1 }
 0x2d7   : > { %v2878_v30 = vsub.f32 1.5, %v2877_v10 }
 0x2d8   : > { %v2684_v2 = vpop.f32.mrf.mxu3  ;;  %v3138_v17 = vpop.eup %3137 }
 0x2d9   : > { %v2879_v25 = vmul.f32 %v3136_v50, %v2878_v30  ;;  %v2685_v33 = vadd.f32 %v2684_v2, %v2662_v7  ;;  %v2915_v16 = vmul.f32 %v3138_v17, %v2596_v36  ;;  %vm2921_vm6 = vweird.f32 %v3138_v17  ;;  %v2756_v36 = vpop.f32.mrf.mxu2  ;;  %v2799_v56 = vpop.f32.mrf.mxu0 }
 0x2da   : > { %vm2922_vm8 = vmor %vm2920_vm7, %vm2921_vm6 }
 0x2db   : > { %v2883_v48 = vsel %vm2882_vm5, %v3136_v50, %v2879_v25  ;;  %3139 = vrsqrt.f32 %v2685_v33  ;;  %v2916_v62 = vmul.f32 %v3138_v17, %v2915_v16  ;;  %vm2890_vm10 = vweird.f32 %v2685_v33 }
 0x2dc   : > { %v2954_v47 = vmul.f32 %v2883_v48, %v5889_v43  ;;  %v2711_v50 = vadd.f32 1e-05, %v2710_v5 }
 0x2dd   : > { %v2917_v27 = vmul.f32 0.5, %v2916_v62 }
 0x2de   : > { %v2972_v29 = vmul.f32 %v2964_v40, %v2954_v47  ;;  %v2734_v61 = vadd.f32 %v2733_v35, %v2711_v50 }
 0x2df   : > { %v2918_v60 = vsub.f32 1.5, %v2917_v27  ;;  %v2966_v27 = vperm.slane %v6446_v37, 2 }
 0x2e0   : > { %v2990_v28 = vadd.f32 %v2982_v51, %v2972_v29  ;;  %v2687_v3 = vpop.f32.mrf.mxu3  ;;  %v2757_v20 = vadd.f32 %v2756_v36, %v2734_v61 }
 0x2e1   : > { %v3140_v43 = vpop.eup %3139  ;;  %v2688_v45 = vadd.f32 %v2687_v3, %v2665_v58  ;;  %v2919_v4 = vmul.f32 %v3138_v17, %v2918_v60  ;;  %v2984_v60 = vperm.slane %v6451_v42, 2  ;;  %v2822_v3 = vpop.f32.mrf.mxu1 }
 0x2e2   : > { %2998 = vst [vmem:[%s6461_s25] sm:$0xff] %v2990_v28  ;;  %v2885_v18 = vmul.f32 %v3140_v43, %v2685_v33  ;;  %vm2891_vm9 = vweird.f32 %v3140_v43  ;;  %v2802_v59 = vpop.f32.mrf.mxu0 }
 0x2e3   : > { %3141 = vrsqrt.f32 %v2688_v45  ;;  %v2923_v44 = vsel %vm2922_vm8, %v3138_v17, %v2919_v4  ;;  %vm2892_vm11 = vmor %vm2890_vm10, %vm2891_vm9  ;;  %vm2930_vm13 = vweird.f32 %v2688_v45 }
 0x2e4   : > { %v2886_v14 = vmul.f32 %v3140_v43, %v2885_v18  ;;  %v2958_v54 = vmul.f32 %v2923_v44, %v5937_v0  ;;  %v2965_v0 = vperm.slane %v6446_v37, 1  ;;  %v2800_v18 = vadd.f32 1e-05, %v2799_v56 }
 0x2e6   : > { %v2887_v23 = vmul.f32 0.5, %v2886_v14  ;;  %v2976_v15 = vmul.f32 %v2964_v40, %v2958_v54  ;;  %v2823_v44 = vadd.f32 %v2822_v3, %v2800_v18 }
 0x2e8   : > { %v2888_v63 = vsub.f32 1.5, %v2887_v23  ;;  %v2994_v38 = vadd.f32 %v2982_v51, %v2976_v15  ;;  %v2776_v24 = vpop.f32.mrf.mxu3 }
 0x2e9   : > { %v3142_v19 = vpop.eup %3141  ;;  %v2777_v21 = vadd.f32 %v2776_v24, %v2754_v53 }
 0x2ea   : > { %v2889_v49 = vmul.f32 %v3140_v43, %v2888_v63  ;;  %v2925_v32 = vmul.f32 %v3142_v19, %v2688_v45  ;;  %3002 = vst [vmem:[%s6461_s25 + $0x20] sm:$0xff] %v2994_v38  ;;  %vm2931_vm12 = vweird.f32 %v3142_v19  ;;  %v2845_v45 = vpop.f32.mrf.mxu2  ;;  %v2825_v63 = vpop.f32.mrf.mxu1 }
 0x2eb   : > { %3143 = vrsqrt.f32 %v2777_v21  ;;  %vm2932_vm14 = vmor %vm2930_vm13, %vm2931_vm12  ;;  %vm2900_vm0 = vweird.f32 %v2777_v21  ;;  %v2846_v54 = vadd.f32 %v2845_v45, %v2823_v44 }
 0x2ec   : > { %v2893_v6 = vsel %vm2892_vm11, %v3140_v43, %v2889_v49  ;;  %v2926_v34 = vmul.f32 %v3142_v19, %v2925_v32 }
 0x2ed   : > { %v2955_v31 = vmul.f32 %v2893_v6, %v5984_v55 }
 0x2ee   : > { %v2927_v26 = vmul.f32 0.5, %v2926_v34 }
 0x2ef   : > { %v2973_v10 = vmul.f32 %v2965_v0, %v2955_v31 }
 0x2f0   : > { %v2928_v7 = vsub.f32 1.5, %v2927_v26  ;;  %v2779_v2 = vpop.f32.mrf.mxu3 }
 0x2f1   : > { %v2991_v30 = vadd.f32 %v2983_v39, %v2973_v10  ;;  %v3144_v17 = vpop.eup %3143  ;;  %v2780_v25 = vadd.f32 %v2779_v2, %v2757_v20  ;;  %v2985_v20 = vperm.slane %v6451_v42, 3 }
 0x2f2   : > { %v2929_v41 = vmul.f32 %v3142_v19, %v2928_v7  ;;  %v2895_v33 = vmul.f32 %v3144_v17, %v2777_v21  ;;  %vm2901_vm15 = vweird.f32 %v3144_v17  ;;  %v2848_v38 = vpop.f32.mrf.mxu2 }
 0x2f3   : > { %2999 = vst [vmem:[%s6461_s25 + $0x8] sm:$0xff] %v2991_v30  ;;  %3145 = vrsqrt.f32 %v2780_v25  ;;  %vm2902_vm1 = vmor %vm2900_vm0, %vm2901_vm15  ;;  %vm2940_vm3 = vweird.f32 %v2780_v25 }
 0x2f4   : > { %v2933_v40 = vsel %vm2932_vm14, %v3142_v19, %v2929_v41  ;;  %v2896_v16 = vmul.f32 %v3144_v17, %v2895_v33  ;;  %v2803_v19 = vadd.f32 1e-05, %v2802_v59 }
 0x2f5   : > { %v2959_v55 = vmul.f32 %v2933_v40, %v6022_v13 }
 0x2f6   : > { %v2897_v48 = vmul.f32 0.5, %v2896_v16  ;;  %v2826_v24 = vadd.f32 %v2825_v63, %v2803_v19 }
 0x2f7   : > { %v2977_v1 = vmul.f32 %v2965_v0, %v2959_v55 }
 0x2f8   : > { %v2898_v51 = vsub.f32 1.5, %v2897_v48  ;;  %v2849_v49 = vadd.f32 %v2848_v38, %v2826_v24 }
 0x2f9   : > { %v2995_v47 = vadd.f32 %v2983_v39, %v2977_v1  ;;  %v3146_v62 = vpop.eup %3145  ;;  %v2967_v39 = vperm.slane %v6446_v37, 3 }
 0x2fa   : > { %v2899_v52 = vmul.f32 %v3144_v17, %v2898_v51  ;;  %v2935_v29 = vmul.f32 %v3146_v62, %v2780_v25  ;;  %vm2941_vm2 = vweird.f32 %v3146_v62 }
 0x2fb   : > { %3003 = vst [vmem:[%s6461_s25 + $0x28] sm:$0xff] %v2995_v47  ;;  %vm2942_vm4 = vmor %vm2940_vm3, %vm2941_vm2 }
 0x2fc   : > { %v2903_v58 = vsel %vm2902_vm1, %v3144_v17, %v2899_v52  ;;  %v2936_v28 = vmul.f32 %v3146_v62, %v2935_v29 }
 0x2fd   : > { %v2956_v13 = vmul.f32 %v2903_v58, %v6085_v8 }
 0x2fe   : > { %v2937_v43 = vmul.f32 0.5, %v2936_v28 }
 0x2ff   : > { %v2974_v22 = vmul.f32 %v2966_v27, %v2956_v13 }
 0x300   : > { %v2938_v4 = vsub.f32 1.5, %v2937_v43 }
 0x301   : > { %v2992_v46 = vadd.f32 %v2984_v60, %v2974_v22 }
 0x302   : > { %v2939_v9 = vmul.f32 %v3146_v62, %v2938_v4 }
 0x303   : > { %3000 = vst [vmem:[%s6461_s25 + $0x10] sm:$0xff] %v2992_v46 }
 0x304   : > { %v2943_v14 = vsel %vm2942_vm4, %v3146_v62, %v2939_v9 }
 0x305   : > { %v2960_v8 = vmul.f32 %v2943_v14, %v6139_v11 }
 0x307   : > { %v2978_v15 = vmul.f32 %v2966_v27, %v2960_v8 }
 0x308   : > { %v2868_v23 = vpop.f32.mrf.mxu3 }
 0x309   : > { %v2869_v53 = vadd.f32 %v2868_v23, %v2846_v54  ;;  %v2996_v5 = vadd.f32 %v2984_v60, %v2978_v15 }
 0x30b   : > { %3147 = vrsqrt.f32 %v2869_v53  ;;  %3004 = vst [vmem:[%s6461_s25 + $0x30] sm:$0xff] %v2996_v5  ;;  %vm2910_vm6 = vweird.f32 %v2869_v53 }
 0x310   : > { %v2871_v32 = vpop.f32.mrf.mxu3 }
 0x311   : > { %v3148_v21 = vpop.eup %3147  ;;  %v2872_v35 = vadd.f32 %v2871_v32, %v2849_v49 }
 0x312   : > { %v2905_v0 = vmul.f32 %v3148_v21, %v2869_v53  ;;  %vm2911_vm5 = vweird.f32 %v3148_v21 }
 0x313   : > { %3149 = vrsqrt.f32 %v2872_v35  ;;  %vm2912_vm7 = vmor %vm2910_vm6, %vm2911_vm5  ;;  %vm2950_vm9 = vweird.f32 %v2872_v35 }
 0x314   : > { %v2906_v50 = vmul.f32 %v3148_v21, %v2905_v0 }
 0x316   : > { %v2907_v6 = vmul.f32 0.5, %v2906_v50 }
 0x318   : > { %v2908_v11 = vsub.f32 1.5, %v2907_v6 }
 0x319   : > { %v3150_v34 = vpop.eup %3149 }
 0x31a   : > { %v2909_v36 = vmul.f32 %v3148_v21, %v2908_v11  ;;  %v2945_v31 = vmul.f32 %v3150_v34, %v2872_v35  ;;  %vm2951_vm8 = vweird.f32 %v3150_v34 }
 0x31b   : > { %vm2952_vm10 = vmor %vm2950_vm9, %vm2951_vm8 }
 0x31c   : > { %v2913_v61 = vsel %vm2912_vm7, %v3148_v21, %v2909_v36  ;;  %v2946_v26 = vmul.f32 %v3150_v34, %v2945_v31 }
 0x31d   : > { %v2957_v10 = vmul.f32 %v2913_v61, %v6248_v57 }
 0x31e   : > { %v2947_v7 = vmul.f32 0.5, %v2946_v26 }
 0x31f   : > { %v2975_v30 = vmul.f32 %v2967_v39, %v2957_v10 }
 0x320   : > { %v2948_v2 = vsub.f32 1.5, %v2947_v7 }
 0x321   : > { %v2993_v17 = vadd.f32 %v2985_v20, %v2975_v30 }
 0x322   : > { %v2949_v41 = vmul.f32 %v3150_v34, %v2948_v2 }
 0x323   : > { %3001 = vst [vmem:[%s6461_s25 + $0x18] sm:$0xff] %v2993_v17 }
 0x324   : > { %v2953_v25 = vsel %vm2952_vm10, %v3150_v34, %v2949_v41 }
 0x325   : > { %v2961_v33 = vmul.f32 %v2953_v25, %v6293_v12 }
 0x327   : > { %v2979_v37 = vmul.f32 %v2967_v39, %v2961_v33 }
 0x329   : > { %v2997_v40 = vadd.f32 %v2985_v20, %v2979_v37 }
 0x32b   : > { %3005 = vst [vmem:[%s6461_s25 + $0x38] sm:$0xff] %v2997_v40 }
 0x32c PF: > { %s17_s24 = sadd.s32 1, %s3166_s24  }
 0x32d   : > { %p14_p4 = scmp.ge.s32.totalorder %s17_s24, 4  }
 0x32f   :  { %16 = sbr.rel (!%p14_p4) target bundleno = 1 (0x1), region = 78 }

</bundles_post_ra>
